<compile_context>
chip_gen: v7x
topology: tpu7x:2x2x1
jax: 0.10.0
libtpu: 0.0.40
codegen_flags: <defaults>
</compile_context>

<pallas_src>
import functools

import jax
import jax.numpy as jnp
from jax.experimental import pallas as pl
from jax.experimental.pallas import tpu as pltpu

LANE = 128                       # all channel dims zero-padded to one full lane group
DW_DTYPE = jnp.bfloat16          # depthwise/SiLU path dtype; set jnp.float32 on v5e (no bf16 VPU)
VMEM_LIMIT = 64 * 1024 * 1024    # fits v7x (64 MiB physical); raise to ~100 MiB on v5e/v6e


def _pick_nb(n, rows_per_img, target_rows=128):
    """Images per grid step so the folded matmul M dim is ~128 (and divides the batch)."""
    nb = max(1, min(n, -(-target_rows // rows_per_img)))
    while n % nb:
        nb -= 1
    return nb


# ----------------------------------------------------------------------------
# Kernel 1: stem Conv3x3 stride-2 + folded-BN + SiLU.
#   Input is 4 stride-2 phase planes folded onto the channel axis (4*Cin), so all 9 taps are
#   unit-stride slices of the VMEM block.  The channel contraction is 9 MXU dots with f32
#   accumulation (review: stem was VALU-slot-bound); output is a lane-dense (NB, Ho*Wo, 128)
#   bf16 slab.
# ----------------------------------------------------------------------------
def _stem_kernel(ph_ref, w_ref, b_ref, o_ref, *, Ho, Wo, Cin, NB):
    M = NB * Ho * Wo
    CP = o_ref.shape[-1]
    ph = ph_ref[...]                                      # (NB, Ho+1, Wo+1, 4*Cin) bf16
    w = w_ref[...]                                        # (9*Cin, CP) bf16, loaded once
    acc = jnp.zeros((M, CP), jnp.float32)
    for dy in range(3):
        for dx in range(3):
            p = (dy % 2) * 2 + (dx % 2)
            tap = ph[:, dy // 2:dy // 2 + Ho, dx // 2:dx // 2 + Wo, p * Cin:(p + 1) * Cin]
            k = (dy * 3 + dx) * Cin
            acc = acc + jnp.dot(tap.reshape(M, Cin), w[k:k + Cin, :],
                                preferred_element_type=jnp.float32)
    y = acc + b_ref[...]
    o_ref[...] = (y * jax.nn.sigmoid(y)).reshape(NB, Ho * Wo, CP).astype(o_ref.dtype)


def stem_conv(x, params):
    """3x3 stride-2 pad-1 conv + folded BN + SiLU.  x: (N,H,W,Cin) bf16 NHWC."""
    N, H, W, Cin = x.shape
    assert H % 2 == 0 and W % 2 == 0
    Ho, Wo = H // 2, W // 2
    HWo = Ho * Wo
    xp = jnp.pad(x, ((0, 0), (1, 1), (1, 1), (0, 0)))
    # stride-2 phase decomposition (cheap XLA reshuffle, ~1x input traffic); phases folded onto
    # the channel axis so the kernel block stays 4-D and all taps are unit-stride.
    planes = [xp[:, a::2, c::2, :][:, :Ho + 1, :Wo + 1, :] for a in (0, 1) for c in (0, 1)]
    phases = jnp.concatenate(planes, axis=-1)             # (N, Ho+1, Wo+1, 4*Cin) bf16
    nb = _pick_nb(N, HWo)
    w, b = params["stem_w"], params["stem_b"]
    cost = pl.CostEstimate(
        flops=2 * N * HWo * 9 * Cin * LANE,
        transcendentals=N * HWo * LANE,
        bytes_accessed=phases.size * 2 + w.size * 2 + b.size * 4 + N * HWo * LANE * 2)
    return pl.pallas_call(
        functools.partial(_stem_kernel, Ho=Ho, Wo=Wo, Cin=Cin, NB=nb),
        out_shape=jax.ShapeDtypeStruct((N, HWo, LANE), jnp.bfloat16),
        grid=(N // nb,),
        in_specs=[
            pl.BlockSpec((nb, Ho + 1, Wo + 1, 4 * Cin), lambda n: (n, 0, 0, 0)),
            pl.BlockSpec(w.shape, lambda n: (0, 0)),
            pl.BlockSpec(b.shape, lambda n: (0, 0)),
        ],
        out_specs=pl.BlockSpec((nb, HWo, LANE), lambda n: (n, 0, 0)),
        compiler_params=pltpu.CompilerParams(
            dimension_semantics=("parallel",), vmem_limit_bytes=VMEM_LIMIT),
        cost_estimate=cost,
    )(phases, w, b)


# ----------------------------------------------------------------------------
# Kernel 2: fused MBConv block (expand 1x1 -> dw3x3 -> SE -> scale -> project 1x1 -> residual).
#   All matmuls are (NB*H*W, 128)x(128, 128) on the MXU with f32 accumulation; the depthwise
#   stage uses a persistent zero-haloed scratch (zeroed once) and ref-sliced taps; SE never
#   leaves VMEM.  One HBM read + one HBM write of the lane-dense activation per step.
# ----------------------------------------------------------------------------
def _mbconv_kernel(y_ref, ew_ref, eb_ref, dw_ref, db_ref,
                   s1w_ref, s1b_ref, s2w_ref, s2b_ref,
                   pw_ref, pb_ref, o_ref, epad_ref, *, NB, H, W):
    CP = y_ref.shape[-1]
    HW = H * W

    # Zero the padded dw scratch ONCE; scratch persists across grid steps, the halo stays zero,
    # and the interior is fully overwritten per image below (review: no per-step full zero fill).
    @pl.when(pl.program_id(0) == 0)
    def _():
        epad_ref[...] = jnp.zeros_like(epad_ref)

    y = y_ref[...].reshape(NB * HW, CP)                                   # bf16
    # --- expand 1x1 (MXU) + SiLU ---
    e = jnp.dot(y, ew_ref[...], preferred_element_type=jnp.float32) + eb_ref[...]
    e = e * jax.nn.sigmoid(e)
    e = e.astype(epad_ref.dtype).reshape(NB, H, W, CP)                    # bf16 dw path

    # --- depthwise 3x3 + SiLU; taps read from the ref (ld slot co-issues with the FMAs) ---
    dw = dw_ref[...]                                                      # (9, CP), loaded once
    db = db_ref[...]
    d_imgs = []
    for nbi in range(NB):
        epad_ref[1:H + 1, 1:W + 1, :] = e[nbi]
        acc = jnp.zeros((H, W, CP), epad_ref.dtype)
        for dx in range(3):
            col = epad_ref[:, dx:dx + W, :]                               # reused across dy
            for dy in range(3):
                k = dy * 3 + dx
                acc = acc + col[dy:dy + H] * dw[k:k + 1, :]
        d = acc.astype(jnp.float32) + db
        d_imgs.append(d * jax.nn.sigmoid(d))
    d2 = jnp.stack(d_imgs, axis=0).reshape(NB, HW, CP)                    # f32

    # --- squeeze-excite entirely in VMEM ---
    pooled = jnp.mean(d2, axis=1)                                         # (NB, CP)
    s = jnp.dot(pooled.astype(s1w_ref.dtype), s1w_ref[...],
                preferred_element_type=jnp.float32) + s1b_ref[...]
    s = s * jax.nn.sigmoid(s)
    s = jnp.dot(s.astype(s2w_ref.dtype), s2w_ref[...],
                preferred_element_type=jnp.float32) + s2b_ref[...]
    gate = jax.nn.sigmoid(s)                                              # (NB, CP)

    # --- SE scale + project 1x1 (MXU) + residual, fused ---
    dg = (d2 * gate[:, None, :]).astype(pw_ref.dtype).reshape(NB * HW, CP)
    p = jnp.dot(dg, pw_ref[...], preferred_element_type=jnp.float32) + pb_ref[...]
    out = p + y.astype(jnp.float32)
    o_ref[...] = out.reshape(NB, HW, CP).astype(o_ref.dtype)


def mbconv_block(y, params, H, W):
    N, HW, CP = y.shape
    assert HW == H * W and CP == LANE
    nb = _pick_nb(N, HW)
    args = (y,
            params["exp_w"], params["exp_b"], params["dw_w"], params["dw_b"],
            params["se1_w"], params["se1_b"], params["se2_w"], params["se2_b"],
            params["proj_w"], params["proj_b"])
    in_specs = [pl.BlockSpec((nb, HW, CP), lambda n: (n, 0, 0))]
    for a in args[1:]:
        in_specs.append(pl.BlockSpec(a.shape, lambda n: (0, 0)))
    cost = pl.CostEstimate(
        flops=4 * N * HW * CP * CP + 18 * N * HW * CP + 4 * N * CP * CP,
        transcendentals=4 * N * HW * CP,
        bytes_accessed=4 * N * HW * CP + 12 * CP * CP)
    return pl.pallas_call(
        functools.partial(_mbconv_kernel, NB=nb, H=H, W=W),
        out_shape=jax.ShapeDtypeStruct((N, HW, CP), jnp.bfloat16),
        grid=(N // nb,),
        in_specs=in_specs,
        out_specs=pl.BlockSpec((nb, HW, CP), lambda n: (n, 0, 0)),
        scratch_shapes=[pltpu.VMEM((H + 2, W + 2, CP), DW_DTYPE)],
        compiler_params=pltpu.CompilerParams(
            dimension_semantics=("parallel",), vmem_limit_bytes=VMEM_LIMIT),
        cost_estimate=cost,
    )(*args)


# ----------------------------------------------------------------------------
# Kernel 3: fused head 1x1 conv + SiLU + global-average-pool + Linear classifier.
#   2-D grid: batch ("parallel", shardable across v7x's 2 TCs) x row-chunk ("arbitrary"
#   reduction axis, innermost).  The per-batch-block (1,128) f32 accumulator lives in scratch,
#   zeroed at chunk 0 and turned into logits at the last chunk; the output block is a
#   lane-dense (1, 8, 128) slab (sliced to num_classes in the wrapper).
# ----------------------------------------------------------------------------
def _head_kernel(y_ref, hw_ref, hb_ref, cw_ref, cb_ref, o_ref, acc_ref, *, inv_hw):
    i = pl.program_id(1)

    @pl.when(i == 0)
    def _():
        acc_ref[...] = jnp.zeros_like(acc_ref)

    BH, CP = y_ref.shape[1], y_ref.shape[2]
    h = jnp.dot(y_ref[...].reshape(BH, CP), hw_ref[...],
                preferred_element_type=jnp.float32) + hb_ref[...]
    h = h * jax.nn.sigmoid(h)
    acc_ref[...] += jnp.sum(h, axis=0, keepdims=True)

    @pl.when(i == pl.num_programs(1) - 1)
    def _():
        feat = acc_ref[...] * inv_hw
        logits = jnp.dot(feat, cw_ref[...], preferred_element_type=jnp.float32) + cb_ref[...]
        o_ref[...] = jnp.broadcast_to(logits[:, None, :], o_ref.shape)


def head_gap_classify(y, params, num_classes):
    N, HW, CP = y.shape
    # Row chunk: 32 here exercises the reduction axis; at real B4 resolution size this to VMEM.
    BH = 32 if HW % 32 == 0 else HW
    hw_, hb_ = params["head_w"], params["head_b"]
    cw_, cb_ = params["cls_w"], params["cls_b"]
    cost = pl.CostEstimate(
        flops=2 * N * HW * CP * CP + 2 * N * CP * CP,
        transcendentals=N * HW * CP,
        bytes_accessed=N * HW * CP * 2 + 4 * CP * CP + N * 8 * CP * 4)
    out = pl.pallas_call(
        functools.partial(_head_kernel, inv_hw=1.0 / float(HW)),
        out_shape=jax.ShapeDtypeStruct((N, 8, LANE), jnp.float32),
        grid=(N, HW // BH),
        in_specs=[
            pl.BlockSpec((1, BH, CP), lambda b, i: (b, i, 0)),
            pl.BlockSpec(hw_.shape, lambda b, i: (0, 0)),
            pl.BlockSpec(hb_.shape, lambda b, i: (0, 0)),
            pl.BlockSpec(cw_.shape, lambda b, i: (0, 0)),
            pl.BlockSpec(cb_.shape, lambda b, i: (0, 0)),
        ],
        out_specs=pl.BlockSpec((1, 8, LANE), lambda b, i: (b, 0, 0)),
        scratch_shapes=[pltpu.VMEM((1, LANE), jnp.float32)],
        compiler_params=pltpu.CompilerParams(
            dimension_semantics=("parallel", "arbitrary"), vmem_limit_bytes=VMEM_LIMIT),
        cost_estimate=cost,
    )(y, hw_, hb_, cw_, cb_)
    return out[:, 0, :num_classes]


# ----------------------------------------------------------------------------
# deterministic parameters (BatchNorm folded, eval mode), zero-padded to 128 lanes
# ----------------------------------------------------------------------------
def _fold_bn(w, gamma, beta, mean, var, eps=1e-3):
    scale = gamma / jnp.sqrt(var + eps)
    return w * scale[None, :], beta - mean * scale


def _pad2(a, rows, cols):
    return jnp.pad(a, ((0, rows - a.shape[0]), (0, cols - a.shape[1])))


def _padb(b):
    return jnp.pad(b, (0, LANE - b.shape[0])).reshape(1, LANE).astype(jnp.float32)


def init_params(key, num_classes=3, c_in=3, c_stem=16, expand=4, c_head=32):
    keys = iter(jax.random.split(key, 48))

    def rnd(shape, std=0.1):
        return std * jax.random.normal(next(keys), shape, jnp.float32)

    def bn(c):
        gamma = 1.0 + 0.1 * jax.random.normal(next(keys), (c,), jnp.float32)
        beta = 0.05 * jax.random.normal(next(keys), (c,), jnp.float32)
        mean = 0.05 * jax.random.normal(next(keys), (c,), jnp.float32)
        var = 1.0 + 0.1 * jax.random.uniform(next(keys), (c,), jnp.float32)
        return gamma, beta, mean, var

    c_mid = c_stem * expand
    c_se = max(1, c_stem // 4)
    p = {}
    # Zero padding of weight rows/cols + zero bias padding keeps padded lanes exactly 0 through
    # SiLU/SE/residual, so the padded-lane math is identical to the un-padded model.
    w, b = _fold_bn(rnd((9 * c_in, c_stem)), *bn(c_stem))
    p["stem_w"], p["stem_b"] = _pad2(w, 9 * c_in, LANE).astype(jnp.bfloat16), _padb(b)
    w, b = _fold_bn(rnd((c_stem, c_mid)), *bn(c_mid))
    p["exp_w"], p["exp_b"] = _pad2(w, LANE, LANE).astype(jnp.bfloat16), _padb(b)
    w, b = _fold_bn(rnd((9, c_mid)), *bn(c_mid))
    p["dw_w"], p["dw_b"] = _pad2(w, 9, LANE).astype(DW_DTYPE), _padb(b)
    p["se1_w"], p["se1_b"] = _pad2(rnd((c_mid, c_se)), LANE, LANE).astype(jnp.bfloat16), _padb(rnd((c_se,), 0.01))
    p["se2_w"], p["se2_b"] = _pad2(rnd((c_se, c_mid)), LANE, LANE).astype(jnp.bfloat16), _padb(rnd((c_mid,), 0.01))
    w, b = _fold_bn(rnd((c_mid, c_stem)), *bn(c_stem))
    p["proj_w"], p["proj_b"] = _pad2(w, LANE, LANE).astype(jnp.bfloat16), _padb(b)
    w, b = _fold_bn(rnd((c_stem, c_head)), *bn(c_head))
    p["head_w"], p["head_b"] = _pad2(w, LANE, LANE).astype(jnp.bfloat16), _padb(b)
    p["cls_w"], p["cls_b"] = _pad2(rnd((c_head, num_classes)), LANE, LANE), _padb(rnd((num_classes,), 0.01))
    return p


# ----------------------------------------------------------------------------
# forward pass  (FishClassifier.forward equivalent, eval mode)
# ----------------------------------------------------------------------------
def fish_classifier_forward(x_nchw, params, num_classes=3):
    # Accept PyTorch NCHW; run in NHWC-derived lane-dense layouts, bf16 activations with f32
    # accumulation.  Dropout(p=0.4) in the torch classifier is identity in eval mode.
    # TODO(synk): pretrained EfficientNet-B4 backbone (32 MBConv stages, ImageNet weights) is
    # represented by this reduced deterministic stem + MBConv + head stack.
    N, _, H, W = x_nchw.shape
    x = jnp.transpose(x_nchw, (0, 2, 3, 1)).astype(jnp.bfloat16)
    Ho, Wo = H // 2, W // 2
    y = stem_conv(x, params)                      # (N, Ho*Wo, 128) bf16
    y = mbconv_block(y, params, Ho, Wo)           # (N, Ho*Wo, 128) bf16
    return head_gap_classify(y, params, num_classes)


# ----------------------------------------------------------------------------
if __name__ == "__main__":
    key = jax.random.PRNGKey(0)
    kx, kp = jax.random.split(key)
    x = jax.random.normal(kx, (2, 3, 16, 16), jnp.float32)    # NCHW, like PyTorch
    params = init_params(kp, num_classes=3)

    logits = jax.jit(fish_classifier_forward)(x, params)
    jax.block_until_ready(logits)

    assert logits.shape == (2, 3), logits.shape
    assert logits.dtype == jnp.float32
    assert bool(jnp.all(jnp.isfinite(logits)))
    print("KERNEL_OK")
</pallas_src>

<mosaic_0001>
module attributes {stable_mosaic.version = 11 : i64} {
  func.func @_stem_kernel(%arg0: i32, %arg1: memref<2x9x9x12xbf16, #tpu.memory_space<vmem>>, %arg2: memref<27x128xbf16, #tpu.memory_space<vmem>>, %arg3: memref<1x128xf32, #tpu.memory_space<vmem>>, %arg4: memref<2x64x128xbf16, #tpu.memory_space<vmem>>) attributes {dimension_semantics = [#tpu.dimension_semantics<parallel>], iteration_bounds = array<i64: 1>, scalar_prefetch = 0 : i64, scratch_operands = 0 : i64, tpu.core_type = #tpu.core_type<tc>, window_params = [{transform_indices = @transform_0, window_bounds = array<i64: 2, 9, 9, 12>}, {pipeline_mode = #tpu.pipeline_mode<synchronous>, transform_indices = @transform_1, window_bounds = array<i64: 27, 128>}, {pipeline_mode = #tpu.pipeline_mode<synchronous>, transform_indices = @transform_2, window_bounds = array<i64: 1, 128>}, {transform_indices = @transform_3, window_bounds = array<i64: 2, 64, 128>}]} {
    %c0 = arith.constant 0 : index
    %c0_0 = arith.constant 0 : index
    %c0_1 = arith.constant 0 : index
    %c0_2 = arith.constant 0 : index
    %0 = vector.load %arg1[%c0, %c0_0, %c0_1, %c0_2] : memref<2x9x9x12xbf16, #tpu.memory_space<vmem>>, vector<2x9x9x12xbf16>
    %c0_3 = arith.constant 0 : index
    %c0_4 = arith.constant 0 : index
    %1 = vector.load %arg2[%c0_3, %c0_4] : memref<27x128xbf16, #tpu.memory_space<vmem>>, vector<27x128xbf16>
    %cst = arith.constant 0.000000e+00 : f32
    %2 = vector.broadcast %cst : f32 to vector<128x128xf32>
    %3 = vector.extract_strided_slice %0 {offsets = [0, 0, 0, 0], sizes = [2, 8, 8, 3], strides = [1, 1, 1, 1]} : vector<2x9x9x12xbf16> to vector<2x8x8x3xbf16>
    %4 = vector.shape_cast %3 : vector<2x8x8x3xbf16> to vector<128x3xbf16>
    %5 = vector.extract_strided_slice %1 {offsets = [0, 0], sizes = [3, 128], strides = [1, 1]} : vector<27x128xbf16> to vector<3x128xbf16>
    %cst_5 = arith.constant dense<0.000000e+00> : vector<128x128xf32>
    %6 = tpu.matmul %4, %5, %cst_5 {dimension_numbers = #tpu.dot_dimension_numbers<[1], [0], [0], [1], [0, 0, 1, 1], [], []>} : vector<128x3xbf16>, vector<3x128xbf16>, vector<128x128xf32> -> vector<128x128xf32>
    %7 = arith.addf %2, %6 : vector<128x128xf32>
    %8 = vector.extract_strided_slice %0 {offsets = [0, 0, 0, 3], sizes = [2, 8, 8, 3], strides = [1, 1, 1, 1]} : vector<2x9x9x12xbf16> to vector<2x8x8x3xbf16>
    %9 = vector.shape_cast %8 : vector<2x8x8x3xbf16> to vector<128x3xbf16>
    %10 = vector.extract_strided_slice %1 {offsets = [3, 0], sizes = [3, 128], strides = [1, 1]} : vector<27x128xbf16> to vector<3x128xbf16>
    %cst_6 = arith.constant dense<0.000000e+00> : vector<128x128xf32>
    %11 = tpu.matmul %9, %10, %cst_6 {dimension_numbers = #tpu.dot_dimension_numbers<[1], [0], [0], [1], [0, 0, 1, 1], [], []>} : vector<128x3xbf16>, vector<3x128xbf16>, vector<128x128xf32> -> vector<128x128xf32>
    %12 = arith.addf %7, %11 : vector<128x128xf32>
    %13 = vector.extract_strided_slice %0 {offsets = [0, 0, 1, 0], sizes = [2, 8, 8, 3], strides = [1, 1, 1, 1]} : vector<2x9x9x12xbf16> to vector<2x8x8x3xbf16>
    %14 = vector.shape_cast %13 : vector<2x8x8x3xbf16> to vector<128x3xbf16>
    %15 = vector.extract_strided_slice %1 {offsets = [6, 0], sizes = [3, 128], strides = [1, 1]} : vector<27x128xbf16> to vector<3x128xbf16>
    %cst_7 = arith.constant dense<0.000000e+00> : vector<128x128xf32>
    %16 = tpu.matmul %14, %15, %cst_7 {dimension_numbers = #tpu.dot_dimension_numbers<[1], [0], [0], [1], [0, 0, 1, 1], [], []>} : vector<128x3xbf16>, vector<3x128xbf16>, vector<128x128xf32> -> vector<128x128xf32>
    %17 = arith.addf %12, %16 : vector<128x128xf32>
    %18 = vector.extract_strided_slice %0 {offsets = [0, 0, 0, 6], sizes = [2, 8, 8, 3], strides = [1, 1, 1, 1]} : vector<2x9x9x12xbf16> to vector<2x8x8x3xbf16>
    %19 = vector.shape_cast %18 : vector<2x8x8x3xbf16> to vector<128x3xbf16>
    %20 = vector.extract_strided_slice %1 {offsets = [9, 0], sizes = [3, 128], strides = [1, 1]} : vector<27x128xbf16> to vector<3x128xbf16>
    %cst_8 = arith.constant dense<0.000000e+00> : vector<128x128xf32>
    %21 = tpu.matmul %19, %20, %cst_8 {dimension_numbers = #tpu.dot_dimension_numbers<[1], [0], [0], [1], [0, 0, 1, 1], [], []>} : vector<128x3xbf16>, vector<3x128xbf16>, vector<128x128xf32> -> vector<128x128xf32>
    %22 = arith.addf %17, %21 : vector<128x128xf32>
    %23 = vector.extract_strided_slice %0 {offsets = [0, 0, 0, 9], sizes = [2, 8, 8, 3], strides = [1, 1, 1, 1]} : vector<2x9x9x12xbf16> to vector<2x8x8x3xbf16>
    %24 = vector.shape_cast %23 : vector<2x8x8x3xbf16> to vector<128x3xbf16>
    %25 = vector.extract_strided_slice %1 {offsets = [12, 0], sizes = [3, 128], strides = [1, 1]} : vector<27x128xbf16> to vector<3x128xbf16>
    %cst_9 = arith.constant dense<0.000000e+00> : vector<128x128xf32>
    %26 = tpu.matmul %24, %25, %cst_9 {dimension_numbers = #tpu.dot_dimension_numbers<[1], [0], [0], [1], [0, 0, 1, 1], [], []>} : vector<128x3xbf16>, vector<3x128xbf16>, vector<128x128xf32> -> vector<128x128xf32>
    %27 = arith.addf %22, %26 : vector<128x128xf32>
    %28 = vector.extract_strided_slice %0 {offsets = [0, 0, 1, 6], sizes = [2, 8, 8, 3], strides = [1, 1, 1, 1]} : vector<2x9x9x12xbf16> to vector<2x8x8x3xbf16>
    %29 = vector.shape_cast %28 : vector<2x8x8x3xbf16> to vector<128x3xbf16>
    %30 = vector.extract_strided_slice %1 {offsets = [15, 0], sizes = [3, 128], strides = [1, 1]} : vector<27x128xbf16> to vector<3x128xbf16>
    %cst_10 = arith.constant dense<0.000000e+00> : vector<128x128xf32>
    %31 = tpu.matmul %29, %30, %cst_10 {dimension_numbers = #tpu.dot_dimension_numbers<[1], [0], [0], [1], [0, 0, 1, 1], [], []>} : vector<128x3xbf16>, vector<3x128xbf16>, vector<128x128xf32> -> vector<128x128xf32>
    %32 = arith.addf %27, %31 : vector<128x128xf32>
    %33 = vector.extract_strided_slice %0 {offsets = [0, 1, 0, 0], sizes = [2, 8, 8, 3], strides = [1, 1, 1, 1]} : vector<2x9x9x12xbf16> to vector<2x8x8x3xbf16>
    %34 = vector.shape_cast %33 : vector<2x8x8x3xbf16> to vector<128x3xbf16>
    %35 = vector.extract_strided_slice %1 {offsets = [18, 0], sizes = [3, 128], strides = [1, 1]} : vector<27x128xbf16> to vector<3x128xbf16>
    %cst_11 = arith.constant dense<0.000000e+00> : vector<128x128xf32>
    %36 = tpu.matmul %34, %35, %cst_11 {dimension_numbers = #tpu.dot_dimension_numbers<[1], [0], [0], [1], [0, 0, 1, 1], [], []>} : vector<128x3xbf16>, vector<3x128xbf16>, vector<128x128xf32> -> vector<128x128xf32>
    %37 = arith.addf %32, %36 : vector<128x128xf32>
    %38 = vector.extract_strided_slice %0 {offsets = [0, 1, 0, 3], sizes = [2, 8, 8, 3], strides = [1, 1, 1, 1]} : vector<2x9x9x12xbf16> to vector<2x8x8x3xbf16>
    %39 = vector.shape_cast %38 : vector<2x8x8x3xbf16> to vector<128x3xbf16>
    %40 = vector.extract_strided_slice %1 {offsets = [21, 0], sizes = [3, 128], strides = [1, 1]} : vector<27x128xbf16> to vector<3x128xbf16>
    %cst_12 = arith.constant dense<0.000000e+00> : vector<128x128xf32>
    %41 = tpu.matmul %39, %40, %cst_12 {dimension_numbers = #tpu.dot_dimension_numbers<[1], [0], [0], [1], [0, 0, 1, 1], [], []>} : vector<128x3xbf16>, vector<3x128xbf16>, vector<128x128xf32> -> vector<128x128xf32>
    %42 = arith.addf %37, %41 : vector<128x128xf32>
    %43 = vector.extract_strided_slice %0 {offsets = [0, 1, 1, 0], sizes = [2, 8, 8, 3], strides = [1, 1, 1, 1]} : vector<2x9x9x12xbf16> to vector<2x8x8x3xbf16>
    %44 = vector.shape_cast %43 : vector<2x8x8x3xbf16> to vector<128x3xbf16>
    %45 = vector.extract_strided_slice %1 {offsets = [24, 0], sizes = [3, 128], strides = [1, 1]} : vector<27x128xbf16> to vector<3x128xbf16>
    %cst_13 = arith.constant dense<0.000000e+00> : vector<128x128xf32>
    %46 = tpu.matmul %44, %45, %cst_13 {dimension_numbers = #tpu.dot_dimension_numbers<[1], [0], [0], [1], [0, 0, 1, 1], [], []>} : vector<128x3xbf16>, vector<3x128xbf16>, vector<128x128xf32> -> vector<128x128xf32>
    %47 = arith.addf %42, %46 : vector<128x128xf32>
    %c0_14 = arith.constant 0 : index
    %c0_15 = arith.constant 0 : index
    %48 = vector.load %arg3[%c0_14, %c0_15] : memref<1x128xf32, #tpu.memory_space<vmem>>, vector<1x128xf32>
    %49 = vector.broadcast %48 : vector<1x128xf32> to vector<128x128xf32>
    %50 = arith.addf %47, %49 : vector<128x128xf32>
    %51 = arith.negf %50 : vector<128x128xf32>
    %52 = math.exp %51 : vector<128x128xf32>
    %cst_16 = arith.constant 1.000000e+00 : f32
    %53 = vector.broadcast %cst_16 : f32 to vector<128x128xf32>
    %54 = arith.addf %53, %52 : vector<128x128xf32>
    %55 = arith.divf %53, %54 : vector<128x128xf32>
    %56 = arith.mulf %50, %55 : vector<128x128xf32>
    %57 = vector.shape_cast %56 : vector<128x128xf32> to vector<2x64x128xf32>
    %58 = arith.truncf %57 : vector<2x64x128xf32> to vector<2x64x128xbf16>
    %c0_17 = arith.constant 0 : index
    %c0_18 = arith.constant 0 : index
    %c0_19 = arith.constant 0 : index
    %59 = vector.load %arg4[%c0_17, %c0_18, %c0_19] : memref<2x64x128xbf16, #tpu.memory_space<vmem>>, vector<2x64x128xbf16>
    tpu.vector_store %arg4[%c0_17, %c0_18, %c0_19], %58 {strides = array<i32>} : memref<2x64x128xbf16, #tpu.memory_space<vmem>>, vector<2x64x128xbf16>,
    return
  }
  func.func @transform_0(%arg0: i32) -> (i32, i32, i32, i32) {
    %c0_i32 = arith.constant 0 : i32
    %c0_i32_0 = arith.constant 0 : i32
    %c0_i32_1 = arith.constant 0 : i32
    %c0_i32_2 = arith.constant 0 : i32
    return %arg0, %c0_i32, %c0_i32_0, %c0_i32_1 : i32, i32, i32, i32
  }
  func.func @transform_1(%arg0: i32) -> (i32, i32) {
    %c0_i32 = arith.constant 0 : i32
    %c0_i32_0 = arith.constant 0 : i32
    %c0_i32_1 = arith.constant 0 : i32
    return %c0_i32, %c0_i32_0 : i32, i32
  }
  func.func @transform_2(%arg0: i32) -> (i32, i32) {
    %c0_i32 = arith.constant 0 : i32
    %c0_i32_0 = arith.constant 0 : i32
    %c0_i32_1 = arith.constant 0 : i32
    return %c0_i32, %c0_i32_0 : i32, i32
  }
  func.func @transform_3(%arg0: i32) -> (i32, i32, i32) {
    %c0_i32 = arith.constant 0 : i32
    %c0_i32_0 = arith.constant 0 : i32
    %c0_i32_1 = arith.constant 0 : i32
    return %arg0, %c0_i32, %c0_i32_0 : i32, i32, i32
  }
}

module attributes {stable_mosaic.version = 11 : i64} {
  func.func @_head_kernel(%arg0: i32, %arg1: i32, %arg2: memref<1x32x128xbf16, #tpu.memory_space<vmem>>, %arg3: memref<128x128xbf16, #tpu.memory_space<vmem>>, %arg4: memref<1x128xf32, #tpu.memory_space<vmem>>, %arg5: memref<128x128xf32, #tpu.memory_space<vmem>>, %arg6: memref<1x128xf32, #tpu.memory_space<vmem>>, %arg7: memref<1x8x128xf32, #tpu.memory_space<vmem>>, %arg8: memref<1x128xf32, #tpu.memory_space<vmem>>) attributes {dimension_semantics = [#tpu.dimension_semantics<parallel>, #tpu.dimension_semantics<arbitrary>], iteration_bounds = array<i64: 2, 2>, scalar_prefetch = 0 : i64, scratch_operands = 1 : i64, tpu.core_type = #tpu.core_type<tc>, window_params = [{transform_indices = @transform_0, window_bounds = array<i64: 1, 32, 128>}, {pipeline_mode = #tpu.pipeline_mode<synchronous>, transform_indices = @transform_1, window_bounds = array<i64: 128, 128>}, {pipeline_mode = #tpu.pipeline_mode<synchronous>, transform_indices = @transform_2, window_bounds = array<i64: 1, 128>}, {pipeline_mode = #tpu.pipeline_mode<synchronous>, transform_indices = @transform_3, window_bounds = array<i64: 128, 128>}, {pipeline_mode = #tpu.pipeline_mode<synchronous>, transform_indices = @transform_4, window_bounds = array<i64: 1, 128>}, {transform_indices = @transform_5, window_bounds = array<i64: 1, 8, 128>}]} {
    %c0_i32 = arith.constant 0 : i32
    %0 = arith.cmpi eq, %arg1, %c0_i32 : i32
    %1 = arith.extui %0 : i1 to i32
    %c0_i32_0 = arith.constant 0 : i32
    %2 = arith.cmpi ne, %1, %c0_i32_0 : i32
    scf.if %2 {
      %cst_14 = arith.constant 0.000000e+00 : f32
      %24 = vector.broadcast %cst_14 : f32 to vector<1x128xf32>
      %c0_15 = arith.constant 0 : index
      %c0_16 = arith.constant 0 : index
      %25 = vector.load %arg8[%c0_15, %c0_16] : memref<1x128xf32, #tpu.memory_space<vmem>>, vector<1x128xf32>
      tpu.vector_store %arg8[%c0_15, %c0_16], %24 {strides = array<i32>} : memref<1x128xf32, #tpu.memory_space<vmem>>, vector<1x128xf32>,
    } else {
    }
    %c0 = arith.constant 0 : index
    %c0_1 = arith.constant 0 : index
    %c0_2 = arith.constant 0 : index
    %3 = vector.load %arg2[%c0, %c0_1, %c0_2] : memref<1x32x128xbf16, #tpu.memory_space<vmem>>, vector<1x32x128xbf16>
    %4 = vector.shape_cast %3 : vector<1x32x128xbf16> to vector<32x128xbf16>
    %c0_3 = arith.constant 0 : index
    %c0_4 = arith.constant 0 : index
    %5 = vector.load %arg3[%c0_3, %c0_4] : memref<128x128xbf16, #tpu.memory_space<vmem>>, vector<128x128xbf16>
    %cst = arith.constant dense<0.000000e+00> : vector<32x128xf32>
    %6 = tpu.matmul %4, %5, %cst {dimension_numbers = #tpu.dot_dimension_numbers<[1], [0], [0], [1], [0, 0, 1, 1], [], []>} : vector<32x128xbf16>, vector<128x128xbf16>, vector<32x128xf32> -> vector<32x128xf32>
    %c0_5 = arith.constant 0 : index
    %c0_6 = arith.constant 0 : index
    %7 = vector.load %arg4[%c0_5, %c0_6] : memref<1x128xf32, #tpu.memory_space<vmem>>, vector<1x128xf32>
    %8 = vector.broadcast %7 : vector<1x128xf32> to vector<32x128xf32>
    %9 = arith.addf %6, %8 : vector<32x128xf32>
    %10 = arith.negf %9 : vector<32x128xf32>
    %11 = math.exp %10 : vector<32x128xf32>
    %cst_7 = arith.constant 1.000000e+00 : f32
    %12 = vector.broadcast %cst_7 : f32 to vector<32x128xf32>
    %13 = arith.addf %12, %11 : vector<32x128xf32>
    %14 = arith.divf %12, %13 : vector<32x128xf32>
    %15 = arith.mulf %9, %14 : vector<32x128xf32>
    %c0_8 = arith.constant 0 : index
    %c0_9 = arith.constant 0 : index
    %16 = vector.load %arg8[%c0_8, %c0_9] : memref<1x128xf32, #tpu.memory_space<vmem>>, vector<1x128xf32>
    %cst_10 = arith.constant dense<0.000000e+00> : vector<128xf32>
    %17 = vector.multi_reduction <add>, %15, %cst_10 [0] : vector<32x128xf32> to vector<128xf32>
    %18 = vector.shape_cast %17 : vector<128xf32> to vector<1x128xf32>
    %19 = arith.addf %16, %18 : vector<1x128xf32>
    %c0_11 = arith.constant 0 : index
    %c0_12 = arith.constant 0 : index
    %20 = vector.load %arg8[%c0_11, %c0_12] : memref<1x128xf32, #tpu.memory_space<vmem>>, vector<1x128xf32>
    tpu.vector_store %arg8[%c0_11, %c0_12], %19 {strides = array<i32>} : memref<1x128xf32, #tpu.memory_space<vmem>>, vector<1x128xf32>,
    %c1_i32 = arith.constant 1 : i32
    %21 = arith.cmpi eq, %arg1, %c1_i32 : i32
    %22 = arith.extui %21 : i1 to i32
    %c0_i32_13 = arith.constant 0 : i32
    %23 = arith.cmpi ne, %22, %c0_i32_13 : i32
    scf.if %23 {
      %c0_14 = arith.constant 0 : index
      %c0_15 = arith.constant 0 : index
      %24 = vector.load %arg8[%c0_14, %c0_15] : memref<1x128xf32, #tpu.memory_space<vmem>>, vector<1x128xf32>
      %cst_16 = arith.constant 1.562500e-02 : f32
      %25 = vector.broadcast %cst_16 : f32 to vector<1x128xf32>
      %26 = arith.mulf %24, %25 : vector<1x128xf32>
      %c0_17 = arith.constant 0 : index
      %c0_18 = arith.constant 0 : index
      %27 = vector.load %arg5[%c0_17, %c0_18] : memref<128x128xf32, #tpu.memory_space<vmem>>, vector<128x128xf32>
      %cst_19 = arith.constant dense<0.000000e+00> : vector<1x128xf32>
      %28 = tpu.matmul %26, %27, %cst_19 {dimension_numbers = #tpu.dot_dimension_numbers<[1], [0], [0], [1], [0, 0, 1, 1], [], []>} : vector<1x128xf32>, vector<128x128xf32>, vector<1x128xf32> -> vector<1x128xf32>
      %c0_20 = arith.constant 0 : index
      %c0_21 = arith.constant 0 : index
      %29 = vector.load %arg6[%c0_20, %c0_21] : memref<1x128xf32, #tpu.memory_space<vmem>>, vector<1x128xf32>
      %30 = arith.addf %28, %29 : vector<1x128xf32>
      %31 = vector.shape_cast %30 : vector<1x128xf32> to vector<1x1x128xf32>
      %32 = vector.shape_cast %31 : vector<1x1x128xf32> to vector<1x1x128xf32>
      %33 = vector.broadcast %32 : vector<1x1x128xf32> to vector<1x8x128xf32>
      %c0_22 = arith.constant 0 : index
      %c0_23 = arith.constant 0 : index
      %c0_24 = arith.constant 0 : index
      %34 = vector.load %arg7[%c0_22, %c0_23, %c0_24] : memref<1x8x128xf32, #tpu.memory_space<vmem>>, vector<1x8x128xf32>
      tpu.vector_store %arg7[%c0_22, %c0_23, %c0_24], %33 {strides = array<i32>} : memref<1x8x128xf32, #tpu.memory_space<vmem>>, vector<1x8x128xf32>,
    } else {
    }
    return
  }
  func.func @transform_0(%arg0: i32, %arg1: i32) -> (i32, i32, i32) {
    %c0_i32 = arith.constant 0 : i32
    %c0_i32_0 = arith.constant 0 : i32
    return %arg0, %arg1, %c0_i32 : i32, i32, i32
  }
  func.func @transform_1(%arg0: i32, %arg1: i32) -> (i32, i32) {
    %c0_i32 = arith.constant 0 : i32
    %c0_i32_0 = arith.constant 0 : i32
    %c0_i32_1 = arith.constant 0 : i32
    return %c0_i32, %c0_i32_0 : i32, i32
  }
  func.func @transform_2(%arg0: i32, %arg1: i32) -> (i32, i32) {
    %c0_i32 = arith.constant 0 : i32
    %c0_i32_0 = arith.constant 0 : i32
    %c0_i32_1 = arith.constant 0 : i32
    return %c0_i32, %c0_i32_0 : i32, i32
  }
  func.func @transform_3(%arg0: i32, %arg1: i32) -> (i32, i32) {
    %c0_i32 = arith.constant 0 : i32
    %c0_i32_0 = arith.constant 0 : i32
    %c0_i32_1 = arith.constant 0 : i32
    return %c0_i32, %c0_i32_0 : i32, i32
  }
  func.func @transform_4(%arg0: i32, %arg1: i32) -> (i32, i32) {
    %c0_i32 = arith.constant 0 : i32
    %c0_i32_0 = arith.constant 0 : i32
    %c0_i32_1 = arith.constant 0 : i32
    return %c0_i32, %c0_i32_0 : i32, i32
  }
  func.func @transform_5(%arg0: i32, %arg1: i32) -> (i32, i32, i32) {
    %c0_i32 = arith.constant 0 : i32
    %c0_i32_0 = arith.constant 0 : i32
    %c0_i32_1 = arith.constant 0 : i32
    return %arg0, %c0_i32, %c0_i32_0 : i32, i32, i32
  }
}

module attributes {stable_mosaic.version = 11 : i64} {
  func.func @_mbconv_kernel(%arg0: i32, %arg1: memref<2x64x128xbf16, #tpu.memory_space<vmem>>, %arg2: memref<128x128xbf16, #tpu.memory_space<vmem>>, %arg3: memref<1x128xf32, #tpu.memory_space<vmem>>, %arg4: memref<9x128xbf16, #tpu.memory_space<vmem>>, %arg5: memref<1x128xf32, #tpu.memory_space<vmem>>, %arg6: memref<128x128xbf16, #tpu.memory_space<vmem>>, %arg7: memref<1x128xf32, #tpu.memory_space<vmem>>, %arg8: memref<128x128xbf16, #tpu.memory_space<vmem>>, %arg9: memref<1x128xf32, #tpu.memory_space<vmem>>, %arg10: memref<128x128xbf16, #tpu.memory_space<vmem>>, %arg11: memref<1x128xf32, #tpu.memory_space<vmem>>, %arg12: memref<2x64x128xbf16, #tpu.memory_space<vmem>>, %arg13: memref<10x10x128xbf16, #tpu.memory_space<vmem>>) attributes {dimension_semantics = [#tpu.dimension_semantics<parallel>], iteration_bounds = array<i64: 1>, scalar_prefetch = 0 : i64, scratch_operands = 1 : i64, tpu.core_type = #tpu.core_type<tc>, window_params = [{transform_indices = @transform_0, window_bounds = array<i64: 2, 64, 128>}, {pipeline_mode = #tpu.pipeline_mode<synchronous>, transform_indices = @transform_1, window_bounds = array<i64: 128, 128>}, {pipeline_mode = #tpu.pipeline_mode<synchronous>, transform_indices = @transform_2, window_bounds = array<i64: 1, 128>}, {pipeline_mode = #tpu.pipeline_mode<synchronous>, transform_indices = @transform_3, window_bounds = array<i64: 9, 128>}, {pipeline_mode = #tpu.pipeline_mode<synchronous>, transform_indices = @transform_4, window_bounds = array<i64: 1, 128>}, {pipeline_mode = #tpu.pipeline_mode<synchronous>, transform_indices = @transform_5, window_bounds = array<i64: 128, 128>}, {pipeline_mode = #tpu.pipeline_mode<synchronous>, transform_indices = @transform_6, window_bounds = array<i64: 1, 128>}, {pipeline_mode = #tpu.pipeline_mode<synchronous>, transform_indices = @transform_7, window_bounds = array<i64: 128, 128>}, {pipeline_mode = #tpu.pipeline_mode<synchronous>, transform_indices = @transform_8, window_bounds = array<i64: 1, 128>}, {pipeline_mode = #tpu.pipeline_mode<synchronous>, transform_indices = @transform_9, window_bounds = array<i64: 128, 128>}, {pipeline_mode = #tpu.pipeline_mode<synchronous>, transform_indices = @transform_10, window_bounds = array<i64: 1, 128>}, {transform_indices = @transform_11, window_bounds = array<i64: 2, 64, 128>}]} {
    %c0_i32 = arith.constant 0 : i32
    %0 = arith.cmpi eq, %arg0, %c0_i32 : i32
    %1 = arith.extui %0 : i1 to i32
    %c0_i32_0 = arith.constant 0 : i32
    %2 = arith.cmpi ne, %1, %c0_i32_0 : i32
    scf.if %2 {
      %cst_60 = arith.constant 0.000000e+00 : bf16
      %207 = vector.broadcast %cst_60 : bf16 to vector<10x10x128xbf16>
      %c0_61 = arith.constant 0 : index
      %c0_62 = arith.constant 0 : index
      %c0_63 = arith.constant 0 : index
      %208 = vector.load %arg13[%c0_61, %c0_62, %c0_63] : memref<10x10x128xbf16, #tpu.memory_space<vmem>>, vector<10x10x128xbf16>
      tpu.vector_store %arg13[%c0_61, %c0_62, %c0_63], %207 {strides = array<i32>} : memref<10x10x128xbf16, #tpu.memory_space<vmem>>, vector<10x10x128xbf16>,
    } else {
    }
    %c0 = arith.constant 0 : index
    %c0_1 = arith.constant 0 : index
    %c0_2 = arith.constant 0 : index
    %3 = vector.load %arg1[%c0, %c0_1, %c0_2] : memref<2x64x128xbf16, #tpu.memory_space<vmem>>, vector<2x64x128xbf16>
    %4 = vector.shape_cast %3 : vector<2x64x128xbf16> to vector<128x128xbf16>
    %c0_3 = arith.constant 0 : index
    %c0_4 = arith.constant 0 : index
    %5 = vector.load %arg2[%c0_3, %c0_4] : memref<128x128xbf16, #tpu.memory_space<vmem>>, vector<128x128xbf16>
    %cst = arith.constant dense<0.000000e+00> : vector<128x128xf32>
    %6 = tpu.matmul %4, %5, %cst {dimension_numbers = #tpu.dot_dimension_numbers<[1], [0], [0], [1], [0, 0, 1, 1], [], []>} : vector<128x128xbf16>, vector<128x128xbf16>, vector<128x128xf32> -> vector<128x128xf32>
    %c0_5 = arith.constant 0 : index
    %c0_6 = arith.constant 0 : index
    %7 = vector.load %arg3[%c0_5, %c0_6] : memref<1x128xf32, #tpu.memory_space<vmem>>, vector<1x128xf32>
    %8 = vector.broadcast %7 : vector<1x128xf32> to vector<128x128xf32>
    %9 = arith.addf %6, %8 : vector<128x128xf32>
    %10 = arith.negf %9 : vector<128x128xf32>
    %11 = math.exp %10 : vector<128x128xf32>
    %cst_7 = arith.constant 1.000000e+00 : f32
    %12 = vector.broadcast %cst_7 : f32 to vector<128x128xf32>
    %13 = arith.addf %12, %11 : vector<128x128xf32>
    %14 = arith.divf %12, %13 : vector<128x128xf32>
    %15 = arith.mulf %9, %14 : vector<128x128xf32>
    %16 = arith.truncf %15 : vector<128x128xf32> to vector<128x128xbf16>
    %17 = vector.shape_cast %16 : vector<128x128xbf16> to vector<2x8x8x128xbf16>
    %c0_8 = arith.constant 0 : index
    %c0_9 = arith.constant 0 : index
    %18 = vector.load %arg4[%c0_8, %c0_9] : memref<9x128xbf16, #tpu.memory_space<vmem>>, vector<9x128xbf16>
    %c0_10 = arith.constant 0 : index
    %c0_11 = arith.constant 0 : index
    %19 = vector.load %arg5[%c0_10, %c0_11] : memref<1x128xf32, #tpu.memory_space<vmem>>, vector<1x128xf32>
    %20 = vector.extract_strided_slice %17 {offsets = [0, 0, 0, 0], sizes = [1, 8, 8, 128], strides = [1, 1, 1, 1]} : vector<2x8x8x128xbf16> to vector<1x8x8x128xbf16>
    %21 = vector.shape_cast %20 : vector<1x8x8x128xbf16> to vector<8x8x128xbf16>
    %c1 = arith.constant 1 : index
    %c1_12 = arith.constant 1 : index
    %c0_13 = arith.constant 0 : index
    %22 = vector.load %arg13[%c1, %c1_12, %c0_13] : memref<10x10x128xbf16, #tpu.memory_space<vmem>>, vector<8x8x128xbf16>
    tpu.vector_store %arg13[%c1, %c1_12, %c0_13], %21 {strides = array<i32>} : memref<10x10x128xbf16, #tpu.memory_space<vmem>>, vector<8x8x128xbf16>,
    %cst_14 = arith.constant 0.000000e+00 : bf16
    %23 = vector.broadcast %cst_14 : bf16 to vector<8x8x128xbf16>
    %c0_15 = arith.constant 0 : index
    %c0_16 = arith.constant 0 : index
    %c0_17 = arith.constant 0 : index
    %24 = vector.load %arg13[%c0_15, %c0_16, %c0_17] : memref<10x10x128xbf16, #tpu.memory_space<vmem>>, vector<10x8x128xbf16>
    %25 = vector.extract_strided_slice %24 {offsets = [0, 0, 0], sizes = [8, 8, 128], strides = [1, 1, 1]} : vector<10x8x128xbf16> to vector<8x8x128xbf16>
    %26 = vector.extract_strided_slice %18 {offsets = [0, 0], sizes = [1, 128], strides = [1, 1]} : vector<9x128xbf16> to vector<1x128xbf16>
    %27 = vector.shape_cast %26 : vector<1x128xbf16> to vector<1x1x128xbf16>
    %28 = vector.broadcast %27 : vector<1x1x128xbf16> to vector<8x8x128xbf16>
    %29 = arith.mulf %25, %28 : vector<8x8x128xbf16>
    %30 = arith.addf %23, %29 : vector<8x8x128xbf16>
    %31 = vector.extract_strided_slice %24 {offsets = [1, 0, 0], sizes = [8, 8, 128], strides = [1, 1, 1]} : vector<10x8x128xbf16> to vector<8x8x128xbf16>
    %32 = vector.extract_strided_slice %18 {offsets = [3, 0], sizes = [1, 128], strides = [1, 1]} : vector<9x128xbf16> to vector<1x128xbf16>
    %33 = vector.shape_cast %32 : vector<1x128xbf16> to vector<1x1x128xbf16>
    %34 = vector.broadcast %33 : vector<1x1x128xbf16> to vector<8x8x128xbf16>
    %35 = arith.mulf %31, %34 : vector<8x8x128xbf16>
    %36 = arith.addf %30, %35 : vector<8x8x128xbf16>
    %37 = vector.extract_strided_slice %24 {offsets = [2, 0, 0], sizes = [8, 8, 128], strides = [1, 1, 1]} : vector<10x8x128xbf16> to vector<8x8x128xbf16>
    %38 = vector.extract_strided_slice %18 {offsets = [6, 0], sizes = [1, 128], strides = [1, 1]} : vector<9x128xbf16> to vector<1x128xbf16>
    %39 = vector.shape_cast %38 : vector<1x128xbf16> to vector<1x1x128xbf16>
    %40 = vector.broadcast %39 : vector<1x1x128xbf16> to vector<8x8x128xbf16>
    %41 = arith.mulf %37, %40 : vector<8x8x128xbf16>
    %42 = arith.addf %36, %41 : vector<8x8x128xbf16>
    %c0_18 = arith.constant 0 : index
    %c1_19 = arith.constant 1 : index
    %c0_20 = arith.constant 0 : index
    %43 = vector.load %arg13[%c0_18, %c1_19, %c0_20] : memref<10x10x128xbf16, #tpu.memory_space<vmem>>, vector<10x8x128xbf16>
    %44 = vector.extract_strided_slice %43 {offsets = [0, 0, 0], sizes = [8, 8, 128], strides = [1, 1, 1]} : vector<10x8x128xbf16> to vector<8x8x128xbf16>
    %45 = vector.extract_strided_slice %18 {offsets = [1, 0], sizes = [1, 128], strides = [1, 1]} : vector<9x128xbf16> to vector<1x128xbf16>
    %46 = vector.shape_cast %45 : vector<1x128xbf16> to vector<1x1x128xbf16>
    %47 = vector.broadcast %46 : vector<1x1x128xbf16> to vector<8x8x128xbf16>
    %48 = arith.mulf %44, %47 : vector<8x8x128xbf16>
    %49 = arith.addf %42, %48 : vector<8x8x128xbf16>
    %50 = vector.extract_strided_slice %43 {offsets = [1, 0, 0], sizes = [8, 8, 128], strides = [1, 1, 1]} : vector<10x8x128xbf16> to vector<8x8x128xbf16>
    %51 = vector.extract_strided_slice %18 {offsets = [4, 0], sizes = [1, 128], strides = [1, 1]} : vector<9x128xbf16> to vector<1x128xbf16>
    %52 = vector.shape_cast %51 : vector<1x128xbf16> to vector<1x1x128xbf16>
    %53 = vector.broadcast %52 : vector<1x1x128xbf16> to vector<8x8x128xbf16>
    %54 = arith.mulf %50, %53 : vector<8x8x128xbf16>
    %55 = arith.addf %49, %54 : vector<8x8x128xbf16>
    %56 = vector.extract_strided_slice %43 {offsets = [2, 0, 0], sizes = [8, 8, 128], strides = [1, 1, 1]} : vector<10x8x128xbf16> to vector<8x8x128xbf16>
    %57 = vector.extract_strided_slice %18 {offsets = [7, 0], sizes = [1, 128], strides = [1, 1]} : vector<9x128xbf16> to vector<1x128xbf16>
    %58 = vector.shape_cast %57 : vector<1x128xbf16> to vector<1x1x128xbf16>
    %59 = vector.broadcast %58 : vector<1x1x128xbf16> to vector<8x8x128xbf16>
    %60 = arith.mulf %56, %59 : vector<8x8x128xbf16>
    %61 = arith.addf %55, %60 : vector<8x8x128xbf16>
    %c0_21 = arith.constant 0 : index
    %c2 = arith.constant 2 : index
    %c0_22 = arith.constant 0 : index
    %62 = vector.load %arg13[%c0_21, %c2, %c0_22] : memref<10x10x128xbf16, #tpu.memory_space<vmem>>, vector<10x8x128xbf16>
    %63 = vector.extract_strided_slice %62 {offsets = [0, 0, 0], sizes = [8, 8, 128], strides = [1, 1, 1]} : vector<10x8x128xbf16> to vector<8x8x128xbf16>
    %64 = vector.extract_strided_slice %18 {offsets = [2, 0], sizes = [1, 128], strides = [1, 1]} : vector<9x128xbf16> to vector<1x128xbf16>
    %65 = vector.shape_cast %64 : vector<1x128xbf16> to vector<1x1x128xbf16>
    %66 = vector.broadcast %65 : vector<1x1x128xbf16> to vector<8x8x128xbf16>
    %67 = arith.mulf %63, %66 : vector<8x8x128xbf16>
    %68 = arith.addf %61, %67 : vector<8x8x128xbf16>
    %69 = vector.extract_strided_slice %62 {offsets = [1, 0, 0], sizes = [8, 8, 128], strides = [1, 1, 1]} : vector<10x8x128xbf16> to vector<8x8x128xbf16>
    %70 = vector.extract_strided_slice %18 {offsets = [5, 0], sizes = [1, 128], strides = [1, 1]} : vector<9x128xbf16> to vector<1x128xbf16>
    %71 = vector.shape_cast %70 : vector<1x128xbf16> to vector<1x1x128xbf16>
    %72 = vector.broadcast %71 : vector<1x1x128xbf16> to vector<8x8x128xbf16>
    %73 = arith.mulf %69, %72 : vector<8x8x128xbf16>
    %74 = arith.addf %68, %73 : vector<8x8x128xbf16>
    %75 = vector.extract_strided_slice %62 {offsets = [2, 0, 0], sizes = [8, 8, 128], strides = [1, 1, 1]} : vector<10x8x128xbf16> to vector<8x8x128xbf16>
    %76 = vector.extract_strided_slice %18 {offsets = [8, 0], sizes = [1, 128], strides = [1, 1]} : vector<9x128xbf16> to vector<1x128xbf16>
    %77 = vector.shape_cast %76 : vector<1x128xbf16> to vector<1x1x128xbf16>
    %78 = vector.broadcast %77 : vector<1x1x128xbf16> to vector<8x8x128xbf16>
    %79 = arith.mulf %75, %78 : vector<8x8x128xbf16>
    %80 = arith.addf %74, %79 : vector<8x8x128xbf16>
    %81 = arith.extf %80 : vector<8x8x128xbf16> to vector<8x8x128xf32>
    %82 = vector.shape_cast %19 : vector<1x128xf32> to vector<1x1x128xf32>
    %83 = vector.broadcast %82 : vector<1x1x128xf32> to vector<8x8x128xf32>
    %84 = arith.addf %81, %83 : vector<8x8x128xf32>
    %85 = arith.negf %84 : vector<8x8x128xf32>
    %86 = math.exp %85 : vector<8x8x128xf32>
    %cst_23 = arith.constant 1.000000e+00 : f32
    %87 = vector.broadcast %cst_23 : f32 to vector<8x8x128xf32>
    %88 = arith.addf %87, %86 : vector<8x8x128xf32>
    %89 = arith.divf %87, %88 : vector<8x8x128xf32>
    %90 = arith.mulf %84, %89 : vector<8x8x128xf32>
    %91 = vector.extract_strided_slice %17 {offsets = [1, 0, 0, 0], sizes = [1, 8, 8, 128], strides = [1, 1, 1, 1]} : vector<2x8x8x128xbf16> to vector<1x8x8x128xbf16>
    %92 = vector.shape_cast %91 : vector<1x8x8x128xbf16> to vector<8x8x128xbf16>
    %c1_24 = arith.constant 1 : index
    %c1_25 = arith.constant 1 : index
    %c0_26 = arith.constant 0 : index
    %93 = vector.load %arg13[%c1_24, %c1_25, %c0_26] : memref<10x10x128xbf16, #tpu.memory_space<vmem>>, vector<8x8x128xbf16>
    tpu.vector_store %arg13[%c1_24, %c1_25, %c0_26], %92 {strides = array<i32>} : memref<10x10x128xbf16, #tpu.memory_space<vmem>>, vector<8x8x128xbf16>,
    %cst_27 = arith.constant 0.000000e+00 : bf16
    %94 = vector.broadcast %cst_27 : bf16 to vector<8x8x128xbf16>
    %c0_28 = arith.constant 0 : index
    %c0_29 = arith.constant 0 : index
    %c0_30 = arith.constant 0 : index
    %95 = vector.load %arg13[%c0_28, %c0_29, %c0_30] : memref<10x10x128xbf16, #tpu.memory_space<vmem>>, vector<10x8x128xbf16>
    %96 = vector.extract_strided_slice %95 {offsets = [0, 0, 0], sizes = [8, 8, 128], strides = [1, 1, 1]} : vector<10x8x128xbf16> to vector<8x8x128xbf16>
    %97 = vector.extract_strided_slice %18 {offsets = [0, 0], sizes = [1, 128], strides = [1, 1]} : vector<9x128xbf16> to vector<1x128xbf16>
    %98 = vector.shape_cast %97 : vector<1x128xbf16> to vector<1x1x128xbf16>
    %99 = vector.broadcast %98 : vector<1x1x128xbf16> to vector<8x8x128xbf16>
    %100 = arith.mulf %96, %99 : vector<8x8x128xbf16>
    %101 = arith.addf %94, %100 : vector<8x8x128xbf16>
    %102 = vector.extract_strided_slice %95 {offsets = [1, 0, 0], sizes = [8, 8, 128], strides = [1, 1, 1]} : vector<10x8x128xbf16> to vector<8x8x128xbf16>
    %103 = vector.extract_strided_slice %18 {offsets = [3, 0], sizes = [1, 128], strides = [1, 1]} : vector<9x128xbf16> to vector<1x128xbf16>
    %104 = vector.shape_cast %103 : vector<1x128xbf16> to vector<1x1x128xbf16>
    %105 = vector.broadcast %104 : vector<1x1x128xbf16> to vector<8x8x128xbf16>
    %106 = arith.mulf %102, %105 : vector<8x8x128xbf16>
    %107 = arith.addf %101, %106 : vector<8x8x128xbf16>
    %108 = vector.extract_strided_slice %95 {offsets = [2, 0, 0], sizes = [8, 8, 128], strides = [1, 1, 1]} : vector<10x8x128xbf16> to vector<8x8x128xbf16>
    %109 = vector.extract_strided_slice %18 {offsets = [6, 0], sizes = [1, 128], strides = [1, 1]} : vector<9x128xbf16> to vector<1x128xbf16>
    %110 = vector.shape_cast %109 : vector<1x128xbf16> to vector<1x1x128xbf16>
    %111 = vector.broadcast %110 : vector<1x1x128xbf16> to vector<8x8x128xbf16>
    %112 = arith.mulf %108, %111 : vector<8x8x128xbf16>
    %113 = arith.addf %107, %112 : vector<8x8x128xbf16>
    %c0_31 = arith.constant 0 : index
    %c1_32 = arith.constant 1 : index
    %c0_33 = arith.constant 0 : index
    %114 = vector.load %arg13[%c0_31, %c1_32, %c0_33] : memref<10x10x128xbf16, #tpu.memory_space<vmem>>, vector<10x8x128xbf16>
    %115 = vector.extract_strided_slice %114 {offsets = [0, 0, 0], sizes = [8, 8, 128], strides = [1, 1, 1]} : vector<10x8x128xbf16> to vector<8x8x128xbf16>
    %116 = vector.extract_strided_slice %18 {offsets = [1, 0], sizes = [1, 128], strides = [1, 1]} : vector<9x128xbf16> to vector<1x128xbf16>
    %117 = vector.shape_cast %116 : vector<1x128xbf16> to vector<1x1x128xbf16>
    %118 = vector.broadcast %117 : vector<1x1x128xbf16> to vector<8x8x128xbf16>
    %119 = arith.mulf %115, %118 : vector<8x8x128xbf16>
    %120 = arith.addf %113, %119 : vector<8x8x128xbf16>
    %121 = vector.extract_strided_slice %114 {offsets = [1, 0, 0], sizes = [8, 8, 128], strides = [1, 1, 1]} : vector<10x8x128xbf16> to vector<8x8x128xbf16>
    %122 = vector.extract_strided_slice %18 {offsets = [4, 0], sizes = [1, 128], strides = [1, 1]} : vector<9x128xbf16> to vector<1x128xbf16>
    %123 = vector.shape_cast %122 : vector<1x128xbf16> to vector<1x1x128xbf16>
    %124 = vector.broadcast %123 : vector<1x1x128xbf16> to vector<8x8x128xbf16>
    %125 = arith.mulf %121, %124 : vector<8x8x128xbf16>
    %126 = arith.addf %120, %125 : vector<8x8x128xbf16>
    %127 = vector.extract_strided_slice %114 {offsets = [2, 0, 0], sizes = [8, 8, 128], strides = [1, 1, 1]} : vector<10x8x128xbf16> to vector<8x8x128xbf16>
    %128 = vector.extract_strided_slice %18 {offsets = [7, 0], sizes = [1, 128], strides = [1, 1]} : vector<9x128xbf16> to vector<1x128xbf16>
    %129 = vector.shape_cast %128 : vector<1x128xbf16> to vector<1x1x128xbf16>
    %130 = vector.broadcast %129 : vector<1x1x128xbf16> to vector<8x8x128xbf16>
    %131 = arith.mulf %127, %130 : vector<8x8x128xbf16>
    %132 = arith.addf %126, %131 : vector<8x8x128xbf16>
    %c0_34 = arith.constant 0 : index
    %c2_35 = arith.constant 2 : index
    %c0_36 = arith.constant 0 : index
    %133 = vector.load %arg13[%c0_34, %c2_35, %c0_36] : memref<10x10x128xbf16, #tpu.memory_space<vmem>>, vector<10x8x128xbf16>
    %134 = vector.extract_strided_slice %133 {offsets = [0, 0, 0], sizes = [8, 8, 128], strides = [1, 1, 1]} : vector<10x8x128xbf16> to vector<8x8x128xbf16>
    %135 = vector.extract_strided_slice %18 {offsets = [2, 0], sizes = [1, 128], strides = [1, 1]} : vector<9x128xbf16> to vector<1x128xbf16>
    %136 = vector.shape_cast %135 : vector<1x128xbf16> to vector<1x1x128xbf16>
    %137 = vector.broadcast %136 : vector<1x1x128xbf16> to vector<8x8x128xbf16>
    %138 = arith.mulf %134, %137 : vector<8x8x128xbf16>
    %139 = arith.addf %132, %138 : vector<8x8x128xbf16>
    %140 = vector.extract_strided_slice %133 {offsets = [1, 0, 0], sizes = [8, 8, 128], strides = [1, 1, 1]} : vector<10x8x128xbf16> to vector<8x8x128xbf16>
    %141 = vector.extract_strided_slice %18 {offsets = [5, 0], sizes = [1, 128], strides = [1, 1]} : vector<9x128xbf16> to vector<1x128xbf16>
    %142 = vector.shape_cast %141 : vector<1x128xbf16> to vector<1x1x128xbf16>
    %143 = vector.broadcast %142 : vector<1x1x128xbf16> to vector<8x8x128xbf16>
    %144 = arith.mulf %140, %143 : vector<8x8x128xbf16>
    %145 = arith.addf %139, %144 : vector<8x8x128xbf16>
    %146 = vector.extract_strided_slice %133 {offsets = [2, 0, 0], sizes = [8, 8, 128], strides = [1, 1, 1]} : vector<10x8x128xbf16> to vector<8x8x128xbf16>
    %147 = vector.extract_strided_slice %18 {offsets = [8, 0], sizes = [1, 128], strides = [1, 1]} : vector<9x128xbf16> to vector<1x128xbf16>
    %148 = vector.shape_cast %147 : vector<1x128xbf16> to vector<1x1x128xbf16>
    %149 = vector.broadcast %148 : vector<1x1x128xbf16> to vector<8x8x128xbf16>
    %150 = arith.mulf %146, %149 : vector<8x8x128xbf16>
    %151 = arith.addf %145, %150 : vector<8x8x128xbf16>
    %152 = arith.extf %151 : vector<8x8x128xbf16> to vector<8x8x128xf32>
    %153 = vector.shape_cast %19 : vector<1x128xf32> to vector<1x1x128xf32>
    %154 = vector.broadcast %153 : vector<1x1x128xf32> to vector<8x8x128xf32>
    %155 = arith.addf %152, %154 : vector<8x8x128xf32>
    %156 = arith.negf %155 : vector<8x8x128xf32>
    %157 = math.exp %156 : vector<8x8x128xf32>
    %cst_37 = arith.constant 1.000000e+00 : f32
    %158 = vector.broadcast %cst_37 : f32 to vector<8x8x128xf32>
    %159 = arith.addf %158, %157 : vector<8x8x128xf32>
    %160 = arith.divf %158, %159 : vector<8x8x128xf32>
    %161 = arith.mulf %155, %160 : vector<8x8x128xf32>
    %162 = vector.shape_cast %90 : vector<8x8x128xf32> to vector<1x8x8x128xf32>
    %163 = vector.shape_cast %161 : vector<8x8x128xf32> to vector<1x8x8x128xf32>
    %164 = tpu.concatenate %162, %163 in 0 : vector<1x8x8x128xf32>, vector<1x8x8x128xf32> -> vector<2x8x8x128xf32>
    %165 = vector.shape_cast %164 : vector<2x8x8x128xf32> to vector<2x64x128xf32>
    %cst_38 = arith.constant dense<0.000000e+00> : vector<2x128xf32>
    %166 = vector.multi_reduction <add>, %165, %cst_38 [1] : vector<2x64x128xf32> to vector<2x128xf32>
    %cst_39 = arith.constant 6.400000e+01 : f32
    %167 = vector.broadcast %cst_39 : f32 to vector<2x128xf32>
    %168 = arith.divf %166, %167 : vector<2x128xf32>
    %169 = arith.truncf %168 : vector<2x128xf32> to vector<2x128xbf16>
    %c0_40 = arith.constant 0 : index
    %c0_41 = arith.constant 0 : index
    %170 = vector.load %arg6[%c0_40, %c0_41] : memref<128x128xbf16, #tpu.memory_space<vmem>>, vector<128x128xbf16>
    %cst_42 = arith.constant dense<0.000000e+00> : vector<2x128xf32>
    %171 = tpu.matmul %169, %170, %cst_42 {dimension_numbers = #tpu.dot_dimension_numbers<[1], [0], [0], [1], [0, 0, 1, 1], [], []>} : vector<2x128xbf16>, vector<128x128xbf16>, vector<2x128xf32> -> vector<2x128xf32>
    %c0_43 = arith.constant 0 : index
    %c0_44 = arith.constant 0 : index
    %172 = vector.load %arg7[%c0_43, %c0_44] : memref<1x128xf32, #tpu.memory_space<vmem>>, vector<1x128xf32>
    %173 = vector.broadcast %172 : vector<1x128xf32> to vector<2x128xf32>
    %174 = arith.addf %171, %173 : vector<2x128xf32>
    %175 = arith.negf %174 : vector<2x128xf32>
    %176 = math.exp %175 : vector<2x128xf32>
    %cst_45 = arith.constant 1.000000e+00 : f32
    %177 = vector.broadcast %cst_45 : f32 to vector<2x128xf32>
    %178 = arith.addf %177, %176 : vector<2x128xf32>
    %179 = arith.divf %177, %178 : vector<2x128xf32>
    %180 = arith.mulf %174, %179 : vector<2x128xf32>
    %181 = arith.truncf %180 : vector<2x128xf32> to vector<2x128xbf16>
    %c0_46 = arith.constant 0 : index
    %c0_47 = arith.constant 0 : index
    %182 = vector.load %arg8[%c0_46, %c0_47] : memref<128x128xbf16, #tpu.memory_space<vmem>>, vector<128x128xbf16>
    %cst_48 = arith.constant dense<0.000000e+00> : vector<2x128xf32>
    %183 = tpu.matmul %181, %182, %cst_48 {dimension_numbers = #tpu.dot_dimension_numbers<[1], [0], [0], [1], [0, 0, 1, 1], [], []>} : vector<2x128xbf16>, vector<128x128xbf16>, vector<2x128xf32> -> vector<2x128xf32>
    %c0_49 = arith.constant 0 : index
    %c0_50 = arith.constant 0 : index
    %184 = vector.load %arg9[%c0_49, %c0_50] : memref<1x128xf32, #tpu.memory_space<vmem>>, vector<1x128xf32>
    %185 = vector.broadcast %184 : vector<1x128xf32> to vector<2x128xf32>
    %186 = arith.addf %183, %185 : vector<2x128xf32>
    %187 = arith.negf %186 : vector<2x128xf32>
    %188 = math.exp %187 : vector<2x128xf32>
    %cst_51 = arith.constant 1.000000e+00 : f32
    %189 = vector.broadcast %cst_51 : f32 to vector<2x128xf32>
    %190 = arith.addf %189, %188 : vector<2x128xf32>
    %191 = arith.divf %189, %190 : vector<2x128xf32>
    %192 = vector.shape_cast %191 : vector<2x128xf32> to vector<2x1x128xf32>
    %193 = vector.broadcast %192 : vector<2x1x128xf32> to vector<2x64x128xf32>
    %194 = arith.mulf %165, %193 : vector<2x64x128xf32>
    %195 = arith.truncf %194 : vector<2x64x128xf32> to vector<2x64x128xbf16>
    %196 = vector.shape_cast %195 : vector<2x64x128xbf16> to vector<128x128xbf16>
    %c0_52 = arith.constant 0 : index
    %c0_53 = arith.constant 0 : index
    %197 = vector.load %arg10[%c0_52, %c0_53] : memref<128x128xbf16, #tpu.memory_space<vmem>>, vector<128x128xbf16>
    %cst_54 = arith.constant dense<0.000000e+00> : vector<128x128xf32>
    %198 = tpu.matmul %196, %197, %cst_54 {dimension_numbers = #tpu.dot_dimension_numbers<[1], [0], [0], [1], [0, 0, 1, 1], [], []>} : vector<128x128xbf16>, vector<128x128xbf16>, vector<128x128xf32> -> vector<128x128xf32>
    %c0_55 = arith.constant 0 : index
    %c0_56 = arith.constant 0 : index
    %199 = vector.load %arg11[%c0_55, %c0_56] : memref<1x128xf32, #tpu.memory_space<vmem>>, vector<1x128xf32>
    %200 = vector.broadcast %199 : vector<1x128xf32> to vector<128x128xf32>
    %201 = arith.addf %198, %200 : vector<128x128xf32>
    %202 = arith.extf %4 : vector<128x128xbf16> to vector<128x128xf32>
    %203 = arith.addf %201, %202 : vector<128x128xf32>
    %204 = vector.shape_cast %203 : vector<128x128xf32> to vector<2x64x128xf32>
    %205 = arith.truncf %204 : vector<2x64x128xf32> to vector<2x64x128xbf16>
    %c0_57 = arith.constant 0 : index
    %c0_58 = arith.constant 0 : index
    %c0_59 = arith.constant 0 : index
    %206 = vector.load %arg12[%c0_57, %c0_58, %c0_59] : memref<2x64x128xbf16, #tpu.memory_space<vmem>>, vector<2x64x128xbf16>
    tpu.vector_store %arg12[%c0_57, %c0_58, %c0_59], %205 {strides = array<i32>} : memref<2x64x128xbf16, #tpu.memory_space<vmem>>, vector<2x64x128xbf16>,
    return
  }
  func.func @transform_0(%arg0: i32) -> (i32, i32, i32) {
    %c0_i32 = arith.constant 0 : i32
    %c0_i32_0 = arith.constant 0 : i32
    %c0_i32_1 = arith.constant 0 : i32
    return %arg0, %c0_i32, %c0_i32_0 : i32, i32, i32
  }
  func.func @transform_1(%arg0: i32) -> (i32, i32) {
    %c0_i32 = arith.constant 0 : i32
    %c0_i32_0 = arith.constant 0 : i32
    %c0_i32_1 = arith.constant 0 : i32
    return %c0_i32, %c0_i32_0 : i32, i32
  }
  func.func @transform_2(%arg0: i32) -> (i32, i32) {
    %c0_i32 = arith.constant 0 : i32
    %c0_i32_0 = arith.constant 0 : i32
    %c0_i32_1 = arith.constant 0 : i32
    return %c0_i32, %c0_i32_0 : i32, i32
  }
  func.func @transform_3(%arg0: i32) -> (i32, i32) {
    %c0_i32 = arith.constant 0 : i32
    %c0_i32_0 = arith.constant 0 : i32
    %c0_i32_1 = arith.constant 0 : i32
    return %c0_i32, %c0_i32_0 : i32, i32
  }
  func.func @transform_4(%arg0: i32) -> (i32, i32) {
    %c0_i32 = arith.constant 0 : i32
    %c0_i32_0 = arith.constant 0 : i32
    %c0_i32_1 = arith.constant 0 : i32
    return %c0_i32, %c0_i32_0 : i32, i32
  }
  func.func @transform_5(%arg0: i32) -> (i32, i32) {
    %c0_i32 = arith.constant 0 : i32
    %c0_i32_0 = arith.constant 0 : i32
    %c0_i32_1 = arith.constant 0 : i32
    return %c0_i32, %c0_i32_0 : i32, i32
  }
  func.func @transform_6(%arg0: i32) -> (i32, i32) {
    %c0_i32 = arith.constant 0 : i32
    %c0_i32_0 = arith.constant 0 : i32
    %c0_i32_1 = arith.constant 0 : i32
    return %c0_i32, %c0_i32_0 : i32, i32
  }
  func.func @transform_7(%arg0: i32) -> (i32, i32) {
    %c0_i32 = arith.constant 0 : i32
    %c0_i32_0 = arith.constant 0 : i32
    %c0_i32_1 = arith.constant 0 : i32
    return %c0_i32, %c0_i32_0 : i32, i32
  }
  func.func @transform_8(%arg0: i32) -> (i32, i32) {
    %c0_i32 = arith.constant 0 : i32
    %c0_i32_0 = arith.constant 0 : i32
    %c0_i32_1 = arith.constant 0 : i32
    return %c0_i32, %c0_i32_0 : i32, i32
  }
  func.func @transform_9(%arg0: i32) -> (i32, i32) {
    %c0_i32 = arith.constant 0 : i32
    %c0_i32_0 = arith.constant 0 : i32
    %c0_i32_1 = arith.constant 0 : i32
    return %c0_i32, %c0_i32_0 : i32, i32
  }
  func.func @transform_10(%arg0: i32) -> (i32, i32) {
    %c0_i32 = arith.constant 0 : i32
    %c0_i32_0 = arith.constant 0 : i32
    %c0_i32_1 = arith.constant 0 : i32
    return %c0_i32, %c0_i32_0 : i32, i32
  }
  func.func @transform_11(%arg0: i32) -> (i32, i32, i32) {
    %c0_i32 = arith.constant 0 : i32
    %c0_i32_0 = arith.constant 0 : i32
    %c0_i32_1 = arith.constant 0 : i32
    return %arg0, %c0_i32, %c0_i32_0 : i32, i32, i32
  }
}

</mosaic_0001>

<bundles_post_ra>
// kernel: fish_classifier_forward.5
= control target key start
LH: loop header
LB: loop body
LE: loop exit
PB: predicated region body
PF: predicated region fallthrough
CT: control target
= control target key end

     0   :  { %s1723_s0 = inlined_call_operand.hbm [shape: bf16[2,64,128], index: 0, kind: input, shape index: {}]   ;;  %s1724_s1 = inlined_call_operand.hbm [shape: bf16[128,128], index: 1, kind: input, shape index: {}]   ;;  %s1725_s2 = inlined_call_operand.hbm [shape: f32[1,128], index: 2, kind: input, shape index: {}]   ;;  %s1726_s3 = inlined_call_operand.hbm [shape: f32[128,128], index: 3, kind: input, shape index: {}]   ;;  %s1727_s4 = inlined_call_operand.hbm [shape: f32[1,128], index: 4, kind: input, shape index: {}]   ;;  %s1728_s5 = inlined_call_operand.hbm [shape: f32[2,8,128], index: 5, kind: output, shape index: {}]  }
   0x1   :  { %1743 = sst [smem:[#allocation23_spill]] %s1724_s1 }
   0x2   :  { %1744 = sst [smem:[#allocation24_spill]] %s1725_s2 }
   0x3   :  { %1745 = sst [smem:[#allocation25_spill]] %s1726_s3 }
   0x4   :  { %1746 = sst [smem:[#allocation26_spill]] %s1727_s4 }
   0x5   :  { %1747 = sst [smem:[#allocation27_spill]] %s1728_s5 }
   0x6   :  { %10 = vsyncpa [#allocation4], 0 }
   0x7   :  { %12 = vsyncpa [#allocation4 + $0x1], 0 }
   0x8   :  { %13 = vsyncpa [#allocation7], 0 }
   0x9   :  { %14 = vsyncpa [#allocation10], 0 }
   0xa   :  { %15 = vsyncpa [#allocation5], 0 }
   0xb   :  { %17 = vsyncpa [#allocation5 + $0x1], 0  ;;  %s1371_s18 = smov 0   ;;  %s1373_s19 = smov 0  }
   0xc   :  { %s1375_s20 = smov 0   ;;  %s1377_s21 = smov 0  }
   0xd   :  { %s1379_s22 = smov 0   ;;  %s1381_s23 = smov 0  }
   0xe   :  { %s1383_s24 = smov 0   ;;  %s1385_s25 = smov 0  }
   0xf   :  { %s1387_s26 = smov 0   ;;  %s1389_s27 = smov 0  }
  0x10   :  { %s1391_s28 = smov 0  }
  0x11 LB: > { %1748 = sst [smem:[#allocation17_spill]] %s1285_s18  ;;  %s730_s29 = sadd.s32 4294967295, %s1325_s28   ;;  %s1325_s28 = sphi %s1391_s28, %s23_s28   ;;  %s1321_s27 = sphi %s1389_s27, %s1793_s27   ;;  %s1317_s26 = sphi %s1387_s26, %s1792_s26   ;;  %s1313_s25 = sphi %s1385_s25, %s1791_s25   ;;  %s1309_s24 = sphi %s1383_s24, %s1790_s24   ;;  %s1305_s23 = sphi %s1381_s23, %s1789_s23   ;;  %s1301_s22 = sphi %s1379_s22, %s1788_s22   ;;  %s1297_s21 = sphi %s1377_s21, %s1787_s21   ;;  %s1293_s20 = sphi %s1375_s20, %s1786_s20   ;;  %s1289_s19 = sphi %s1373_s19, %s1785_s19   ;;  %s1285_s18 = sphi %s1371_s18, %s1784_s18  }
  0x12   : > { %1749 = sst [smem:[#allocation18_spill]] %s1289_s19  ;;  %s731_s30 = sadd.s32 4294967294, %s1325_s28  }
  0x13   : > { %1750 = sst [smem:[#allocation19_spill]] %s1309_s24  ;;  %p57_p0 = scmp.ne.s32.totalorder %s1301_s22, %s1297_s21 }
  0x14   : > { %1751 = sst [smem:[#allocation20_spill]] %s1313_s25  ;;  %p1427_p1 = scmp.eq.s32.totalorder %s730_s29, 0 }
  0x15   : > { %p164_p2 = scmp.ne.s32.totalorder %s1293_s20, %s1289_s19  ;;  %p165_p3 = scmp.eq.s32.totalorder %s730_s29, 3 }
  0x16   : > { %s1752_s6 = scalar_select %p1427_p1, 1, 0 }
  0x17   : > { %p1435_p4 = por %p1427_p1, %p57_p0  ;;  %p170_p5 = scmp.ne.s32.totalorder %s1289_s19, %s1285_s18 }
  0x18   : > { %p1441_p6 = por %p165_p3, %p164_p2  ;;  %p171_p7 = scmp.eq.s32.totalorder %s731_s30, 3 }
  0x19   : > { %s1753_s7 = scalar_select %p1435_p4, 1, 0 }
  0x1a   : > { %s1754_s8 = scalar_select %p1441_p6, 1, 0 }
  0x1b   : > { %p732_p8 = scmp.ge.s32.totalorder %s1325_s28, 1  ;;  %p178_p9 = scmp.lt.s32.totalorder %s1325_s28, 5 }
  0x1c   : > { %1755 = sst [smem:[#allocation21_spill]] %s1754_s8  ;;  %p1447_p10 = por %p171_p7, %p170_p5 }
  0x1d   : > { %p1451_p11 = pnand %p732_p8, %p178_p9  ;;  %s1327_s11 = smov [#allocation6]  }
  0x1e   : > { %s1756_s9 = scalar_select %p1447_p10, 1, 0 }
  0x1f   : > { %s1758_s10 = scalar_select %p1451_p11, 1, 0 }
  0x20   : > { %1757 = sst [smem:[#allocation22_spill]] %s1756_s9  ;;  %s190_s12 = sshll.u32 %s1327_s11, 4  ;;  %s191_s12 = int_to_ptr.vmem [resolvable:$true] %s190_s12 }
  0x21   : > { %p896_p12 = pneg %p1451_p11  ;;  %s1328_s14 = smov [#allocation9]  }
  0x22   : > { %s214_s15 = sshll.u32 %s1328_s14, 4  ;;  %s1760_s1 = sld [smem:[#allocation23_spill]]  ;;  %s1463_s15 = int_to_ptr.vmem [resolvable:$true] %s214_s15 }
  0x23   : > { %p1459_p13 = pnand %p896_p12, %p1427_p1 }
  0x25   : > { %p1473_p2 = pneg %p1459_p13 }
  0x28   : > { %s1053_s21 = scalar_lea.hbm %s1760_s1, 1024 }
  0x29   : > { %p1054_p0 = scmp.ne.s32.totalorder %s1760_s1, %s1053_s21  ;;  %p1060_p7 = scmp.lt.u32.totalorder %s1053_s21, %s1760_s1 }
  0x2b   : > { %p1056_p3 = pnand %p1473_p2, %p1054_p0 }
  0x2d   : > { %p1057_p5 = pneg %p1056_p3 }
  0x2f   : > { %p1062_p8 = pnand %p1060_p7, %p1057_p5 }
  0x31   : > { %1065 = shalt.err (!%p1062_p8)
}
  0x32   : > { %s1066_s16 = scalar_lea.vmem %s191_s12, 1024  ;;  %p1074_p6 = scmp.lt.s32.totalorder %s191_s12, %s191_s12 }
  0x33   : > { %p1067_p9 = scmp.ne.s32.totalorder %s191_s12, %s1066_s16  ;;  %p1075_p1 = scmp.lt.s32.totalorder %s1066_s16, %s1066_s16 }
  0x35   : > { %p1069_p12 = pnand %p1067_p9, %p1473_p2  ;;  %p1076_p4 = por %p1075_p1, %p1074_p6 }
  0x37   : > { %p1070_p10 = pneg %p1069_p12 }
  0x39   : > { %p1077_p11 = pnand %p1076_p4, %p1070_p10 }
  0x3b   : > { %1080 = shalt.err (!%p1077_p11)
}
  0x3c   : > { %s1739_s17 = smov 64   ;;  %s1740_s29 = smov 4  }
  0x3d   : > { %899 = dma.hbm_to_vmem [thread:$0]  (!%p1459_p13), %s1760_s1, 1024, %s191_s12, [#allocation7], %s1739_s17, %s1739_s17, %s1740_s29  }
  0x3e   : > { %s1762_s3 = sld [smem:[#allocation25_spill]] }
  0x44   : > { %s1081_s18 = scalar_lea.hbm %s1762_s3, 2048 }
  0x45   : > { %p1082_p1 = scmp.ne.s32.totalorder %s1762_s3, %s1081_s18  ;;  %p1088_p10 = scmp.lt.u32.totalorder %s1081_s18, %s1762_s3 }
  0x47   : > { %p1084_p4 = pnand %p1082_p1, %p1473_p2 }
  0x49   : > { %p1085_p6 = pneg %p1084_p4 }
  0x4b   : > { %p1090_p11 = pnand %p1088_p10, %p1085_p6 }
  0x4d   : > { %1093 = shalt.err (!%p1090_p11)
}
  0x4e   : > { %s1094_s12 = scalar_lea.vmem %s1463_s15, 2048  ;;  %p1102_p7 = scmp.lt.s32.totalorder %s1463_s15, %s1463_s15 }
  0x4f   : > { %p1095_p0 = scmp.ne.s32.totalorder %s1463_s15, %s1094_s12  ;;  %p1103_p8 = scmp.lt.s32.totalorder %s1094_s12, %s1094_s12 }
  0x51   : > { %p1097_p3 = pnand %p1095_p0, %p1473_p2  ;;  %p1104_p9 = por %p1103_p8, %p1102_p7 }
  0x53   : > { %p1098_p5 = pneg %p1097_p3 }
  0x55   : > { %p1105_p12 = pnand %p1104_p9, %p1098_p5 }
  0x57   : > { %1108 = shalt.err (!%p1105_p12)
}
  0x58   : > { %s1331_s5 = smov 128   ;;  %s1332_s18 = smov 8  }
  0x59   : > { %905 = dma.hbm_to_vmem [thread:$0]  (!%p1459_p13), %s1762_s3, 2048, %s1463_s15, [#allocation10], %s1331_s5, %s1331_s5, %s1332_s18  }
  0x5a   : > { %s1333_s9 = smov [#allocation8]   ;;  %s1334_s30 = smov [#allocation11]  }
  0x5b   : > { %s204_s21 = sshll.u32 %s1333_s9, 4  ;;  %s228_s14 = sshll.u32 %s1334_s30, 4  ;;  %s205_s21 = int_to_ptr.vmem [resolvable:$true] %s204_s21  ;;  %s229_s14 = int_to_ptr.vmem [resolvable:$true] %s228_s14 }
  0x5c   : > { %s1763_s2 = sld [smem:[#allocation24_spill]] }
  0x62   : > { %s1109_s17 = scalar_lea.hbm %s1763_s2, 16 }
  0x63   : > { %p1110_p1 = scmp.ne.s32.totalorder %s1763_s2, %s1109_s17  ;;  %p1116_p10 = scmp.lt.u32.totalorder %s1109_s17, %s1763_s2 }
  0x65   : > { %p1112_p4 = pnand %p1110_p1, %p1473_p2 }
  0x67   : > { %p1113_p6 = pneg %p1112_p4 }
  0x69   : > { %p1118_p11 = pnand %p1116_p10, %p1113_p6 }
  0x6b   : > { %1121 = shalt.err (!%p1118_p11)
}
  0x6c   : > { %s1122_s15 = scalar_lea.vmem %s205_s21, 16  ;;  %s1129_s5 = scalar_lea.vmem %s205_s21, 32 }
  0x6d   : > { %p1123_p0 = scmp.ne.s32.totalorder %s205_s21, %s1122_s15  ;;  %p1130_p7 = scmp.lt.s32.totalorder %s205_s21, %s205_s21 }
  0x6e   : > { %p1131_p8 = scmp.lt.s32.totalorder %s1129_s5, %s1122_s15 }
  0x6f   : > { %p1125_p3 = pnand %p1123_p0, %p1473_p2 }
  0x70   : > { %p1132_p9 = por %p1131_p8, %p1130_p7 }
  0x71   : > { %p1126_p5 = pneg %p1125_p3 }
  0x73   : > { %p1133_p12 = pnand %p1132_p9, %p1126_p5 }
  0x75   : > { %1136 = shalt.err (!%p1133_p12)
}
  0x76   : > { %902 = dma.hbm_to_vmem [thread:$0]  (!%p1459_p13), %s1763_s2, 16, %s205_s21, [#allocation7]  }
  0x77   : > { %s1764_s4 = sld [smem:[#allocation26_spill]] }
  0x7d   : > { %s1137_s17 = scalar_lea.hbm %s1764_s4, 16 }
  0x7e   : > { %p1138_p1 = scmp.ne.s32.totalorder %s1764_s4, %s1137_s17  ;;  %p1144_p10 = scmp.lt.u32.totalorder %s1137_s17, %s1764_s4 }
  0x80   : > { %p1140_p4 = pnand %p1138_p1, %p1473_p2 }
  0x82   : > { %p1141_p6 = pneg %p1140_p4 }
  0x84   : > { %p1146_p11 = pnand %p1144_p10, %p1141_p6 }
  0x86   : > { %1149 = shalt.err (!%p1146_p11)
}
  0x87   : > { %s1150_s30 = scalar_lea.vmem %s229_s14, 16  ;;  %s1157_s21 = scalar_lea.vmem %s229_s14, 32 }
  0x88   : > { %p1151_p0 = scmp.ne.s32.totalorder %s229_s14, %s1150_s30  ;;  %p1158_p7 = scmp.lt.s32.totalorder %s229_s14, %s229_s14 }
  0x89   : > { %p1159_p8 = scmp.lt.s32.totalorder %s1157_s21, %s1150_s30 }
  0x8a   : > { %p1153_p3 = pnand %p1151_p0, %p1473_p2 }
  0x8b   : > { %p1160_p9 = por %p1159_p8, %p1158_p7 }
  0x8c   : > { %p1154_p5 = pneg %p1153_p3 }
  0x8e   : > { %p1161_p12 = pnand %p1160_p9, %p1154_p5 }
  0x90   : > { %1164 = shalt.err (!%p1161_p12)
}
  0x91   : > { %908 = dma.hbm_to_vmem [thread:$0]  (!%p1459_p13), %s1764_s4, 16, %s229_s14, [#allocation10]  }
  0x92   : > { %s32_s11 = sadd.s32 1, %s1317_s26  ;;  %s35_s13 = sadd.s32 1, %s1321_s27 }
  0x93   : > { %p33_p2 = scmp.ge.s32.totalorder %s32_s11, 2  ;;  %s44_s15 = sadd.s32 1, %s1305_s23 }
  0x94   : > { %p51_p1 = scmp.ne.s32.totalorder %s1305_s23, %s1301_s22  ;;  %p52_p4 = scmp.eq.s32.totalorder %s1325_s28, 0 }
  0x95   : > { %s1795_s11 = smov (%p33_p2, %s32_s11), 0  ;;  %s1797_s13 = smov (!%p33_p2, %s35_s13), %s1321_s27 }
  0x96   : > { %s40_s5 = ssub.s32 %s1317_s26, %s1795_s11  ;;  %p37_p6 = scmp.ge.s32.totalorder %s1797_s13, 2 }
  0x97   : > { %s154_s1 = sadd.s32 1, %s1293_s20  ;;  %p1563_p10 = por %p52_p4, %p51_p1 }
  0x98   : > { %p921_p13 = scmp.lt.s32.totalorder %s1325_s28, 4  ;;  %s1799_s13 = smov (%p37_p6, %s1797_s13), 0 }
  0x99   : > { %s239_s29 = sand.u32 1, %s1305_s23   ;;  %s739_s19 = sshll.u32 %s1317_s26, 2 }
  0x9a   : > { %s39_s24 = ssub.s32 %s1321_s27, %s1799_s13  ;;  %s738_s18 = sshll.u32 %s239_s29, 4 }
  0x9b   : > { %s41_s17 = sor.u32 %s40_s5, %s39_s24  ;;  %p152_p11 = scmp.eq.s32.totalorder %s39_s24, 0 }
  0x9c   : > { %p42_p0 = scmp.eq.s32.totalorder %s41_s17, 0  ;;  %s740_s9 = sshll.u32 %s1321_s27, 3 }
  0x9d   : > { %s1575_s25 = scalar_select %p152_p11, %s1293_s20, %s154_s1  }
  0x9e   : > { %s1578_s8 = scalar_select %p42_p0, %s1305_s23, %s44_s15  }
  0x9f   : > { %s249_s30 = sadd.s32 %s740_s9, %s739_s19  ;;  %s243_s21 = scalar_lea.vmem [#allocation3], %s738_s18 }
  0xa0   : > { %s252_s16 = sshll.u32 %s243_s21, 4  ;;  %s741_s12 = sshll.u32 %s249_s30, 6  ;;  %s1581_s16 = int_to_ptr.vmem [resolvable:$true] %s252_s16 }
  0xa1   : > { %s1586_s4 = scalar_lea.hbm %s1723_s0, %s741_s12  ;;  %p1592_p3 = pnand %p921_p13, %p1563_p10 }
  0xa2   : > { %s1596_s5 = scalar_lea.sflag [#allocation4], %s239_s29  ;;  %s1165_s1 = scalar_lea.hbm %s1586_s4, 256 }
  0xa3   : > { %p1166_p5 = scmp.ne.s32.totalorder %s1586_s4, %s1165_s1  ;;  %p1167_p7 = pneg %p1592_p3 }
  0xa4   : > { %s1170_s14 = scalar_lea.hbm %s1723_s0, 1024  ;;  %p1171_p12 = scmp.lt.u32.totalorder %s1586_s4, %s1723_s0 }
  0xa5   : > { %p1168_p8 = pnand %p1167_p7, %p1166_p5  ;;  %p1172_p2 = scmp.lt.u32.totalorder %s1170_s14, %s1165_s1 }
  0xa6   : > { %p1174_p4 = scmp.lt.u32.totalorder %s1165_s1, %s1586_s4 }
  0xa7   : > { %p1169_p9 = pneg %p1168_p8  ;;  %p1173_p1 = por %p1172_p2, %p1171_p12 }
  0xa9   : > { %p1175_p6 = por %p1174_p4, %p1173_p1 }
  0xab   : > { %p1176_p10 = pnand %p1175_p6, %p1169_p9 }
  0xad   : > { %1179 = shalt.err (!%p1176_p10)
}
  0xae   : > { %s1180_s29 = scalar_lea.vmem %s1581_s16, 256  ;;  %s1335_s17 = smov [#allocation3]  }
  0xaf   : > { %p1181_p13 = scmp.ne.s32.totalorder %s1581_s16, %s1180_s29  ;;  %s1185_s18 = sshll.u32 %s1335_s17, 4  ;;  %s1186_s18 = int_to_ptr.vmem [resolvable:$false] %s1185_s18 }
  0xb0   : > { %s1187_s9 = scalar_lea.vmem %s1186_s18, 512  ;;  %p1188_p5 = scmp.lt.s32.totalorder %s1581_s16, %s1186_s18 }
  0xb1   : > { %p1183_p11 = pnand %p1181_p13, %p1167_p7  ;;  %p1189_p8 = scmp.lt.s32.totalorder %s1187_s9, %s1180_s29 }
  0xb3   : > { %p1184_p0 = pneg %p1183_p11  ;;  %p1190_p12 = por %p1189_p8, %p1188_p5 }
  0xb5   : > { %p1191_p2 = pnand %p1190_p12, %p1184_p0 }
  0xb7   : > { %1194 = shalt.err (!%p1191_p2)
}
  0xb8   : > { %s1767_s30 = smov 4   ;;  %s1768_s21 = smov 64  }
  0xb9   : > { %912 = dma.hbm_to_vmem [thread:$0]  (!%p1592_p3), %s1586_s4, 256, %s1581_s16, %s1596_s5, %s1768_s21, %s1768_s21, %s1767_s30  }
  0xba   : > { %p1769_p7 = scmp.ne.s32.totalorder %s1758_s10, 0 }
  0xbb   : > { %s266_s12 = sand.u32 (!%p1769_p7), 1, %s1301_s22   ;;  %p1770_p9 = scmp.ne.s32.totalorder (!%p1769_p7), %s1753_s7, 0 }
  0xbc   : > { %264 = sbr.rel (%p1769_p7) target bundleno = 768 (0x300), region = 40  ;;  %s1630_s1 = sshll.u32 (!%p1769_p7), %s266_s12, 4 }
  0xbd   : > { %s267_s2 = scalar_lea.sflag (!%p1769_p7), [#allocation4], %s266_s12  ;;  %s270_s3 = scalar_lea.vmem (!%p1769_p7), [#allocation3], %s1630_s1 }
  0xc3   : > { %1268 = dma.done.wait (%p1770_p9), %s267_s2, 256  }
  0xc4   : > { %1270 = vsyncadd (%p1770_p9), %s267_s2, 4294967040  ;;  %p1771_p1 = scmp.ne.s32.totalorder %s1752_s6, 0 }
  0xc6   : > { %1272 = dma.done.wait (%p1771_p1), [#allocation7], 1040  }
  0xc7   : > { %1274 = vsyncadd (%p1771_p1), [#allocation7], 4294966256 }
  0xc8   : > { %1276 = dma.done.wait (%p1771_p1), [#allocation10], 2064  }
  0xc9   : > { %1278 = vsyncadd (%p1771_p1), [#allocation10], 4294965232  ;;  %s1772_s4 = sld [smem:[#allocation18_spill]]  ;;  %s1773_s15 = sld [smem:[#allocation19_spill]] }
  0xcf   : > { %s310_s10 = sand.u32 1, %s1772_s4   ;;  %p749_p3 = scmp.ne.s32.totalorder %s1773_s15, 0 }
  0xd0   : > { %s1648_s16 = sshll.u32 %s310_s10, 3  ;;  %v1336_v0 = vmov (!%p749_p3), 0.0  }
  0xd1   : > { %s312_s7 = scalar_lea.vmem [#allocation12], %s1648_s16  ;;  %318 = sbr.rel (%p749_p3) target bundleno = 216 (0xd8), region = 64  ;;  %319 = vst [vmem:[#allocation2] sm:$0x1] (!%p749_p3), %v1336_v0 }
  0xd8 PF: > { %v1027_v1 = vld [vmem:[#allocation6] sm:$0xff]   ;;  %v1028_v2 = vld [vmem:[#allocation6 + $0x8] sm:$0xff]   ;;  %v1029_v3 = vld [vmem:[#allocation6 + $0x10] sm:$0xff]   ;;  %s1774_s6 = sld [smem:[#allocation19_spill]] }
  0xd9   : > { %797 = vmatprep.subr.bf16.mxu0 %v1027_v1  ;;  %v1030_v4 = vld [vmem:[#allocation6 + $0x18] sm:$0xff]   ;;  %v1035_v5 = vld [vmem:[%s270_s3] sm:$0xff]   ;;  %v1032_v7 = vld [vmem:[#allocation6 + $0x28] sm:$0xff]  }
  0xda   : > { %798 = vmatpush3.bf16.msra.mxu0 %v1027_v1  ;;  %813 = vmatprep.mubr.bf16.mxu0 %v1035_v5  ;;  %v1031_v6 = vld [vmem:[#allocation6 + $0x20] sm:$0xff]   ;;  %v1033_v8 = vld [vmem:[#allocation6 + $0x30] sm:$0xff]   ;;  %v1034_v9 = vld [vmem:[#allocation6 + $0x38] sm:$0xff]  }
  0xdb   : > { %799 = vmatprep.subr.bf16.mxu0 %v1028_v2  ;;  %v1036_v10 = vld [vmem:[%s270_s3 + $0x8] sm:$0xff]   ;;  %v750_v11 = vld [vmem:[#allocation8] ss:$0 sm:$0xff] }
  0xdc   : > { %v484_v48 = vld [vmem:[#allocation2] sm:$0x1] }
  0xde   : > { %800 = vmatpush3.bf16.msra.mxu0 %v1028_v2  ;;  %p765_p4 = scmp.ne.s32.totalorder %s1774_s6, 1 }
  0xdf   : > { %801 = vmatprep.subr.bf16.mxu0 %v1029_v3  ;;  %v502_v51 = vld [vmem:[#allocation9] sm:$0xff] (!%p765_p4)  ;;  %v503_v52 = vld [vmem:[#allocation9 + $0x8] sm:$0xff] (!%p765_p4)  ;;  %v504_v53 = vld [vmem:[#allocation9 + $0x10] sm:$0xff] (!%p765_p4)  ;;  %v1337_v54 = vmov (!%p765_p4), 0.0|0.0   ;;  %vm1338_vm0 = vmmov (!%p765_p4), 0   ;;  %v1339_v57 = vmov (!%p765_p4), 0.0  }
  0xe0   : > { %v853_v55 = vpack.c.bf16 (!%p765_p4), %v503_v52, %v502_v51  ;;  %v505_v56 = vld [vmem:[#allocation9 + $0x18] sm:$0xff] (!%p765_p4)  ;;  %v506_v59 = vld [vmem:[#allocation9 + $0x20] sm:$0xff] (!%p765_p4)  ;;  %v507_v60 = vld [vmem:[#allocation9 + $0x28] sm:$0xff] (!%p765_p4) }
  0xe1   : > { %v856_v58 = vpack.c.bf16 (!%p765_p4), %v505_v56, %v504_v53  ;;  %v859_v61 = vpack.c.bf16 (!%p765_p4), %v507_v60, %v506_v59  ;;  %v508_v62 = vld [vmem:[#allocation9 + $0x30] sm:$0xff] (!%p765_p4)  ;;  %v509_v63 = vld [vmem:[#allocation9 + $0x38] sm:$0xff] (!%p765_p4)  ;;  %v510_v1 = vld [vmem:[#allocation9 + $0x40] sm:$0xff] (!%p765_p4) }
  0xe2   : > { %802 = vmatpush3.bf16.msra.mxu0 %v1029_v3  ;;  %v862_v0 = vpack.c.bf16 (!%p765_p4), %v509_v63, %v508_v62  ;;  %v511_v2 = vld [vmem:[#allocation9 + $0x48] sm:$0xff] (!%p765_p4)  ;;  %v513_v5 = vld [vmem:[#allocation9 + $0x58] sm:$0xff] (!%p765_p4) }
  0xe3   : > { %803 = vmatprep.subr.bf16.mxu0 %v1030_v4  ;;  %v865_v3 = vpack.c.bf16 (!%p765_p4), %v511_v2, %v510_v1 }
  0xe6   : > { %804 = vmatpush3.bf16.msra.mxu0 %v1030_v4  ;;  %v512_v4 = vld [vmem:[#allocation9 + $0x50] sm:$0xff] (!%p765_p4) }
  0xe7   : > { %805 = vmatprep.subr.bf16.mxu0 %v1031_v6 }
  0xea   : > { %806 = vmatpush3.bf16.msra.mxu0 %v1031_v6  ;;  %v868_v6 = vpack.c.bf16 (!%p765_p4), %v513_v5, %v512_v4 }
  0xeb   : > { %807 = vmatprep.subr.bf16.mxu0 %v1032_v7 }
  0xee   : > { %808 = vmatpush3.bf16.msra.mxu0 %v1032_v7  ;;  %v514_v7 = vld [vmem:[#allocation9 + $0x60] sm:$0xff] (!%p765_p4) }
  0xef   : > { %809 = vmatprep.subr.bf16.mxu0 %v1033_v8 }
  0xf2   : > { %810 = vmatpush3.bf16.msra.mxu0 %v1033_v8  ;;  %v515_v8 = vld [vmem:[#allocation9 + $0x68] sm:$0xff] (!%p765_p4) }
  0xf3   : > { %811 = vmatprep.subr.bf16.mxu0 %v1034_v9 }
  0xf6   : > { %812 = vmatpush3.bf16.msra.mxu0 %v1034_v9  ;;  %v871_v9 = vpack.c.bf16 (!%p765_p4), %v515_v8, %v514_v7 }
  0xf7   : > { %852 = vmatprep.subr.bf16.mxu0 (!%p765_p4), %v1337_v54 }
  0xf9   : > { %814 = vmatmul.mubr.bf16.vlgmr.msra.gmra.mrb[0].mxu0 %v1036_v10  ;;  %v516_v10 = vld [vmem:[#allocation9 + $0x70] sm:$0xff] (!%p765_p4) }
  0xfa   : > { %849 = vmatprep.mubr.msk.f32.mxu0 (!%p765_p4), %vm1338_vm0, %v1339_v57  ;;  %854 = vmatpush3.bf16.msra.mxu0 (!%p765_p4), %v853_v55 }
  0xfb   : > { %855 = vmatprep.subr.bf16.mxu0 (!%p765_p4), %v1337_v54 }
  0xfe   : > { %857 = vmatpush3.bf16.msra.mxu0 (!%p765_p4), %v856_v58 }
  0xff   : > { %858 = vmatprep.subr.bf16.mxu0 (!%p765_p4), %v1337_v54 }
 0x102   : > { %860 = vmatpush3.bf16.msra.mxu0 (!%p765_p4), %v859_v61 }
 0x103   : > { %861 = vmatprep.subr.bf16.mxu0 (!%p765_p4), %v1337_v54 }
 0x106   : > { %863 = vmatpush3.bf16.msra.mxu0 (!%p765_p4), %v862_v0 }
 0x107   : > { %864 = vmatprep.subr.bf16.mxu0 (!%p765_p4), %v1337_v54 }
 0x10a   : > { %866 = vmatpush3.bf16.msra.mxu0 (!%p765_p4), %v865_v3 }
 0x10b   : > { %867 = vmatprep.subr.bf16.mxu0 (!%p765_p4), %v1337_v54 }
 0x10e   : > { %869 = vmatpush3.bf16.msra.mxu0 (!%p765_p4), %v868_v6 }
 0x10f   : > { %870 = vmatprep.subr.bf16.mxu0 (!%p765_p4), %v1337_v54 }
 0x112   : > { %872 = vmatpush3.bf16.msra.mxu0 (!%p765_p4), %v871_v9 }
 0x113   : > { %873 = vmatprep.subr.bf16.mxu0 (!%p765_p4), %v1337_v54 }
 0x1cc   : > { %v815_v12 = vpop.f32.mrb[0].mxu0 }
 0x1cd   : > { %v450_v13 = vadd.f32 %v815_v12, %v750_v11  ;;  %v441_v14 = vpop.f32.mrb[1].mxu0 }
 0x1ce   : > { %v442_v15 = vadd.f32 %v750_v11, %v441_v14  ;;  %v816_v16 = vpop.f32.mrb[2].mxu0 }
 0x1cf   : > { %v763_v17 = vmul.f32 -1.442695, %v450_v13  ;;  %v453_v18 = vadd.f32 %v816_v16, %v750_v11  ;;  %v444_v19 = vpop.f32.mrb[3].mxu0 }
 0x1d0   : > { %v761_v20 = vmul.f32 -1.442695, %v442_v15  ;;  %v445_v21 = vadd.f32 %v750_v11, %v444_v19  ;;  %v517_v11 = vld [vmem:[#allocation9 + $0x78] sm:$0xff] (!%p765_p4) }
 0x1d1   : > { %1037 = vpow2.f32 %v763_v17  ;;  %v764_v22 = vmul.f32 -1.442695, %v453_v18  ;;  %v874_v12 = vpack.c.bf16 (!%p765_p4), %v517_v11, %v516_v10  ;;  %v518_v17 = vld [vmem:[#allocation11] sm:$0x1] (!%p765_p4) }
 0x1d2   : > { %1039 = vpow2.f32 %v761_v20  ;;  %v762_v23 = vmul.f32 -1.442695, %v445_v21 }
 0x1d3   : > { %1041 = vpow2.f32 %v764_v22  ;;  %875 = vmatpush3.bf16.msra.mxu0 (!%p765_p4), %v874_v12 }
 0x1d4   : > { %1043 = vpow2.f32 %v762_v23 }
 0x1db   : > { %v1038_v24 = vpop.eup %1037 }
 0x1dc   : > { %v1040_v25 = vpop.eup %1039  ;;  %v470_v26 = vadd.f32 1.0, %v1038_v24 }
 0x1dd   : > { %v1042_v27 = vpop.eup %1041  ;;  %v468_v28 = vadd.f32 1.0, %v1040_v25 }
 0x1de   : > { %v1044_v29 = vpop.eup %1043  ;;  %v471_v30 = vadd.f32 1.0, %v1042_v27 }
 0x1df   : > { %1045 = vrcp.f32 %v468_v28  ;;  %v469_v31 = vadd.f32 1.0, %v1044_v29 }
 0x1e0   : > { %1047 = vrcp.f32 %v470_v26 }
 0x1e1   : > { %1049 = vrcp.f32 %v469_v31 }
 0x1e2   : > { %1051 = vrcp.f32 %v471_v30 }
 0x1e9   : > { %v1046_v32 = vpop.eup %1045 }
 0x1ea   : > { %v1048_v33 = vpop.eup %1047  ;;  %v480_v35 = vmul.f32 %v1046_v32, %v442_v15  ;;  %v589_v15 = vlaneseq (!%p765_p4) }
 0x1eb   : > { %v1050_v34 = vpop.eup %1049  ;;  %v482_v38 = vmul.f32 %v1048_v33, %v450_v13 }
 0x1ec   : > { %v481_v36 = vmul.f32 %v1050_v34, %v445_v21  ;;  %v1052_v37 = vpop.eup %1051  ;;  %v590_v16 = vshrl.u32 (!%p765_p4), %v589_v15, 7 }
 0x1ed   : > { %v483_v40 = vmul.f32 %v1052_v37, %v453_v18 }
 0x1ee   : > { %v485_v39 = vadd.f32 %v481_v36, %v480_v35  ;;  %v591_v18 = vsub.s32 (!%p765_p4), 0, %v590_v16 }
 0x1f0   : > { %v486_v41 = vadd.f32 %v485_v39, %v482_v38 }
 0x1f2   : > { %v487_v42 = vadd.f32 %v486_v41, %v483_v40 }
 0x1f4   : > { %v488_v43 = vrot.slane %v487_v42, 4 }
 0x1f6   : > { %v489_v44 = vadd.f32 %v488_v43, %v487_v42 }
 0x1f8   : > { %v490_v45 = vrot.slane %v489_v44, 2 }
 0x1fa   : > { %v491_v46 = vadd.f32 %v490_v45, %v489_v44 }
 0x1fc   : > { %v492_v47 = vrot.slane %v491_v46, 1  ;;  %499 = sbr.rel (%p765_p4) target bundleno = 741 (0x2e5), region = 68 }
 0x1fe   : > { %v493_v49 = vadd.f32 %v492_v47, %v491_v46 }
 0x200   : > { %v494_v50 = vadd.f32 %v493_v49, %v484_v48 }
 0x202   : > { %495 = vst [vmem:[#allocation2] sm:$0x1] %v494_v50 }
 0x209   : > { %v500_v13 = vld [vmem:[#allocation2] sm:$0x1] }
 0x20a   : > { %v501_v14 = vmul.f32 0.015625, %v500_v13 }
 0x20c   : > { %850 = vmatmul.mubr.f32.vlgmr.msra.gmra.mrb[0].mxu0 %v501_v14 }
 0x2df   : > { %v585_v19 = vpop.f32.mrb[0].mxu0 }
 0x2e0   : > { %v586_v20 = vadd.f32 %v585_v19, %v518_v17  ;;  %v851_v21 = vpop.f32.mrb[1].mxu0 }
 0x2e2   : > { %v592_v22 = vrot.slane %v586_v20, %v591_v18 }
 0x2e4   : > { %593 = vst [vmem:[%s312_s7] sm:$0xff] %v592_v22 }
 0x2e5 PF: > { %s1775_s5 = sld [smem:[#allocation20_spill]]  ;;  %s1777_s19 = sld [smem:[#allocation21_spill]] }
 0x2e6   : > { %s1778_s18 = sld [smem:[#allocation27_spill]]  ;;  %s608_s21 = sshll.u32 %s312_s7, 4  ;;  %s609_s21 = int_to_ptr.vmem [resolvable:$true] %s608_s21 }
 0x2e7   : > { %s595_s12 = scalar_lea.sflag [#allocation5], %s310_s10  ;;  %s1195_s1 = scalar_lea.vmem %s609_s21, 128 }
 0x2e8   : > { %p1196_p6 = scmp.ne.s32.totalorder %s609_s21, %s1195_s1  ;;  %s1340_s2 = smov [#allocation12]  }
 0x2e9   : > { %s1199_s3 = sshll.u32 %s1340_s2, 4  ;;  %s1200_s3 = int_to_ptr.vmem [resolvable:$false] %s1199_s3 }
 0x2ea   : > { %s1201_s4 = scalar_lea.vmem %s1200_s3, 256  ;;  %p1202_p0 = scmp.lt.s32.totalorder %s609_s21, %s1200_s3 }
 0x2eb   : > { %s767_s24 = sshll.u32 %s1775_s5, 7  ;;  %p1780_p10 = scmp.ne.s32.totalorder %s1777_s19, 0 }
 0x2ec   : > { %s1779_s9 = smov %s1778_s18  ;;  %s1663_s30 = scalar_lea.hbm %s1778_s18, %s767_s24 }
 0x2ed   : > { %p1197_p13 = pnand %p1196_p6, %p1780_p10  ;;  %p1203_p5 = scmp.lt.s32.totalorder %s1201_s4, %s1195_s1 }
 0x2ef   : > { %p1198_p11 = pneg %p1197_p13  ;;  %p1204_p8 = por %p1203_p5, %p1202_p0 }
 0x2f1   : > { %p1205_p12 = pnand %p1204_p8, %p1198_p11 }
 0x2f3   : > { %1208 = shalt.err (!%p1205_p12)
}
 0x2f4   : > { %s1209_s10 = scalar_lea.hbm %s1663_s30, 128  ;;  %s1213_s15 = scalar_lea.hbm %s1779_s9, 256 }
 0x2f5   : > { %p1210_p2 = scmp.ne.s32.totalorder %s1663_s30, %s1209_s10  ;;  %p1214_p1 = scmp.lt.u32.totalorder %s1663_s30, %s1779_s9 }
 0x2f6   : > { %p1215_p3 = scmp.lt.u32.totalorder %s1213_s15, %s1209_s10  ;;  %p1217_p6 = scmp.lt.u32.totalorder %s1209_s10, %s1663_s30 }
 0x2f7   : > { %p1211_p7 = pnand %p1210_p2, %p1780_p10 }
 0x2f8   : > { %p1216_p4 = por %p1215_p3, %p1214_p1 }
 0x2f9   : > { %p1212_p9 = pneg %p1211_p7 }
 0x2fa   : > { %p1218_p13 = por %p1217_p6, %p1216_p4 }
 0x2fc   : > { %p1219_p11 = pnand %p1218_p13, %p1212_p9 }
 0x2fe   : > { %1222 = shalt.err (!%p1219_p11)
}
 0x2ff   : > { %894 = dma.vmem_to_hbm [thread:$0]  (%p1780_p10), %s609_s21, 128, %s1663_s30, %s595_s12  }
 0x300 PF: > { %s1781_s14 = sld [smem:[#allocation17_spill]]  ;;  %s1782_s24 = sld [smem:[#allocation22_spill]] }
 0x301   : > { %p926_p0 = scmp.ge.s32.totalorder %s1325_s28, 2 }
 0x306   : > { %s620_s29 = sand.u32 1, %s1781_s14   ;;  %p1783_p5 = scmp.ne.s32.totalorder %s1782_s24, 0 }
 0x307   : > { %s621_s17 = scalar_lea.sflag [#allocation5], %s620_s29 }
 0x308   : > { %p914_p8 = pnand %p926_p0, %p1783_p5 }
 0x30a   : > { %1280 = dma.done.wait (!%p914_p8), %s621_s17, 128  }
 0x30b   : > { %1282 = vsyncadd (!%p914_p8), %s621_s17, 4294967168  ;;  %s23_s28 = sadd.s32 1, %s1325_s28   ;;  %s1784_s18 = sld [smem:[#allocation18_spill]] }
 0x30c   : > { %p20_p12 = scmp.ge.s32.totalorder %s23_s28, 6   ;;  %s1785_s19 = smov %s1293_s20 }
 0x30d   : > { %s1786_s20 = smov %s1575_s25  ;;  %s1787_s21 = smov %s1301_s22 }
 0x30e   : > { %s1788_s22 = smov %s1305_s23  ;;  %s1789_s23 = smov %s1578_s8 }
 0x30f   : > { %s1790_s24 = smov %s1317_s26  ;;  %s1791_s25 = smov %s1321_s27 }
 0x310   : > { %s1792_s26 = smov %s1795_s11  ;;  %s1793_s27 = smov %s1799_s13 }
 0x311   :  { %22 = sbr.rel (!%p20_p12) target bundleno = 17 (0x11), region = 109 }
 0x318   :  { %626 = vsyncpa [#allocation4], 1 }
 0x319   :  { %628 = vsyncpa [#allocation4 + $0x1], 1 }
 0x31a   :  { %629 = vsyncpa [#allocation7], 1 }
 0x31b   :  { %630 = vsyncpa [#allocation10], 1 }
 0x31c   :  { %631 = vsyncpa [#allocation5], 1 }
 0x31d   :  { %633 = vsyncpa [#allocation5 + $0x1], 1 }

// kernel: fish_classifier_forward.3
= control target key start
LH: loop header
LB: loop body
LE: loop exit
PB: predicated region body
PF: predicated region fallthrough
CT: control target
= control target key end

     0   :  { %8 = vsyncpa [#allocation3], 0  ;;  %s3448_s0 = inlined_call_operand.hbm [shape: bf16[2,9,9,12], index: 0, kind: input, shape index: {}]   ;;  %s3449_s1 = inlined_call_operand.hbm [shape: bf16[27,128], index: 1, kind: input, shape index: {}]   ;;  %s3450_s2 = inlined_call_operand.hbm [shape: f32[1,128], index: 2, kind: input, shape index: {}]   ;;  %s3451_s3 = inlined_call_operand.hbm [shape: bf16[2,64,128], index: 3, kind: output, shape index: {}]  }
   0x1   :  { %9 = vsyncpa [#allocation6], 0 }
   0x2   :  { %10 = vsyncpa [#allocation4], 0  ;;  %s2794_s12 = smov [#allocation5]   ;;  %s2795_s14 = smov [#allocation2]  }
   0x3   :  { %s28_s13 = sshll.u32 %s2794_s12, 4  ;;  %s16_s15 = sshll.u32 %s2795_s14, 4  ;;  %s29_s13 = int_to_ptr.vmem [resolvable:$true] %s28_s13  ;;  %s2824_s15 = int_to_ptr.vmem [resolvable:$true] %s16_s15 }
   0x4   :  { %s2700_s18 = scalar_lea.hbm %s3449_s1, 256 }
   0x5   :  { %p2701_p0 = scmp.ne.s32.totalorder %s3449_s1, %s2700_s18  ;;  %p2704_p1 = scmp.lt.u32.totalorder %s2700_s18, %s3449_s1 }
   0x7   :  { %p2706_p2 = pnand %p2704_p1, %p2701_p0 }
   0x9   :  { %2709 = shalt.err (!%p2706_p2)
}
   0xa   :  { %s2710_s23 = scalar_lea.vmem %s29_s13, 256  ;;  %p2715_p4 = scmp.lt.s32.totalorder %s29_s13, %s29_s13 }
   0xb   :  { %p2711_p3 = scmp.ne.s32.totalorder %s29_s13, %s2710_s23  ;;  %p2716_p5 = scmp.lt.s32.totalorder %s2710_s23, %s2710_s23 }
   0xd   :  { %p2717_p6 = por %p2716_p5, %p2715_p4 }
   0xf   :  { %p2718_p7 = pnand %p2717_p6, %p2711_p3 }
  0x11   :  { %2721 = shalt.err (!%p2718_p7)
}
  0x12   :  { %s2796_s24 = smov 64   ;;  %s2797_s25 = smov 4  }
  0x13   :  { %34 = dma.hbm_to_vmem [thread:$0]  %s3449_s1, 256, %s29_s13, [#allocation6], %s2796_s24, %s2796_s24, %s2797_s25  }
  0x14   :  { %s2722_s30 = scalar_lea.hbm %s3448_s0, 2304 }
  0x15   :  { %p2723_p8 = scmp.ne.s32.totalorder %s3448_s0, %s2722_s30  ;;  %p2726_p9 = scmp.lt.u32.totalorder %s2722_s30, %s3448_s0 }
  0x17   :  { %p2728_p10 = pnand %p2726_p9, %p2723_p8 }
  0x19   :  { %2731 = shalt.err (!%p2728_p10)
}
  0x1a   :  { %s2732_s8 = scalar_lea.vmem %s2824_s15, 2304  ;;  %p2737_p12 = scmp.lt.s32.totalorder %s2824_s15, %s2824_s15 }
  0x1b   :  { %p2733_p11 = scmp.ne.s32.totalorder %s2824_s15, %s2732_s8  ;;  %p2738_p13 = scmp.lt.s32.totalorder %s2732_s8, %s2732_s8 }
  0x1d   :  { %p2739_p0 = por %p2738_p13, %p2737_p12 }
  0x1f   :  { %p2740_p1 = pnand %p2739_p0, %p2733_p11 }
  0x21   :  { %2743 = shalt.err (!%p2740_p1)
}
  0x22   :  { %22 = dma.hbm_to_vmem [thread:$0]  %s3448_s0, 2304, %s2824_s15, [#allocation3], %s2796_s24, %s2796_s24, %s2797_s25  }
  0x23   :  { %s2798_s10 = smov [#allocation7]   ;;  %s2744_s14 = scalar_lea.hbm %s3450_s2, 16 }
  0x24   :  { %s41_s11 = sshll.u32 %s2798_s10, 4  ;;  %p2745_p2 = scmp.ne.s32.totalorder %s3450_s2, %s2744_s14  ;;  %s42_s11 = int_to_ptr.vmem [resolvable:$true] %s41_s11 }
  0x25   :  { %p2748_p3 = scmp.lt.u32.totalorder %s2744_s14, %s3450_s2 }
  0x27   :  { %p2750_p4 = pnand %p2748_p3, %p2745_p2 }
  0x29   :  { %2753 = shalt.err (!%p2750_p4)
}
  0x2a   :  { %s2754_s20 = scalar_lea.vmem %s42_s11, 16  ;;  %s2758_s0 = scalar_lea.vmem %s42_s11, 32 }
  0x2b   :  { %p2755_p5 = scmp.ne.s32.totalorder %s42_s11, %s2754_s20  ;;  %p2759_p6 = scmp.lt.s32.totalorder %s42_s11, %s42_s11 }
  0x2c   :  { %p2760_p7 = scmp.lt.s32.totalorder %s2758_s0, %s2754_s20 }
  0x2e   :  { %p2761_p8 = por %p2760_p7, %p2759_p6 }
  0x30   :  { %p2762_p9 = pnand %p2761_p8, %p2755_p5 }
  0x32   :  { %2765 = shalt.err (!%p2762_p9)
}
  0x33   :  { %44 = dma.hbm_to_vmem [thread:$0]  %s3450_s2, 16, %s42_s11, [#allocation6]  }
  0x34   :  { %2788 = dma.done.wait [#allocation3], 2304  }
  0x35   :  { %2789 = vsyncadd [#allocation3], 4294964992 }
  0x36   :  { %2790 = dma.done.wait [#allocation6], 272  }
  0x37   :  { %2791 = vsyncadd [#allocation6], 4294967024  ;;  %vm187_vm0 = vcmask 1040384   ;;  %vm415_vm1 = vsmask.f32 3328  ;;  %v2799_v0 = vmov 65535  }
  0x38   :  { %vm416_vm2 = vsmask.f32 7440  ;;  %v2873_v1 = vsel %vm187_vm0, 4294967295, %v2799_v0  ;;  %v55_v2 = vld [vmem:[#allocation2] sm:$0xf]  ;;  %s2800_s2 = smov 125  }
  0x39   :  { %v2875_v3 = vld [vmem:[#allocation2 + $0x8] sm:$0xf]  ;;  %v2877_v4 = vld [vmem:[#allocation2 + $0x10] sm:$0xf]  ;;  %v419_v6 = vshrl.u32 %v55_v2, 16  ;;  %v422_v7 = vshll.u32 %v55_v2, 16  ;;  %vm2931_vm3 = vmor %vm415_vm1, %vm416_vm2 }
  0x3a   :  { %v2880_v5 = vcombine.low %v55_v2, %v2875_v3  ;;  %v2882_v8 = vld [vmem:[#allocation2 + $0x18] sm:$0xf]  ;;  %v2884_v9 = vld [vmem:[#allocation2 + $0x20] sm:$0xf]  ;;  %v2890_v11 = vld [vmem:[#allocation2 + $0x28] sm:$0xf] }
  0x3b   :  { %v2888_v10 = vcombine.low %v2877_v4, %v2882_v8  ;;  %v2892_v12 = vld [vmem:[#allocation2 + $0x30] sm:$0xf]  ;;  %v2894_v13 = vld [vmem:[#allocation2 + $0x38] sm:$0xf]  ;;  %v2898_v14 = vld [vmem:[#allocation2 + $0x48] sm:$0xf]  ;;  %v2906_v17 = vcombine.low %v2884_v9, %v2890_v11 }
  0x3c   :  { %135 = vrot.lane.b32.xlu0 %v2880_v5, %s2800_s2  ;;  %v2900_v15 = vld [vmem:[#allocation2 + $0x50] sm:$0xf]  ;;  %v56_v16 = vld [vmem:[#allocation2 + $0x4] sm:$0x1]  ;;  %v531_v18 = vshrl.u32 %v2898_v14, 16  ;;  %v534_v19 = vshll.u32 %v2898_v14, 16  ;;  %v2916_v27 = vcombine.low %v2892_v12, %v2894_v13 }
  0x3d   :  { %137 = vrot.lane.b32.xlu1 %v2888_v10, %s2800_s2  ;;  %v58_v20 = vld [vmem:[#allocation2 + $0xc] sm:$0x1]  ;;  %v421_v21 = vrot.slane %v419_v6, 4  ;;  %v424_v22 = vrot.slane %v422_v7, 5  ;;  %v428_v23 = vshll.u32 %v56_v16, 16  ;;  %v433_v24 = vshrl.u32 %v2875_v3, 16 }
  0x3e   :  { %v436_v25 = vshll.u32 %v2875_v3, 16  ;;  %v2912_v26 = vld [vmem:[#allocation2 + $0x58] sm:$0xf]  ;;  %v2920_v28 = vcombine.low %v2898_v14, %v2900_v15  ;;  %v442_v29 = vshll.u32 %v58_v20, 16  ;;  %v2922_v30 = vld [vmem:[#allocation2 + $0x60] sm:$0xf] }
  0x3f   :  { %v60_v31 = vld [vmem:[#allocation2 + $0x14] sm:$0x1]  ;;  %v447_v32 = vshrl.u32 %v2877_v4, 16  ;;  %s2801_s22 = smov 119   ;;  %v425_v33 = vor.u32 %v424_v22, %v421_v21  ;;  %v430_v34 = vrot.slane %v428_v23, 5  ;;  %v435_v35 = vrot.slane %v433_v24, 4 }
  0x40   :  { %974 = vrot.lane.b32.xlu0 %v2880_v5, %s2801_s22  ;;  %v438_v36 = vrot.slane %v436_v25, 5  ;;  %v62_v37 = vld [vmem:[#allocation2 + $0x1c] sm:$0x1]  ;;  %v444_v39 = vrot.slane %v442_v29, 5  ;;  %v2937_v40 = vcombine.low %v2912_v26, %v2922_v30  ;;  %v450_v42 = vshll.u32 %v2877_v4, 16  ;;  %s2802_s23 = smov 122  }
  0x41   :  { %976 = vrot.lane.b32.xlu1 %v2888_v10, %s2801_s22  ;;  %v449_v41 = vrot.slane %v447_v32, 4  ;;  %v2940_v43 = vld [vmem:[#allocation2 + $0x68] sm:$0xf]  ;;  %v426_v44 = vrot.slane %v425_v33, 4  ;;  %v456_v46 = vshll.u32 %v60_v31, 16  ;;  %v461_v47 = vshrl.u32 %v2882_v8, 16 }
  0x42   :  { %v439_v45 = vor.u32 %v438_v36, %v435_v35  ;;  %v2943_v48 = vld [vmem:[#allocation2 + $0x70] sm:$0xf]  ;;  %v452_v49 = vrot.slane %v450_v42, 5  ;;  %v464_v50 = vshll.u32 %v2882_v8, 16  ;;  %v470_v51 = vshll.u32 %v62_v37, 16  ;;  %s2803_s26 = smov [#allocation8]  }
  0x43   :  { %v2948_v52 = vcombine.low %v2940_v43, %v2943_v48  ;;  %v64_v53 = vld [vmem:[#allocation2 + $0x24] sm:$0x1]  ;;  %v431_v54 = vsel %vm2931_vm3, %v426_v44, %v430_v34  ;;  %v458_v56 = vrot.slane %v456_v46, 5  ;;  %v463_v57 = vrot.slane %v461_v47, 4  ;;  %v66_v58 = vld [vmem:[#allocation2 + $0x2c] sm:$0x1] }
  0x44   :  { %139 = vrot.lane.b32.xlu0 %v2906_v17, %s2800_s2  ;;  %v440_v55 = vrot.slane %v439_v45, 4  ;;  %v453_v59 = vor.u32 %v452_v49, %v449_v41  ;;  %v466_v60 = vrot.slane %v464_v50, 5  ;;  %v472_v61 = vrot.slane %v470_v51, 5  ;;  %v2957_v63 = vld [vmem:[#allocation2 + $0x78] sm:$0xf]  ;;  %s2014_s27 = sshll.u32 %s2803_s26, 4  ;;  %s2015_s27 = int_to_ptr.vmem [resolvable:$true] %s2014_s27 }
  0x45   :  { %978 = vrot.lane.b32.xlu1 %v2906_v17, %s2801_s22  ;;  %v475_v62 = vshrl.u32 %v2884_v9, 16  ;;  %v478_v2 = vshll.u32 %v2884_v9, 16  ;;  %v484_v6 = vshll.u32 %v64_v53, 16  ;;  %v489_v7 = vshrl.u32 %v2890_v11, 16  ;;  %v2965_v16 = vld [vmem:[#allocation2 + $0x80] sm:$0xf]  ;;  %p2771_p11 = scmp.lt.s32.totalorder %s2015_s27, %s2015_s27 }
  0x46   :  { %v2961_v0 = vsel %vm2931_vm3, %v440_v55, %v444_v39  ;;  %v454_v21 = vrot.slane %v453_v59, 4  ;;  %v467_v22 = vor.u32 %v466_v60, %v463_v57  ;;  %v492_v31 = vshll.u32 %v2890_v11, 16  ;;  %v68_v32 = vld [vmem:[#allocation2 + $0x34] sm:$0x1]  ;;  %v70_v46 = vld [vmem:[#allocation2 + $0x3c] sm:$0x1] }
  0x47   :  { %v2968_v20 = vcombine.low %v431_v54, %v2961_v0  ;;  %v477_v23 = vrot.slane %v475_v62, 4  ;;  %v480_v24 = vrot.slane %v478_v2, 5  ;;  %v486_v25 = vrot.slane %v484_v6, 5  ;;  %v2999_v55 = vld [vmem:[#allocation2 + $0x40] sm:$0xf]  ;;  %s2766_s28 = scalar_lea.vmem %s2015_s27, 1024 }
  0x48   :  { %141 = vrot.lane.b32.xlu0 %v2916_v27, %s2800_s2  ;;  %v491_v29 = vrot.slane %v489_v7, 4  ;;  %v2977_v33 = vsel %vm2931_vm3, %v454_v21, %v458_v56  ;;  %v468_v34 = vrot.slane %v467_v22, 4  ;;  %v498_v35 = vshll.u32 %v66_v58, 16  ;;  %v72_v62 = vld [vmem:[#allocation2 + $0x44] sm:$0x1]  ;;  %p2767_p10 = scmp.ne.s32.totalorder %s2015_s27, %s2766_s28  ;;  %p2772_p12 = scmp.lt.s32.totalorder %s2766_s28, %s2766_s28 }
  0x49   :  { %980 = vrot.lane.b32.xlu1 %v2916_v27, %s2801_s22  ;;  %v2981_v36 = vcombine.low %v2957_v63, %v2965_v16  ;;  %v481_v39 = vor.u32 %v480_v24, %v477_v23  ;;  %v494_v41 = vrot.slane %v492_v31, 5  ;;  %v503_v42 = vshrl.u32 %v2892_v12, 16  ;;  %v74_v24 = vld [vmem:[#allocation2 + $0x4c] sm:$0x1]  ;;  %v78_v14 = vld [vmem:[#allocation2 + $0x5c] sm:$0x1] }
  0x4a   :  { %v2988_v44 = vsel %vm2931_vm3, %v468_v34, %v472_v61  ;;  %v500_v45 = vrot.slane %v498_v35, 5  ;;  %v506_v47 = vshll.u32 %v2892_v12, 16  ;;  %v512_v49 = vshll.u32 %v68_v32, 16  ;;  %v91_v7 = vld [vmem:[#allocation5] sm:$0xf]  ;;  %p2773_p13 = por %p2772_p12, %p2771_p11 }
  0x4b   :  { %v2995_v50 = vcombine.low %v2977_v33, %v2988_v44  ;;  %v482_v51 = vrot.slane %v481_v39, 4  ;;  %v495_v53 = vor.u32 %v494_v41, %v491_v29  ;;  %v505_v54 = vrot.slane %v503_v42, 4 }
  0x4c   :  { %143 = vrot.lane.b32.xlu0 %v2920_v28, %s2800_s2  ;;  %v508_v56 = vrot.slane %v506_v47, 5  ;;  %v514_v57 = vrot.slane %v512_v49, 5  ;;  %v517_v58 = vshrl.u32 %v2894_v13, 16  ;;  %v520_v59 = vshll.u32 %v2894_v13, 16  ;;  %p2774_p0 = pnand %p2773_p13, %p2767_p10 }
  0x4d   :  { %1131 = vrot.lane.b32.xlu1 %v2968_v20, %s2802_s23  ;;  %v3005_v60 = vsel %vm2931_vm3, %v482_v51, %v486_v25  ;;  %v496_v61 = vrot.slane %v495_v53, 4  ;;  %v526_v2 = vshll.u32 %v70_v46, 16  ;;  %v1617_v6 = vshrl.u32 %v2999_v55, 16  ;;  %v76_v46 = vld [vmem:[#allocation2 + $0x54] sm:$0x1] }
  0x4e   :  { %v509_v21 = vor.u32 %v508_v56, %v505_v54  ;;  %v519_v22 = vrot.slane %v517_v58, 4  ;;  %v522_v23 = vrot.slane %v520_v59, 5  ;;  %v1620_v32 = vshll.u32 %v2999_v55, 16 }
  0x4f   :  { %v3014_v29 = vsel %vm2931_vm3, %v496_v61, %v500_v45  ;;  %v528_v25 = vrot.slane %v526_v2, 5  ;;  %v1619_v31 = vrot.slane %v1617_v6, 4  ;;  %v1626_v41 = vshll.u32 %v72_v62, 16 }
  0x50   :  { %145 = vrot.lane.b32.xlu0 %v2937_v40, %s2800_s2  ;;  %v3021_v34 = vcombine.low %v3005_v60, %v3014_v29  ;;  %v510_v35 = vrot.slane %v509_v21, 4  ;;  %v523_v39 = vor.u32 %v522_v23, %v519_v22  ;;  %v1622_v42 = vrot.slane %v1620_v32, 5  ;;  %v80_v32 = vld [vmem:[#allocation2 + $0x64] sm:$0x1] }
  0x51   :  { %1133 = vrot.lane.b32.xlu1 %v2995_v50, %s2802_s23  ;;  %v533_v45 = vrot.slane %v531_v18, 4  ;;  %v536_v47 = vrot.slane %v534_v19, 5  ;;  %v540_v49 = vshll.u32 %v74_v24, 16  ;;  %v1628_v54 = vrot.slane %v1626_v41, 5 }
  0x52   :  { %v3029_v51 = vsel %vm2931_vm3, %v510_v35, %v514_v57  ;;  %v524_v53 = vrot.slane %v523_v39, 4  ;;  %v545_v56 = vshrl.u32 %v2900_v15, 16  ;;  %v1623_v58 = vor.u32 %v1622_v42, %v1619_v31 }
  0x53   :  { %v537_v18 = vor.u32 %v536_v47, %v533_v45  ;;  %v542_v61 = vrot.slane %v540_v49, 5  ;;  %v548_v62 = vshll.u32 %v2900_v15, 16  ;;  %v554_v2 = vshll.u32 %v76_v46, 16  ;;  %v82_v45 = vld [vmem:[#allocation2 + $0x6c] sm:$0x1] }
  0x54   :  { %147 = vrot.lane.b32.xlu0 %v2948_v52, %s2800_s2  ;;  %v529_v19 = vsel %vm2931_vm3, %v524_v53, %v528_v25  ;;  %v547_v57 = vrot.slane %v545_v56, 4  ;;  %v1624_v21 = vrot.slane %v1623_v58, 4  ;;  %v559_v23 = vshrl.u32 %v2912_v26, 16 }
  0x55   :  { %1135 = vrot.lane.b32.xlu1 %v3021_v34, %s2802_s23  ;;  %v3042_v6 = vcombine.low %v3029_v51, %v529_v19  ;;  %v538_v22 = vrot.slane %v537_v18, 4  ;;  %v550_v24 = vrot.slane %v548_v62, 5  ;;  %v556_v31 = vrot.slane %v554_v2, 5 }
  0x56   :  { %v562_v35 = vshll.u32 %v2912_v26, 16  ;;  %v568_v39 = vshll.u32 %v78_v14, 16  ;;  %v1629_v25 = vsel %vm2931_vm3, %v1624_v21, %v1628_v54  ;;  %v561_v42 = vrot.slane %v559_v23, 4  ;;  %v84_v23 = vld [vmem:[#allocation2 + $0x74] sm:$0x1] }
  0x57   :  { %v543_v41 = vsel %vm2931_vm3, %v538_v22, %v542_v61  ;;  %v573_v46 = vshrl.u32 %v2922_v30, 16  ;;  %v3053_v47 = vcombine.low %v529_v19, %v1629_v25  ;;  %v551_v49 = vor.u32 %v550_v24, %v547_v57 }
  0x58   :  { %149 = vrot.lane.b32.xlu0 %v2981_v36, %s2800_s2  ;;  %v564_v53 = vrot.slane %v562_v35, 5  ;;  %v570_v56 = vrot.slane %v568_v39, 5  ;;  %v576_v18 = vshll.u32 %v2922_v30, 16  ;;  %v582_v14 = vshll.u32 %v80_v32, 16 }
  0x59   :  { %1137 = vrot.lane.b32.xlu1 %v3042_v6, %s2802_s23  ;;  %v575_v58 = vrot.slane %v573_v46, 4  ;;  %v587_v54 = vshrl.u32 %v2940_v43, 16  ;;  %v552_v62 = vrot.slane %v551_v49, 4  ;;  %v590_v2 = vshll.u32 %v2940_v43, 16  ;;  %v86_v49 = vld [vmem:[#allocation2 + $0x7c] sm:$0x1] }
  0x5a   :  { %v565_v61 = vor.u32 %v564_v53, %v561_v42  ;;  %v596_v21 = vshll.u32 %v82_v45, 16  ;;  %v578_v22 = vrot.slane %v576_v18, 5  ;;  %v584_v19 = vrot.slane %v582_v14, 5 }
  0x5b   :  { %v589_v25 = vrot.slane %v587_v54, 4  ;;  %v601_v59 = vshrl.u32 %v2943_v48, 16  ;;  %v3063_v57 = vsel %vm2931_vm3, %v552_v62, %v556_v31  ;;  %v592_v35 = vrot.slane %v590_v2, 5 }
  0x5c   :  { %v566_v24 = vrot.slane %v565_v61, 4  ;;  %v598_v32 = vrot.slane %v596_v21, 5  ;;  %vm188_vm4 = vcmask 1041408   ;;  %v3066_v39 = vcombine.low %v543_v41, %v3063_v57 }
  0x5d   :  { %v579_v42 = vor.u32 %v578_v22, %v575_v58  ;;  %v603_v46 = vrot.slane %v601_v59, 4  ;;  %v604_v45 = vshll.u32 %v2943_v48, 16  ;;  %v593_v18 = vor.u32 %v592_v35, %v589_v25 }
  0x5e   :  { %v3071_v53 = vsel %vm2931_vm3, %v566_v24, %v570_v56  ;;  %v610_v14 = vshll.u32 %v84_v23, 16  ;;  %v615_v31 = vshrl.u32 %v2957_v63, 16  ;;  %1139 = vrot.lane.b32.xlu0 %v3066_v39, %s2802_s23  ;;  %v618_v59 = vshll.u32 %v2957_v63, 16  ;;  %v88_v23 = vld [vmem:[#allocation2 + $0x84] sm:$0x1] }
  0x5f   :  { %v580_v54 = vrot.slane %v579_v42, 4  ;;  %v606_v58 = vrot.slane %v604_v45, 5  ;;  %v594_v62 = vrot.slane %v593_v18, 4  ;;  %v624_v21 = vshll.u32 %v86_v49, 16  ;;  %v90_v45 = vld [vmem:[#allocation2 + $0x8c] sm:$0x1] }
  0x60   :  { %v612_v61 = vrot.slane %v610_v14, 5  ;;  %v617_v2 = vrot.slane %v615_v31, 4  ;;  %v620_v25 = vrot.slane %v618_v59, 5  ;;  %v629_v24 = vshrl.u32 %v2965_v16, 16 }
  0x61   :  { %v3081_v56 = vsel %vm2931_vm3, %v580_v54, %v584_v19  ;;  %v607_v22 = vor.u32 %v606_v58, %v603_v46  ;;  %v3090_v42 = vsel %vm2931_vm3, %v594_v62, %v598_v32  ;;  %v626_v18 = vrot.slane %v624_v21, 5  ;;  %v3095_v46 = vld [vmem:[#allocation2 + $0x88] sm:$0xf] }
  0x62   :  { %v3086_v35 = vcombine.low %v3071_v53, %v3081_v56  ;;  %3457 = vst [vmem:[#allocation12_spill] sm:$0xff] %v3090_v42  ;;  %v632_v49 = vshll.u32 %v2965_v16, 16  ;;  %v621_v31 = vor.u32 %v620_v25, %v617_v2  ;;  %v631_v54 = vrot.slane %v629_v24, 4 }
  0x63   :  { %v608_v14 = vrot.slane %v607_v22, 4  ;;  %v638_v59 = vshll.u32 %v88_v23, 16  ;;  %v1631_v32 = vshrl.u32 %v3095_v46, 16  ;;  %v1634_v62 = vshll.u32 %v3095_v46, 16 }
  0x64   :  { %1141 = vrot.lane.b32.xlu1 %v3086_v35, %s2802_s23  ;;  %v634_v58 = vrot.slane %v632_v49, 5  ;;  %v622_v22 = vrot.slane %v621_v31, 4  ;;  %v1640_v41 = vshll.u32 %v90_v45, 16  ;;  %v92_v49 = vld [vmem:[#allocation5 + $0x4] sm:$0xf]  ;;  %v3119_v45 = vsel %vm188_vm4, %v2873_v1, 0 }
  0x65   :  { %v3103_v21 = vsel %vm2931_vm3, %v608_v14, %v612_v61  ;;  %v640_v25 = vrot.slane %v638_v59, 5  ;;  %v1633_v24 = vrot.slane %v1631_v32, 4  ;;  %v1636_v37 = vrot.slane %v1634_v62, 5  ;;  %v93_v14 = vld [vmem:[#allocation5 + $0x8] sm:$0xf] }
  0x66   :  { %3458 = vst [vmem:[#allocation13_spill] sm:$0xff] %v3103_v21  ;;  %v3107_v19 = vcombine.low %v3090_v42, %v3103_v21  ;;  %v635_v2 = vor.u32 %v634_v58, %v631_v54  ;;  %v3111_v23 = vsel %vm2931_vm3, %v622_v22, %v626_v18  ;;  %v3115_v61 = vcombine.low %v2875_v3, %v2877_v4 }
  0x67   :  { %3459 = vst [vmem:[#allocation14_spill] sm:$0xff] %v3111_v23  ;;  %v3127_v18 = vcombine.low %v2882_v8, %v2884_v9  ;;  %v3131_v3 = vcombine.low %v2890_v11, %v2892_v12  ;;  %v1637_v4 = vor.u32 %v1636_v37, %v1633_v24  ;;  %v1642_v58 = vrot.slane %v1640_v41, 5 }
  0x68   :  { %1143 = vrot.lane.b32.xlu0 %v3107_v19, %s2802_s23  ;;  %v636_v31 = vrot.slane %v635_v2, 4  ;;  %v2035_v1 = vcombine.low %v91_v7, %v91_v7  ;;  %v2069_v59 = vcombine.low %v92_v49, %v92_v49  ;;  %v2086_v62 = vcombine.low %v92_v49, %v93_v14 }
  0x69   :  { %v2103_v22 = vcombine.low %v93_v14, %v93_v14  ;;  %v2060_v2 = vcombine.low %v91_v7, %v92_v49  ;;  %v1638_v21 = vrot.slane %v1637_v4, 4  ;;  %vm162_vm5 = vcmask 23552  }
  0x6a   :  { %v641_v32 = vsel %vm2931_vm3, %v636_v31, %v640_v25  ;;  %v155_v8 = vshrl.u32 %v2035_v1, 16  ;;  %v158_v9 = vshll.u32 %v2035_v1, 16  ;;  %v990_v11 = vrot.slane %v2069_v59, 2 }
  0x6b   :  { %v3136_v54 = vcombine.low %v3111_v23, %v641_v32  ;;  %v1151_v12 = vshrl.u32 %v2086_v62, 16  ;;  %v1154_v37 = vshll.u32 %v2086_v62, 16  ;;  %v1311_v41 = vrot.slane %v2103_v22, 1 }
  0x6c   :  { %1452 = vrot.lane.b32.xlu0 %v3115_v61, %s2800_s2  ;;  %v1643_v24 = vsel %vm2931_vm3, %v1638_v21, %v1642_v58  ;;  %v157_v25 = vrot.slane %v155_v8, 1  ;;  %v160_v49 = vrot.slane %v158_v9, 2  ;;  %v669_v14 = vrot.slane %v2060_v2, 3 }
  0x6d   :  { %1145 = vrot.lane.b32.xlu1 %v3136_v54, %s2802_s23  ;;  %v3144_v31 = vcombine.low %v641_v32, %v1643_v24  ;;  %v3147_v4 = vand.u32 %v990_v11, %v3119_v45  ;;  %v1153_v1 = vrot.slane %v1151_v12, 3  ;;  %v1156_v23 = vrot.slane %v1154_v37, 4 }
  0x6e   :  { %v161_v42 = vor.u32 %v160_v49, %v157_v25  ;;  %v3150_v62 = vand.u32 %v1311_v41, %v3119_v45  ;;  %v3153_v38 = vand.u32 %v669_v14, %v3119_v45  ;;  %v1469_v21 = vshrl.u32 %v2103_v22, 16 }
  0x6f   :  { %2385 = vmatprep.subr.bf16.mxu0 %v3147_v4  ;;  %v1157_v58 = vor.u32 %v1156_v23, %v1153_v1  ;;  %v1472_v32 = vshll.u32 %v2103_v22, 16  ;;  %v3162_v2 = vcombine.low %v2894_v13, %v2999_v55  ;;  %v316_v9 = vand.u32 %v3119_v45, %v91_v7 }
  0x70   :  { %1456 = vrot.lane.b32.xlu0 %v3131_v3, %s2800_s2  ;;  %v192_v8 = vand.u32 %v3119_v45, %v161_v42  ;;  %2386 = vmatpush3.bf16.msra.mxu0 %v3147_v4  ;;  %v1471_v11 = vrot.slane %v1469_v21, 2  ;;  %v828_v41 = vshrl.u32 %v2069_v59, 16  ;;  %v830_v23 = vshll.u32 %v2069_v59, 16 }
  0x71   :  { %1454 = vrot.lane.b32.xlu1 %v3127_v18, %s2800_s2  ;;  %v1183_v12 = vand.u32 %v1157_v58, %v3119_v45  ;;  %v1474_v37 = vrot.slane %v1472_v32, 3  ;;  %v3174_v55 = vcombine.low %v2900_v15, %v2912_v26  ;;  %v3188_v24 = vcombine.low %v2922_v30, %v2940_v43 }
  0x72   :  { %2313 = vmatprep.subr.bf16.mxu1 %v192_v8  ;;  %v832_v13 = vrot.slane %v830_v23, 1  ;;  %v3196_v15 = vcombine.low %v2943_v48, %v2957_v63  ;;  %v3204_v26 = vcombine.low %v2965_v16, %v3095_v46  ;;  %v3467_v23 = vld [vmem:[#allocation14_spill] sm:$0xff] }
  0x73   :  { %2314 = vmatpush3.bf16.msra.mxu1 %v192_v8  ;;  %v1475_v22 = vor.u32 %v1474_v37, %v1471_v11  ;;  %2403 = vmatprep.subr.bf16.mxu0 %v1183_v12 }
  0x74   :  { %810 = vrot.lane.b32.xlu0 %v2880_v5, %s2802_s23  ;;  %2331 = vmatprep.subr.bf16.mxu1 %v316_v9  ;;  %v833_v42 = vor.u32 %v832_v13, %v828_v41  ;;  %v3466_v41 = vld [vmem:[#allocation13_spill] sm:$0xff] }
  0x75   :  { %1458 = vrot.lane.b32.xlu1 %v3162_v2, %s2800_s2  ;;  %v3177_v7 = vand.u32 %v1475_v22, %v3119_v45  ;;  %v3468_v22 = vcombine.low %v3466_v41, %v3467_v23 }
  0x76   :  { %v3182_v59 = vand.u32 %v833_v42, %v3119_v45 }
  0x78   :  { %812 = vrot.lane.b32.xlu0 %v2888_v10, %s2802_s23 }
  0x79   :  { %1460 = vrot.lane.b32.xlu1 %v3174_v55, %s2800_s2 }
  0x7c   :  { %814 = vrot.lane.b32.xlu0 %v2906_v17, %s2802_s23 }
  0x7d   :  { %1462 = vrot.lane.b32.xlu1 %v3188_v24, %s2800_s2 }
  0x80   :  { %816 = vrot.lane.b32.xlu0 %v2916_v27, %s2802_s23 }
  0x81   :  { %1464 = vrot.lane.b32.xlu1 %v3196_v15, %s2800_s2 }
  0x84   :  { %818 = vrot.lane.b32.xlu0 %v2920_v28, %s2802_s23 }
  0x85   :  { %1466 = vrot.lane.b32.xlu1 %v3204_v26, %s2800_s2 }
  0x88   :  { %822 = vrot.lane.b32.xlu0 %v2948_v52, %s2802_s23 }
  0x89   :  { %820 = vrot.lane.b32.xlu1 %v2937_v40, %s2802_s23 }
  0x8c   :  { %982 = vrot.lane.b32.xlu0 %v2920_v28, %s2801_s22 }
  0x8d   :  { %824 = vrot.lane.b32.xlu1 %v2981_v36, %s2802_s23 }
  0x90   :  { %986 = vrot.lane.b32.xlu0 %v2948_v52, %s2801_s22 }
  0x91   :  { %984 = vrot.lane.b32.xlu1 %v2937_v40, %s2801_s22 }
  0x95   :  { %988 = vrot.lane.b32.xlu1 %v2981_v36, %s2801_s22 }
  0xae   :  { %v136_v30 = vpop.permute.xlu0 %135 }
  0xaf   :  { %v138_v43 = vpop.permute.xlu1 %137  ;;  %2315 = vmatprep.mubr.msk.bf16.mxu1 %vm162_vm5, %v136_v30 }
  0xb0   :  { %2316 = vmatmul.mubr.msk.bf16.vlgmr.msra.gmra.mrb[0].mxu1 %vm162_vm5, %v138_v43 }
  0xb1   :  { %2332 = vmatpush3.bf16.msra.mxu1 %v316_v9 }
  0xb2   :  { %v975_v48 = vpop.permute.xlu0 %974  ;;  %2349 = vmatprep.subr.bf16.mxu1 %v3153_v38 }
  0xb3   :  { %v977_v63 = vpop.permute.xlu1 %976  ;;  %2387 = vmatprep.mubr.msk.bf16.mxu0 %vm162_vm5, %v975_v48 }
  0xb4   :  { %2388 = vmatmul.mubr.msk.bf16.vlgmr.msra.gmra.mrb[0].mxu0 %vm162_vm5, %v977_v63 }
  0xb5   :  { %2404 = vmatpush3.bf16.msra.mxu0 %v1183_v12 }
  0xb6   :  { %v140_v16 = vpop.permute.xlu0 %139  ;;  %2421 = vmatprep.subr.bf16.mxu0 %v3150_v62 }
  0xb7   :  { %v979_v46 = vpop.permute.xlu1 %978  ;;  %2319 = vmatprep.mubr.msk.bf16.mxu1 %vm162_vm5, %v140_v16 }
  0xb8   :  { %2391 = vmatprep.mubr.msk.bf16.mxu0 %vm162_vm5, %v979_v46 }
  0xba   :  { %v142_v25 = vpop.permute.xlu0 %141 }
  0xbb   :  { %v981_v49 = vpop.permute.xlu1 %980  ;;  %2320 = vmatmul.mubr.msk.bf16.gmra.mrb[4].mxu1 %vm162_vm5, %v142_v25 }
  0xbc   :  { %2392 = vmatmul.mubr.msk.bf16.gmra.mrb[4].mxu0 %vm162_vm5, %v981_v49 }
  0xbe   :  { %v144_v14 = vpop.permute.xlu0 %143 }
  0xbf   :  { %v1132_v1 = vpop.permute.xlu1 %1131  ;;  %2323 = vmatprep.mubr.msk.bf16.mxu1 %vm162_vm5, %v144_v14 }
  0xc0   :  { %2405 = vmatprep.mubr.msk.bf16.mxu0 %vm162_vm5, %v1132_v1 }
  0xc2   :  { %v146_v21 = vpop.permute.xlu0 %145 }
  0xc3   :  { %v1134_v58 = vpop.permute.xlu1 %1133  ;;  %2324 = vmatmul.mubr.msk.bf16.gmra.mrb[8].mxu1 %vm162_vm5, %v146_v21 }
  0xc4   :  { %2406 = vmatmul.mubr.msk.bf16.vlgmr.msra.gmra.mrb[0].mxu0 %vm162_vm5, %v1134_v58 }
  0xc5   :  { %2422 = vmatpush3.bf16.msra.mxu0 %v3150_v62 }
  0xc6   :  { %v148_v32 = vpop.permute.xlu0 %147  ;;  %2439 = vmatprep.subr.bf16.mxu0 %v3177_v7 }
  0xc7   :  { %v1136_v8 = vpop.permute.xlu1 %1135  ;;  %2327 = vmatprep.mubr.msk.bf16.mxu1 %vm162_vm5, %v148_v32 }
  0xc8   :  { %2409 = vmatprep.mubr.msk.bf16.mxu0 %vm162_vm5, %v1136_v8 }
  0xca   :  { %v150_v9 = vpop.permute.xlu0 %149 }
  0xcb   :  { %v1138_v11 = vpop.permute.xlu1 %1137  ;;  %2328 = vmatmul.mubr.msk.bf16.gmra.mrb[12].mxu1 %vm162_vm5, %v150_v9 }
  0xcc   :  { %2410 = vmatmul.mubr.msk.bf16.gmra.mrb[4].mxu0 %vm162_vm5, %v1138_v11  ;;  %2333 = vmatprep.mubr.msk.bf16.mxu1 %vm162_vm5, %v2880_v5 }
  0xd0   :  { %v1140_v12 = vpop.permute.xlu0 %1139 }
  0xd1   :  { %2413 = vmatprep.mubr.msk.bf16.mxu0 %vm162_vm5, %v1140_v12 }
  0xd3   :  { %2334 = vmatmul.mubr.msk.bf16.vlgmr.msra.gmra.mrb[0].mxu1 %vm162_vm5, %v2888_v10  ;;  %v94_v10 = vld [vmem:[#allocation5 + $0xc] sm:$0x3] }
  0xd4   :  { %2350 = vmatpush3.bf16.msra.mxu1 %v3153_v38  ;;  %2337 = vmatprep.mubr.msk.bf16.mxu1 %vm162_vm5, %v2906_v17  ;;  %v1679_v17 = vand.u32 %v3119_v45, %v94_v10 }
  0xd5   :  { %2367 = vmatprep.subr.bf16.mxu1 %v3182_v59 }
  0xd6   :  { %v1142_v62 = vpop.permute.xlu1 %1141 }
  0xd7   :  { %2414 = vmatmul.mubr.msk.bf16.gmra.mrb[8].mxu0 %vm162_vm5, %v1142_v62 }
  0xda   :  { %v1144_v37 = vpop.permute.xlu0 %1143 }
  0xdb   :  { %2338 = vmatmul.mubr.msk.bf16.gmra.mrb[4].mxu1 %vm162_vm5, %v2916_v27  ;;  %2417 = vmatprep.mubr.msk.bf16.mxu0 %vm162_vm5, %v1144_v37 }
  0xdc   :  { %2341 = vmatprep.mubr.msk.bf16.mxu1 %vm162_vm5, %v2920_v28 }
  0xde   :  { %v1453_v27 = vpop.permute.xlu0 %1452 }
  0xdf   :  { %v1146_v5 = vpop.permute.xlu1 %1145 }
  0xe0   :  { %2418 = vmatmul.mubr.msk.bf16.gmra.mrb[12].mxu0 %vm162_vm5, %v1146_v5 }
  0xe1   :  { %2423 = vmatprep.mubr.msk.bf16.mxu0 %vm162_vm5, %v3115_v61 }
  0xe2   :  { %v1457_v28 = vpop.permute.xlu0 %1456 }
  0xe3   :  { %2342 = vmatmul.mubr.msk.bf16.gmra.mrb[8].mxu1 %vm162_vm5, %v2937_v40  ;;  %v1455_v40 = vpop.permute.xlu1 %1454 }
  0xe4   :  { %2345 = vmatprep.mubr.msk.bf16.mxu1 %vm162_vm5, %v2948_v52 }
  0xe6   :  { %v811_v52 = vpop.permute.xlu0 %810 }
  0xe8   :  { %2424 = vmatmul.mubr.msk.bf16.vlgmr.msra.gmra.mrb[0].mxu0 %vm162_vm5, %v3127_v18  ;;  %v3460_v18 = vcombine.low %v2961_v0, %v2977_v33 }
  0xe9   :  { %2440 = vmatpush3.bf16.msra.mxu0 %v3177_v7  ;;  %2427 = vmatprep.mubr.msk.bf16.mxu0 %vm162_vm5, %v3131_v3 }
  0xea   :  { %2457 = vmatprep.subr.bf16.mxu0 %v1679_v17 }
  0xeb   :  { %2346 = vmatmul.mubr.msk.bf16.gmra.mrb[12].mxu1 %vm162_vm5, %v2981_v36  ;;  %v813_v36 = vpop.permute.xlu0 %812 }
  0xec   :  { %2351 = vmatprep.mubr.msk.bf16.mxu1 %vm162_vm5, %v2968_v20  ;;  %v1459_v20 = vpop.permute.xlu1 %1458 }
  0xf0   :  { %2428 = vmatmul.mubr.msk.bf16.gmra.mrb[4].mxu0 %vm162_vm5, %v3162_v2  ;;  %v3462_v2 = vcombine.low %v3014_v29, %v3029_v51  ;;  %v3464_v29 = vld [vmem:[#allocation12_spill] sm:$0xff] }
  0xf1   :  { %2431 = vmatprep.mubr.msk.bf16.mxu0 %vm162_vm5, %v3174_v55  ;;  %v3465_v51 = vcombine.low %v3081_v56, %v3464_v29 }
  0xf3   :  { %2352 = vmatmul.mubr.msk.bf16.vlgmr.msra.gmra.mrb[0].mxu1 %vm162_vm5, %v2995_v50  ;;  %v1461_v50 = vpop.permute.xlu1 %1460 }
  0xf4   :  { %2368 = vmatpush3.bf16.msra.mxu1 %v3182_v59  ;;  %2355 = vmatprep.mubr.msk.bf16.mxu1 %vm162_vm5, %v3021_v34  ;;  %v815_v34 = vpop.permute.xlu0 %814 }
  0xf5   :  { %2475 = vmatprep.subr.bf16.mxu1 %v3147_v4 }
  0xf8   :  { %2432 = vmatmul.mubr.msk.bf16.gmra.mrb[8].mxu0 %vm162_vm5, %v3188_v24  ;;  %v3351_v24 = vld [vmem:[#allocation7] ss:$0 sm:$0xff] }
  0xf9   :  { %2435 = vmatprep.mubr.msk.bf16.mxu0 %vm162_vm5, %v3196_v15 }
  0xfb   :  { %2356 = vmatmul.mubr.msk.bf16.gmra.mrb[4].mxu1 %vm162_vm5, %v3042_v6  ;;  %v1463_v6 = vpop.permute.xlu1 %1462 }
  0xfc   :  { %2359 = vmatprep.mubr.msk.bf16.mxu1 %vm162_vm5, %v3066_v39  ;;  %v817_v39 = vpop.permute.xlu0 %816 }
 0x100   :  { %2436 = vmatmul.mubr.msk.bf16.gmra.mrb[12].mxu0 %vm162_vm5, %v3204_v26 }
 0x101   :  { %2441 = vmatprep.mubr.msk.bf16.mxu0 %vm162_vm5, %v1453_v27 }
 0x103   :  { %2360 = vmatmul.mubr.msk.bf16.gmra.mrb[8].mxu1 %vm162_vm5, %v3086_v35  ;;  %v1465_v35 = vpop.permute.xlu1 %1464 }
 0x104   :  { %2363 = vmatprep.mubr.msk.bf16.mxu1 %vm162_vm5, %v3107_v19  ;;  %v819_v19 = vpop.permute.xlu0 %818 }
 0x107   :  { %v1467_v61 = vpop.permute.xlu1 %1466 }
 0x108   :  { %2442 = vmatmul.mubr.msk.bf16.vlgmr.msra.gmra.mrb[0].mxu0 %vm162_vm5, %v1455_v40 }
 0x109   :  { %2458 = vmatpush3.bf16.msra.mxu0 %v1679_v17  ;;  %2445 = vmatprep.mubr.msk.bf16.mxu0 %vm162_vm5, %v1457_v28 }
 0x10b   :  { %2364 = vmatmul.mubr.msk.bf16.gmra.mrb[12].mxu1 %vm162_vm5, %v3136_v54  ;;  %v821_v45 = vpop.permute.xlu1 %820  ;;  %v823_v54 = vpop.permute.xlu0 %822 }
 0x10c   :  { %2369 = vmatprep.mubr.msk.bf16.mxu1 %vm162_vm5, %v811_v52 }
 0x10f   :  { %v825_v3 = vpop.permute.xlu1 %824  ;;  %v983_v38 = vpop.permute.xlu0 %982 }
 0x110   :  { %2446 = vmatmul.mubr.msk.bf16.gmra.mrb[4].mxu0 %vm162_vm5, %v1459_v20 }
 0x111   :  { %2449 = vmatprep.mubr.msk.bf16.mxu0 %vm162_vm5, %v1461_v50 }
 0x113   :  { %2370 = vmatmul.mubr.msk.bf16.vlgmr.msra.gmra.mrb[0].mxu1 %vm162_vm5, %v813_v36  ;;  %v985_v0 = vpop.permute.xlu1 %984  ;;  %v987_v33 = vpop.permute.xlu0 %986 }
 0x114   :  { %2476 = vmatpush3.bf16.msra.mxu1 %v3147_v4  ;;  %2373 = vmatprep.mubr.msk.bf16.mxu1 %vm162_vm5, %v815_v34  ;;  %v3461_v4 = vcombine.low %v2988_v44, %v3005_v60  ;;  %v3463_v44 = vcombine.low %v3063_v57, %v3071_v53 }
 0x117   :  { %v989_v60 = vpop.permute.xlu1 %988 }
 0x118   :  { %2450 = vmatmul.mubr.msk.bf16.gmra.mrb[8].mxu0 %vm162_vm5, %v1463_v6 }
 0x119   :  { %2453 = vmatprep.mubr.msk.bf16.mxu0 %vm162_vm5, %v1465_v35 }
 0x11b   :  { %2374 = vmatmul.mubr.msk.bf16.gmra.mrb[4].mxu1 %vm162_vm5, %v817_v39 }
 0x11c   :  { %2377 = vmatprep.mubr.msk.bf16.mxu1 %vm162_vm5, %v819_v19 }
 0x120   :  { %2454 = vmatmul.mubr.msk.bf16.gmra.mrb[12].mxu0 %vm162_vm5, %v1467_v61 }
 0x121   :  { %2459 = vmatprep.mubr.msk.bf16.mxu0 %vm162_vm5, %v3460_v18 }
 0x123   :  { %2378 = vmatmul.mubr.msk.bf16.gmra.mrb[8].mxu1 %vm162_vm5, %v821_v45 }
 0x124   :  { %2381 = vmatprep.mubr.msk.bf16.mxu1 %vm162_vm5, %v823_v54 }
 0x128   :  { %2460 = vmatmul.mubr.msk.bf16.vlgmr.msra.gmra.mrb[0].mxu0 %vm162_vm5, %v3461_v4 }
 0x129   :  { %2463 = vmatprep.mubr.msk.bf16.mxu0 %vm162_vm5, %v3462_v2 }
 0x12b   :  { %2382 = vmatmul.mubr.msk.bf16.gmra.mrb[12].mxu1 %vm162_vm5, %v825_v3 }
 0x12c   :  { %2395 = vmatprep.mubr.msk.bf16.mxu1 %vm162_vm5, %v983_v38 }
 0x130   :  { %2464 = vmatmul.mubr.msk.bf16.gmra.mrb[4].mxu0 %vm162_vm5, %v3053_v47 }
 0x131   :  { %2467 = vmatprep.mubr.msk.bf16.mxu0 %vm162_vm5, %v3463_v44 }
 0x133   :  { %2396 = vmatmul.mubr.msk.bf16.vlgmr.msra.gmra.mrb[8].mxu1 %vm162_vm5, %v985_v0 }
 0x134   :  { %2399 = vmatprep.mubr.msk.bf16.mxu1 %vm162_vm5, %v987_v33 }
 0x138   :  { %2468 = vmatmul.mubr.msk.bf16.gmra.mrb[8].mxu0 %vm162_vm5, %v3465_v51 }
 0x139   :  { %2471 = vmatprep.mubr.msk.bf16.mxu0 %vm162_vm5, %v3468_v22 }
 0x13b   :  { %2400 = vmatmul.mubr.msk.bf16.gmra.mrb[12].mxu1 %vm162_vm5, %v989_v60 }
 0x140   :  { %2472 = vmatmul.mubr.msk.bf16.gmra.mrb[12].mxu0 %vm162_vm5, %v3144_v31 }
 0x1e6   :  { %v2371_v47 = vpop.f32.mrb[0].mxu1 }
 0x1e7   :  { %v895_v57 = vpop.f32.mrb[1].mxu1 }
 0x1e8   :  { %v2372_v53 = vpop.f32.mrb[2].mxu1 }
 0x1e9   :  { %v898_v13 = vpop.f32.mrb[3].mxu1 }
 0x1ee   :  { %v2375_v55 = vpop.f32.mrb[4].mxu1 }
 0x1ef   :  { %v911_v7 = vpop.f32.mrb[5].mxu1 }
 0x1f0   :  { %v2376_v42 = vpop.f32.mrb[6].mxu1 }
 0x1f1   :  { %v914_v56 = vpop.f32.mrb[7].mxu1 }
 0x1fb   :  { %v2461_v59 = vpop.f32.mrb[0].mxu0 }
 0x1fc   :  { %v2477_v15 = vadd.f32 %v2461_v59, %v2371_v47  ;;  %v1715_v26 = vpop.f32.mrb[1].mxu0 }
 0x1fd   :  { %v2478_v30 = vadd.f32 %v1715_v26, %v895_v57  ;;  %v2462_v43 = vpop.f32.mrb[2].mxu0 }
 0x1fe   :  { %v3354_v48 = vadd.f32 %v2477_v15, %v3351_v24  ;;  %v2479_v63 = vadd.f32 %v2462_v43, %v2372_v53  ;;  %v1718_v31 = vpop.f32.mrb[3].mxu0 }
 0x1ff   :  { %v3357_v16 = vadd.f32 %v2478_v30, %v3351_v24  ;;  %v2480_v46 = vadd.f32 %v1718_v31, %v898_v13 }
 0x200   :  { %v2139_v25 = vmul.f32 -1.442695, %v3354_v48  ;;  %v3361_v49 = vadd.f32 %v2479_v63, %v3351_v24 }
 0x201   :  { %v2137_v14 = vmul.f32 -1.442695, %v3357_v16  ;;  %v3365_v1 = vadd.f32 %v2480_v46, %v3351_v24 }
 0x202   :  { %2636 = vpow2.f32 %v2139_v25  ;;  %v2140_v21 = vmul.f32 -1.442695, %v3361_v49 }
 0x203   :  { %2638 = vpow2.f32 %v2137_v14  ;;  %v2138_v58 = vmul.f32 -1.442695, %v3365_v1  ;;  %v2465_v32 = vpop.f32.mrb[4].mxu0 }
 0x204   :  { %2640 = vpow2.f32 %v2140_v21  ;;  %v2481_v8 = vadd.f32 %v2465_v32, %v2375_v55  ;;  %v1731_v9 = vpop.f32.mrb[5].mxu0 }
 0x205   :  { %2642 = vpow2.f32 %v2138_v58  ;;  %v2482_v11 = vadd.f32 %v1731_v9, %v911_v7  ;;  %v2466_v12 = vpop.f32.mrb[6].mxu0 }
 0x206   :  { %v2397_v62 = vpop.f32.mrb[8].mxu1  ;;  %v3370_v37 = vadd.f32 %v2481_v8, %v3351_v24  ;;  %v2483_v5 = vadd.f32 %v2466_v12, %v2376_v42  ;;  %v1734_v10 = vpop.f32.mrb[7].mxu0 }
 0x207   :  { %v1084_v17 = vpop.f32.mrb[9].mxu1  ;;  %v3373_v27 = vadd.f32 %v2482_v11, %v3351_v24  ;;  %v2484_v28 = vadd.f32 %v1734_v10, %v914_v56 }
 0x208   :  { %v2398_v40 = vpop.f32.mrb[10].mxu1  ;;  %v2143_v52 = vmul.f32 -1.442695, %v3370_v37  ;;  %v3377_v20 = vadd.f32 %v2483_v5, %v3351_v24 }
 0x209   :  { %v1087_v36 = vpop.f32.mrb[11].mxu1  ;;  %v2141_v50 = vmul.f32 -1.442695, %v3373_v27  ;;  %v3381_v34 = vadd.f32 %v2484_v28, %v3351_v24 }
 0x20a   :  { %2644 = vpow2.f32 %v2143_v52  ;;  %v2144_v6 = vmul.f32 -1.442695, %v3377_v20 }
 0x20b   :  { %2646 = vpow2.f32 %v2141_v50  ;;  %v2142_v39 = vmul.f32 -1.442695, %v3381_v34  ;;  %v2469_v35 = vpop.f32.mrb[8].mxu0 }
 0x20c   :  { %v2637_v19 = vpop.eup %2636  ;;  %2648 = vpow2.f32 %v2144_v6  ;;  %v2485_v61 = vadd.f32 %v2469_v35, %v2397_v62  ;;  %v1747_v45 = vpop.f32.mrb[9].mxu0 }
 0x20d   :  { %v2639_v54 = vpop.eup %2638  ;;  %v1867_v18 = vadd.f32 1.0, %v2637_v19  ;;  %2650 = vpow2.f32 %v2142_v39  ;;  %v2486_v3 = vadd.f32 %v1747_v45, %v1084_v17  ;;  %v2470_v4 = vpop.f32.mrb[10].mxu0 }
 0x20e   :  { %v2401_v38 = vpop.f32.mrb[12].mxu1  ;;  %v2641_v2 = vpop.eup %2640  ;;  %v1865_v0 = vadd.f32 1.0, %v2639_v54  ;;  %v3386_v33 = vadd.f32 %v2485_v61, %v3351_v24  ;;  %v2487_v44 = vadd.f32 %v2470_v4, %v2398_v40 }
 0x20f   :  { %v1750_v60 = vpop.f32.mrb[11].mxu0  ;;  %v1100_v29 = vpop.f32.mrb[13].mxu1  ;;  %2652 = vrcp.f32 %v1867_v18  ;;  %v1868_v41 = vadd.f32 1.0, %v2641_v2  ;;  %v3389_v23 = vadd.f32 %v2486_v3, %v3351_v24 }
 0x210   :  { %v2643_v51 = vpop.eup %2642  ;;  %v2488_v22 = vadd.f32 %v1750_v60, %v1087_v36  ;;  %v2402_v47 = vpop.f32.mrb[14].mxu1  ;;  %2654 = vrcp.f32 %v1865_v0  ;;  %v2147_v53 = vmul.f32 -1.442695, %v3386_v33  ;;  %v3393_v13 = vadd.f32 %v2487_v44, %v3351_v24 }
 0x211   :  { %v1866_v57 = vadd.f32 1.0, %v2643_v51  ;;  %v1103_v55 = vpop.f32.mrb[15].mxu1  ;;  %2656 = vrcp.f32 %v1868_v41  ;;  %v2145_v7 = vmul.f32 -1.442695, %v3389_v23 }
 0x212   :  { %v3397_v42 = vadd.f32 %v2488_v22, %v3351_v24  ;;  %v2148_v56 = vmul.f32 -1.442695, %v3393_v13 }
 0x213   :  { %2658 = vrcp.f32 %v1866_v57  ;;  %v2473_v15 = vpop.f32.mrb[12].mxu0 }
 0x214   :  { %2660 = vpow2.f32 %v2147_v53  ;;  %v2146_v59 = vmul.f32 -1.442695, %v3397_v42  ;;  %v2645_v26 = vpop.eup %2644  ;;  %v2489_v30 = vadd.f32 %v2473_v15, %v2401_v38  ;;  %v1763_v43 = vpop.f32.mrb[13].mxu0 }
 0x215   :  { %2662 = vpow2.f32 %v2145_v7  ;;  %v2647_v63 = vpop.eup %2646  ;;  %v1871_v31 = vadd.f32 1.0, %v2645_v26  ;;  %v2490_v46 = vadd.f32 %v1763_v43, %v1100_v29  ;;  %v2474_v25 = vpop.f32.mrb[14].mxu0 }
 0x216   :  { %2664 = vpow2.f32 %v2148_v56  ;;  %v2649_v14 = vpop.eup %2648  ;;  %v1869_v21 = vadd.f32 1.0, %v2647_v63  ;;  %v3402_v58 = vadd.f32 %v2489_v30, %v3351_v24  ;;  %v2491_v32 = vadd.f32 %v2474_v25, %v2402_v47  ;;  %v1766_v8 = vpop.f32.mrb[15].mxu0 }
 0x217   :  { %2666 = vpow2.f32 %v2146_v59  ;;  %v2651_v9 = vpop.eup %2650  ;;  %v1872_v11 = vadd.f32 1.0, %v2649_v14  ;;  %v3405_v12 = vadd.f32 %v2490_v46, %v3351_v24  ;;  %v2492_v62 = vadd.f32 %v1766_v8, %v1103_v55 }
 0x218   :  { %2668 = vrcp.f32 %v1871_v31  ;;  %v1870_v5 = vadd.f32 1.0, %v2651_v9  ;;  %v2151_v10 = vmul.f32 -1.442695, %v3402_v58  ;;  %v3409_v17 = vadd.f32 %v2491_v32, %v3351_v24 }
 0x219   :  { %2670 = vrcp.f32 %v1869_v21  ;;  %v2653_v28 = vpop.eup %2652  ;;  %v2149_v40 = vmul.f32 -1.442695, %v3405_v12  ;;  %v3413_v52 = vadd.f32 %v2492_v62, %v3351_v24 }
 0x21a   :  { %2672 = vrcp.f32 %v1872_v11  ;;  %v2655_v36 = vpop.eup %2654  ;;  %v2152_v50 = vmul.f32 -1.442695, %v3409_v17  ;;  %v1915_v19 = vmul.f32 %v2653_v28, %v3354_v48 }
 0x21b   :  { %2674 = vrcp.f32 %v1870_v5  ;;  %v2657_v6 = vpop.eup %2656  ;;  %v2150_v39 = vmul.f32 -1.442695, %v3413_v52  ;;  %v1913_v54 = vmul.f32 %v2655_v36, %v3357_v16 }
 0x21c   :  { %2676 = vpow2.f32 %v2151_v10  ;;  %v1916_v61 = vmul.f32 %v2657_v6, %v3361_v49 }
 0x21d   :  { %v2659_v35 = vpop.eup %2658  ;;  %2678 = vpow2.f32 %v2149_v40 }
 0x21e   :  { %v2661_v45 = vpop.eup %2660  ;;  %v1914_v24 = vmul.f32 %v2659_v35, %v3365_v1  ;;  %2680 = vpow2.f32 %v2152_v50  ;;  %v2193_v3 = vpack.c.bf16 %v1916_v61, %v1915_v19 }
 0x21f   :  { %v2663_v18 = vpop.eup %2662  ;;  %v1875_v4 = vadd.f32 1.0, %v2661_v45  ;;  %2682 = vpow2.f32 %v2150_v39 }
 0x220   :  { %v2665_v38 = vpop.eup %2664  ;;  %v2188_v2 = vpack.c.bf16 %v1914_v24, %v1913_v54  ;;  %v1873_v0 = vadd.f32 1.0, %v2663_v18  ;;  %2225 = vst [vmem:[#allocation8 + $0x8] sm:$0xff] %v2193_v3  }
 0x221   :  { %v2667_v44 = vpop.eup %2666  ;;  %2684 = vrcp.f32 %v1875_v4  ;;  %v1876_v48 = vadd.f32 1.0, %v2665_v38 }
 0x222   :  { %v2669_v60 = vpop.eup %2668  ;;  %2189 = vst [vmem:[#allocation8] sm:$0xff] %v2188_v2   ;;  %2686 = vrcp.f32 %v1873_v0  ;;  %v1874_v49 = vadd.f32 1.0, %v2667_v44 }
 0x223   :  { %v2671_v29 = vpop.eup %2670  ;;  %2688 = vrcp.f32 %v1876_v48  ;;  %v1919_v51 = vmul.f32 %v2669_v60, %v3370_v37 }
 0x224   :  { %v2673_v16 = vpop.eup %2672  ;;  %2690 = vrcp.f32 %v1874_v49  ;;  %v1917_v47 = vmul.f32 %v2671_v29, %v3373_v27 }
 0x225   :  { %v2675_v1 = vpop.eup %2674  ;;  %v1920_v41 = vmul.f32 %v2673_v16, %v3377_v20 }
 0x226   :  { %v2677_v22 = vpop.eup %2676  ;;  %v1918_v57 = vmul.f32 %v2675_v1, %v3381_v34 }
 0x227   :  { %v2679_v53 = vpop.eup %2678  ;;  %v2203_v55 = vpack.c.bf16 %v1920_v41, %v1919_v51  ;;  %v1879_v7 = vadd.f32 1.0, %v2677_v22 }
 0x228   :  { %v2681_v56 = vpop.eup %2680  ;;  %v2198_v59 = vpack.c.bf16 %v1918_v57, %v1917_v47  ;;  %v1877_v15 = vadd.f32 1.0, %v2679_v53 }
 0x229   :  { %v2683_v26 = vpop.eup %2682  ;;  %2227 = vst [vmem:[#allocation8 + $0x18] sm:$0xff] %v2203_v55   ;;  %2692 = vrcp.f32 %v1879_v7  ;;  %v1880_v30 = vadd.f32 1.0, %v2681_v56 }
 0x22a   :  { %2226 = vst [vmem:[#allocation8 + $0x10] sm:$0xff] %v2198_v59   ;;  %2694 = vrcp.f32 %v1877_v15  ;;  %v1878_v37 = vadd.f32 1.0, %v2683_v26 }
 0x22b   :  { %v2685_v43 = vpop.eup %2684  ;;  %2696 = vrcp.f32 %v1880_v30 }
 0x22c   :  { %v2687_v20 = vpop.eup %2686  ;;  %2698 = vrcp.f32 %v1878_v37  ;;  %v1923_v34 = vmul.f32 %v2685_v43, %v3386_v33 }
 0x22d   :  { %v2689_v27 = vpop.eup %2688  ;;  %v1921_v46 = vmul.f32 %v2687_v20, %v3389_v23 }
 0x22e   :  { %v2691_v63 = vpop.eup %2690  ;;  %v1924_v31 = vmul.f32 %v2689_v27, %v3393_v13 }
 0x22f   :  { %v1922_v25 = vmul.f32 %v2691_v63, %v3397_v42 }
 0x230   :  { %v2213_v14 = vpack.c.bf16 %v1924_v31, %v1923_v34 }
 0x231   :  { %v2208_v21 = vpack.c.bf16 %v1922_v25, %v1921_v46 }
 0x232   :  { %2229 = vst [vmem:[#allocation8 + $0x28] sm:$0xff] %v2213_v14  }
 0x233   :  { %v2693_v32 = vpop.eup %2692  ;;  %2228 = vst [vmem:[#allocation8 + $0x20] sm:$0xff] %v2208_v21  }
 0x234   :  { %v2695_v8 = vpop.eup %2694  ;;  %v1927_v62 = vmul.f32 %v2693_v32, %v3402_v58 }
 0x235   :  { %v2697_v9 = vpop.eup %2696  ;;  %v1925_v33 = vmul.f32 %v2695_v8, %v3405_v12 }
 0x236   :  { %v2699_v11 = vpop.eup %2698  ;;  %v1928_v5 = vmul.f32 %v2697_v9, %v3409_v17 }
 0x237   :  { %v1926_v23 = vmul.f32 %v2699_v11, %v3413_v52 }
 0x238   :  { %v2223_v13 = vpack.c.bf16 %v1928_v5, %v1927_v62 }
 0x239   :  { %v2218_v42 = vpack.c.bf16 %v1926_v23, %v1925_v33 }
 0x23a   :  { %2231 = vst [vmem:[#allocation8 + $0x38] sm:$0xff] %v2223_v13  }
 0x23b   :  { %2230 = vst [vmem:[#allocation8 + $0x30] sm:$0xff] %v2218_v42  }
 0x23c   :  { %2777 = shalt.err (!%p2774_p0)
}
 0x23d   :  { %s2778_s4 = scalar_lea.hbm %s3451_s3, 1024 }
 0x23e   :  { %p2779_p1 = scmp.ne.s32.totalorder %s3451_s3, %s2778_s4  ;;  %p2782_p2 = scmp.lt.u32.totalorder %s2778_s4, %s3451_s3 }
 0x240   :  { %p2784_p3 = pnand %p2782_p2, %p2779_p1 }
 0x242   :  { %2787 = shalt.err (!%p2784_p3)
}
 0x243   :  { %2020 = dma.vmem_to_hbm [thread:$0]  %s2015_s27, 1024, %s3451_s3, [#allocation4], %s2796_s24, %s2796_s24, %s2797_s25  }
 0x244   :  { %2792 = dma.done.wait [#allocation4], 1024  }
 0x245   :  { %2793 = vsyncadd [#allocation4], 4294966272 }
 0x246   :  { %2024 = vsyncpa [#allocation3], 1 }
 0x247   :  { %2025 = vsyncpa [#allocation6], 1 }
 0x248   :  { %2026 = vsyncpa [#allocation4], 1 }

// kernel: fish_classifier_forward.4
= control target key start
LH: loop header
LB: loop body
LE: loop exit
PB: predicated region body
PF: predicated region fallthrough
CT: control target
= control target key end

     0   :  { %16 = vsyncpa [#allocation4], 0  ;;  %s5941_s0 = inlined_call_operand.hbm [shape: bf16[2,64,128], index: 0, kind: input, shape index: {}]   ;;  %s5942_s1 = inlined_call_operand.hbm [shape: bf16[128,128], index: 1, kind: input, shape index: {}]   ;;  %s5943_s2 = inlined_call_operand.hbm [shape: f32[1,128], index: 2, kind: input, shape index: {}]   ;;  %s5944_s3 = inlined_call_operand.hbm [shape: bf16[9,128], index: 3, kind: input, shape index: {}]   ;;  %s5945_s4 = inlined_call_operand.hbm [shape: f32[1,128], index: 4, kind: input, shape index: {}]   ;;  %s5946_s5 = inlined_call_operand.hbm [shape: bf16[128,128], index: 5, kind: input, shape index: {}]   ;;  %s5947_s6 = inlined_call_operand.hbm [shape: f32[1,128], index: 6, kind: input, shape index: {}]   ;;  %s5948_s7 = inlined_call_operand.hbm [shape: bf16[128,128], index: 7, kind: input, shape index: {}]   ;;  %s5949_s8 = inlined_call_operand.hbm [shape: f32[1,128], index: 8, kind: input, shape index: {}]   ;;  %s5950_s9 = inlined_call_operand.hbm [shape: bf16[128,128], index: 9, kind: input, shape index: {}]   ;;  %s5951_s10 = inlined_call_operand.hbm [shape: f32[1,128], index: 10, kind: input, shape index: {}]   ;;  %s5952_s11 = inlined_call_operand.hbm [shape: bf16[2,64,128], index: 11, kind: output, shape index: {}]  }
   0x1   :  { %17 = vsyncpa [#allocation7], 0 }
   0x2   :  { %18 = vsyncpa [#allocation10], 0 }
   0x3   :  { %19 = vsyncpa [#allocation13], 0 }
   0x4   :  { %20 = vsyncpa [#allocation16], 0 }
   0x5   :  { %21 = vsyncpa [#allocation19], 0 }
   0x6   :  { %22 = vsyncpa [#allocation5], 0  ;;  %s4108_s17 = smov [#allocation6]   ;;  %s4109_s19 = smov [#allocation9]  }
   0x7   :  { %s40_s18 = sshll.u32 %s4108_s17, 4  ;;  %s62_s20 = sshll.u32 %s4109_s19, 4  ;;  %s41_s18 = int_to_ptr.vmem [resolvable:$true] %s40_s18  ;;  %s4186_s20 = int_to_ptr.vmem [resolvable:$true] %s62_s20 }
   0x8   :  { %s3830_s23 = scalar_lea.hbm %s5942_s1, 1024 }
   0x9   :  { %p3831_p0 = scmp.ne.s32.totalorder %s5942_s1, %s3830_s23  ;;  %p3834_p1 = scmp.lt.u32.totalorder %s3830_s23, %s5942_s1 }
   0xb   :  { %p3836_p2 = pnand %p3834_p1, %p3831_p0 }
   0xd   :  { %3839 = shalt.err (!%p3836_p2)
}
   0xe   :  { %s3840_s28 = scalar_lea.vmem %s41_s18, 1024  ;;  %p3845_p4 = scmp.lt.s32.totalorder %s41_s18, %s41_s18 }
   0xf   :  { %p3841_p3 = scmp.ne.s32.totalorder %s41_s18, %s3840_s28  ;;  %p3846_p5 = scmp.lt.s32.totalorder %s3840_s28, %s3840_s28 }
  0x11   :  { %p3847_p6 = por %p3846_p5, %p3845_p4 }
  0x13   :  { %p3848_p7 = pnand %p3847_p6, %p3841_p3 }
  0x15   :  { %3851 = shalt.err (!%p3848_p7)
}
  0x16   :  { %s4110_s29 = smov 64   ;;  %s4111_s30 = smov 4  }
  0x17   :  { %46 = dma.hbm_to_vmem [thread:$0]  %s5942_s1, 1024, %s41_s18, [#allocation7], %s4110_s29, %s4110_s29, %s4111_s30  }
  0x18   :  { %s3852_s16 = scalar_lea.hbm %s5944_s3, 128 }
  0x19   :  { %p3853_p8 = scmp.ne.s32.totalorder %s5944_s3, %s3852_s16  ;;  %p3856_p9 = scmp.lt.u32.totalorder %s3852_s16, %s5944_s3 }
  0x1b   :  { %p3858_p10 = pnand %p3856_p9, %p3853_p8 }
  0x1d   :  { %3861 = shalt.err (!%p3858_p10)
}
  0x1e   :  { %s3862_s23 = scalar_lea.vmem %s4186_s20, 128  ;;  %p3867_p12 = scmp.lt.s32.totalorder %s4186_s20, %s4186_s20 }
  0x1f   :  { %p3863_p11 = scmp.ne.s32.totalorder %s4186_s20, %s3862_s23  ;;  %p3868_p13 = scmp.lt.s32.totalorder %s3862_s23, %s3862_s23 }
  0x21   :  { %p3869_p0 = por %p3868_p13, %p3867_p12 }
  0x23   :  { %p3870_p1 = pnand %p3869_p0, %p3863_p11 }
  0x25   :  { %3873 = shalt.err (!%p3870_p1)
}
  0x26   :  { %68 = dma.hbm_to_vmem [thread:$0]  %s5944_s3, 128, %s4186_s20, [#allocation10], %s4110_s29, %s4110_s29, %s4111_s30  }
  0x27   :  { %s4112_s24 = smov [#allocation12]   ;;  %s4113_s26 = smov [#allocation15]  }
  0x28   :  { %s84_s25 = sshll.u32 %s4112_s24, 4  ;;  %s106_s27 = sshll.u32 %s4113_s26, 4  ;;  %s85_s25 = int_to_ptr.vmem [resolvable:$true] %s84_s25  ;;  %s4223_s27 = int_to_ptr.vmem [resolvable:$true] %s106_s27 }
  0x29   :  { %s3874_s13 = scalar_lea.hbm %s5946_s5, 1024 }
  0x2a   :  { %p3875_p2 = scmp.ne.s32.totalorder %s5946_s5, %s3874_s13  ;;  %p3878_p3 = scmp.lt.u32.totalorder %s3874_s13, %s5946_s5 }
  0x2c   :  { %p3880_p4 = pnand %p3878_p3, %p3875_p2 }
  0x2e   :  { %3883 = shalt.err (!%p3880_p4)
}
  0x2f   :  { %s3884_s3 = scalar_lea.vmem %s85_s25, 1024  ;;  %p3889_p6 = scmp.lt.s32.totalorder %s85_s25, %s85_s25 }
  0x30   :  { %p3885_p5 = scmp.ne.s32.totalorder %s85_s25, %s3884_s3  ;;  %p3890_p7 = scmp.lt.s32.totalorder %s3884_s3, %s3884_s3 }
  0x32   :  { %p3891_p8 = por %p3890_p7, %p3889_p6 }
  0x34   :  { %p3892_p9 = pnand %p3891_p8, %p3885_p5 }
  0x36   :  { %3895 = shalt.err (!%p3892_p9)
}
  0x37   :  { %90 = dma.hbm_to_vmem [thread:$0]  %s5946_s5, 1024, %s85_s25, [#allocation13], %s4110_s29, %s4110_s29, %s4111_s30  }
  0x38   :  { %s3896_s23 = scalar_lea.hbm %s5948_s7, 1024 }
  0x39   :  { %p3897_p10 = scmp.ne.s32.totalorder %s5948_s7, %s3896_s23  ;;  %p3900_p11 = scmp.lt.u32.totalorder %s3896_s23, %s5948_s7 }
  0x3b   :  { %p3902_p12 = pnand %p3900_p11, %p3897_p10 }
  0x3d   :  { %3905 = shalt.err (!%p3902_p12)
}
  0x3e   :  { %s3906_s28 = scalar_lea.vmem %s4223_s27, 1024  ;;  %p3911_p0 = scmp.lt.s32.totalorder %s4223_s27, %s4223_s27 }
  0x3f   :  { %p3907_p13 = scmp.ne.s32.totalorder %s4223_s27, %s3906_s28  ;;  %p3912_p1 = scmp.lt.s32.totalorder %s3906_s28, %s3906_s28 }
  0x41   :  { %p3913_p2 = por %p3912_p1, %p3911_p0 }
  0x43   :  { %p3914_p3 = pnand %p3913_p2, %p3907_p13 }
  0x45   :  { %3917 = shalt.err (!%p3914_p3)
}
  0x46   :  { %112 = dma.hbm_to_vmem [thread:$0]  %s5948_s7, 1024, %s4223_s27, [#allocation16], %s4110_s29, %s4110_s29, %s4111_s30  }
  0x47   :  { %s4114_s12 = smov [#allocation18]   ;;  %s4115_s14 = smov [#allocation3]  }
  0x48   :  { %s128_s13 = sshll.u32 %s4114_s12, 4  ;;  %s28_s15 = sshll.u32 %s4115_s14, 4  ;;  %s129_s13 = int_to_ptr.vmem [resolvable:$true] %s128_s13  ;;  %s4260_s15 = int_to_ptr.vmem [resolvable:$true] %s28_s15 }
  0x49   :  { %s3918_s3 = scalar_lea.hbm %s5950_s9, 1024 }
  0x4a   :  { %p3919_p4 = scmp.ne.s32.totalorder %s5950_s9, %s3918_s3  ;;  %p3922_p5 = scmp.lt.u32.totalorder %s3918_s3, %s5950_s9 }
  0x4c   :  { %p3924_p6 = pnand %p3922_p5, %p3919_p4 }
  0x4e   :  { %3927 = shalt.err (!%p3924_p6)
}
  0x4f   :  { %s3928_s7 = scalar_lea.vmem %s129_s13, 1024  ;;  %p3933_p8 = scmp.lt.s32.totalorder %s129_s13, %s129_s13 }
  0x50   :  { %p3929_p7 = scmp.ne.s32.totalorder %s129_s13, %s3928_s7  ;;  %p3934_p9 = scmp.lt.s32.totalorder %s3928_s7, %s3928_s7 }
  0x52   :  { %p3935_p10 = por %p3934_p9, %p3933_p8 }
  0x54   :  { %p3936_p11 = pnand %p3935_p10, %p3929_p7 }
  0x56   :  { %3939 = shalt.err (!%p3936_p11)
}
  0x57   :  { %134 = dma.hbm_to_vmem [thread:$0]  %s5950_s9, 1024, %s129_s13, [#allocation19], %s4110_s29, %s4110_s29, %s4111_s30  }
  0x58   :  { %s3940_s24 = scalar_lea.hbm %s5941_s0, 1024 }
  0x59   :  { %p3941_p12 = scmp.ne.s32.totalorder %s5941_s0, %s3940_s24  ;;  %p3944_p13 = scmp.lt.u32.totalorder %s3940_s24, %s5941_s0 }
  0x5b   :  { %p3946_p0 = pnand %p3944_p13, %p3941_p12 }
  0x5d   :  { %3949 = shalt.err (!%p3946_p0)
}
  0x5e   :  { %s3950_s12 = scalar_lea.vmem %s4260_s15, 1024  ;;  %p3955_p2 = scmp.lt.s32.totalorder %s4260_s15, %s4260_s15 }
  0x5f   :  { %p3951_p1 = scmp.ne.s32.totalorder %s4260_s15, %s3950_s12  ;;  %p3956_p3 = scmp.lt.s32.totalorder %s3950_s12, %s3950_s12 }
  0x61   :  { %p3957_p4 = por %p3956_p3, %p3955_p2 }
  0x63   :  { %p3958_p5 = pnand %p3957_p4, %p3951_p1 }
  0x65   :  { %3961 = shalt.err (!%p3958_p5)
}
  0x66   :  { %34 = dma.hbm_to_vmem [thread:$0]  %s5941_s0, 1024, %s4260_s15, [#allocation4], %s4110_s29, %s4110_s29, %s4111_s30  }
  0x67   :  { %s4116_s14 = smov [#allocation8]   ;;  %s4117_s17 = smov [#allocation11]  }
  0x68   :  { %s53_s16 = sshll.u32 %s4116_s14, 4  ;;  %s75_s3 = sshll.u32 %s4117_s17, 4  ;;  %s54_s16 = int_to_ptr.vmem [resolvable:$true] %s53_s16  ;;  %s76_s3 = int_to_ptr.vmem [resolvable:$true] %s75_s3 }
  0x69   :  { %s3962_s21 = scalar_lea.hbm %s5943_s2, 16 }
  0x6a   :  { %p3963_p6 = scmp.ne.s32.totalorder %s5943_s2, %s3962_s21  ;;  %p3966_p7 = scmp.lt.u32.totalorder %s3962_s21, %s5943_s2 }
  0x6c   :  { %p3968_p8 = pnand %p3966_p7, %p3963_p6 }
  0x6e   :  { %3971 = shalt.err (!%p3968_p8)
}
  0x6f   :  { %s3972_s0 = scalar_lea.vmem %s54_s16, 16  ;;  %s3976_s15 = scalar_lea.vmem %s54_s16, 32 }
  0x70   :  { %p3973_p9 = scmp.ne.s32.totalorder %s54_s16, %s3972_s0  ;;  %p3977_p10 = scmp.lt.s32.totalorder %s54_s16, %s54_s16 }
  0x71   :  { %p3978_p11 = scmp.lt.s32.totalorder %s3976_s15, %s3972_s0 }
  0x73   :  { %p3979_p12 = por %p3978_p11, %p3977_p10 }
  0x75   :  { %p3980_p13 = pnand %p3979_p12, %p3973_p9 }
  0x77   :  { %3983 = shalt.err (!%p3980_p13)
}
  0x78   :  { %56 = dma.hbm_to_vmem [thread:$0]  %s5943_s2, 16, %s54_s16, [#allocation7]  }
  0x79   :  { %s3984_s28 = scalar_lea.hbm %s5945_s4, 16 }
  0x7a   :  { %p3985_p0 = scmp.ne.s32.totalorder %s5945_s4, %s3984_s28  ;;  %p3988_p1 = scmp.lt.u32.totalorder %s3984_s28, %s5945_s4 }
  0x7c   :  { %p3990_p2 = pnand %p3988_p1, %p3985_p0 }
  0x7e   :  { %3993 = shalt.err (!%p3990_p2)
}
  0x7f   :  { %s3994_s13 = scalar_lea.vmem %s76_s3, 16  ;;  %s3998_s14 = scalar_lea.vmem %s76_s3, 32 }
  0x80   :  { %p3995_p3 = scmp.ne.s32.totalorder %s76_s3, %s3994_s13  ;;  %p3999_p4 = scmp.lt.s32.totalorder %s76_s3, %s76_s3 }
  0x81   :  { %p4000_p5 = scmp.lt.s32.totalorder %s3998_s14, %s3994_s13 }
  0x83   :  { %p4001_p6 = por %p4000_p5, %p3999_p4 }
  0x85   :  { %p4002_p7 = pnand %p4001_p6, %p3995_p3 }
  0x87   :  { %4005 = shalt.err (!%p4002_p7)
}
  0x88   :  { %78 = dma.hbm_to_vmem [thread:$0]  %s5945_s4, 16, %s76_s3, [#allocation10]  }
  0x89   :  { %s4118_s17 = smov [#allocation14]   ;;  %s4119_s19 = smov [#allocation17]  }
  0x8a   :  { %s97_s20 = sshll.u32 %s4118_s17, 4  ;;  %s119_s21 = sshll.u32 %s4119_s19, 4  ;;  %s98_s20 = int_to_ptr.vmem [resolvable:$true] %s97_s20  ;;  %s120_s21 = int_to_ptr.vmem [resolvable:$true] %s119_s21 }
  0x8b   :  { %s4006_s27 = scalar_lea.hbm %s5947_s6, 16 }
  0x8c   :  { %p4007_p8 = scmp.ne.s32.totalorder %s5947_s6, %s4006_s27  ;;  %p4010_p9 = scmp.lt.u32.totalorder %s4006_s27, %s5947_s6 }
  0x8e   :  { %p4012_p10 = pnand %p4010_p9, %p4007_p8 }
  0x90   :  { %4015 = shalt.err (!%p4012_p10)
}
  0x91   :  { %s4016_s4 = scalar_lea.vmem %s98_s20, 16  ;;  %s4020_s3 = scalar_lea.vmem %s98_s20, 32 }
  0x92   :  { %p4017_p11 = scmp.ne.s32.totalorder %s98_s20, %s4016_s4  ;;  %p4021_p12 = scmp.lt.s32.totalorder %s98_s20, %s98_s20 }
  0x93   :  { %p4022_p13 = scmp.lt.s32.totalorder %s4020_s3, %s4016_s4 }
  0x95   :  { %p4023_p0 = por %p4022_p13, %p4021_p12 }
  0x97   :  { %p4024_p1 = pnand %p4023_p0, %p4017_p11 }
  0x99   :  { %4027 = shalt.err (!%p4024_p1)
}
  0x9a   :  { %100 = dma.hbm_to_vmem [thread:$0]  %s5947_s6, 16, %s98_s20, [#allocation13]  }
  0x9b   :  { %s4028_s5 = scalar_lea.hbm %s5949_s8, 16 }
  0x9c   :  { %p4029_p2 = scmp.ne.s32.totalorder %s5949_s8, %s4028_s5  ;;  %p4032_p3 = scmp.lt.u32.totalorder %s4028_s5, %s5949_s8 }
  0x9e   :  { %p4034_p4 = pnand %p4032_p3, %p4029_p2 }
  0xa0   :  { %4037 = shalt.err (!%p4034_p4)
}
  0xa1   :  { %s4038_s14 = scalar_lea.vmem %s120_s21, 16  ;;  %s4042_s2 = scalar_lea.vmem %s120_s21, 32 }
  0xa2   :  { %p4039_p5 = scmp.ne.s32.totalorder %s120_s21, %s4038_s14  ;;  %p4043_p6 = scmp.lt.s32.totalorder %s120_s21, %s120_s21 }
  0xa3   :  { %p4044_p7 = scmp.lt.s32.totalorder %s4042_s2, %s4038_s14 }
  0xa5   :  { %p4045_p8 = por %p4044_p7, %p4043_p6 }
  0xa7   :  { %p4046_p9 = pnand %p4045_p8, %p4039_p5 }
  0xa9   :  { %4049 = shalt.err (!%p4046_p9)
}
  0xaa   :  { %122 = dma.hbm_to_vmem [thread:$0]  %s5949_s8, 16, %s120_s21, [#allocation16]  }
  0xab   :  { %s4120_s17 = smov [#allocation20]   ;;  %s4050_s7 = scalar_lea.hbm %s5951_s10, 16 }
  0xac   :  { %s141_s20 = sshll.u32 %s4120_s17, 4  ;;  %p4051_p10 = scmp.ne.s32.totalorder %s5951_s10, %s4050_s7  ;;  %s142_s20 = int_to_ptr.vmem [resolvable:$true] %s141_s20 }
  0xad   :  { %p4054_p11 = scmp.lt.u32.totalorder %s4050_s7, %s5951_s10 }
  0xaf   :  { %p4056_p12 = pnand %p4054_p11, %p4051_p10 }
  0xb1   :  { %4059 = shalt.err (!%p4056_p12)
}
  0xb2   :  { %s4060_s1 = scalar_lea.vmem %s142_s20, 16  ;;  %s4064_s8 = scalar_lea.vmem %s142_s20, 32 }
  0xb3   :  { %p4061_p13 = scmp.ne.s32.totalorder %s142_s20, %s4060_s1  ;;  %p4065_p0 = scmp.lt.s32.totalorder %s142_s20, %s142_s20 }
  0xb4   :  { %p4066_p1 = scmp.lt.s32.totalorder %s4064_s8, %s4060_s1 }
  0xb6   :  { %p4067_p2 = por %p4066_p1, %p4065_p0 }
  0xb8   :  { %p4068_p3 = pnand %p4067_p2, %p4061_p13 }
  0xba   :  { %4071 = shalt.err (!%p4068_p3)
}
  0xbb   :  { %144 = dma.hbm_to_vmem [thread:$0]  %s5951_s10, 16, %s142_s20, [#allocation19]  }
  0xbc   :  { %4094 = dma.done.wait [#allocation4], 1024  }
  0xbd   :  { %4095 = vsyncadd [#allocation4], 4294966272 }
  0xbe   :  { %4096 = dma.done.wait [#allocation7], 1040  }
  0xbf   :  { %4097 = vsyncadd [#allocation7], 4294966256 }
  0xc0   :  { %4098 = dma.done.wait [#allocation10], 144  }
  0xc1   :  { %4099 = vsyncadd [#allocation10], 4294967152 }
  0xc2   :  { %4100 = dma.done.wait [#allocation13], 1040  }
  0xc3   :  { %4101 = vsyncadd [#allocation13], 4294966256 }
  0xc4   :  { %4102 = dma.done.wait [#allocation16], 1040  }
  0xc5   :  { %4103 = vsyncadd [#allocation16], 4294966256 }
  0xc6   :  { %4104 = dma.done.wait [#allocation19], 1040  }
  0xc7   :  { %4105 = vsyncadd [#allocation19], 4294966256  ;;  %v4121_v0 = vmov 0   ;;  %v3636_v1 = vld [vmem:[#allocation6] sm:$0xff]   ;;  %v3637_v2 = vld [vmem:[#allocation6 + $0x8] sm:$0xff]   ;;  %v746_v17 = vlaneseq  ;;  %v5953_v22 = vmov 0.0  }
  0xc8   :  { %189 = vst [vmem:[#allocation2 + $0x18] sm:$0xf] %v4121_v0  ;;  %190 = vst [vmem:[#allocation2 + $0x1c] sm:$0x1] %v4121_v0  ;;  %3514 = vmatprep.subr.bf16.mxu0 %v3636_v1  ;;  %v3638_v3 = vld [vmem:[#allocation6 + $0x10] sm:$0xff]   ;;  %v3639_v4 = vld [vmem:[#allocation6 + $0x18] sm:$0xff]   ;;  %3546 = vmatprep.subr.bf16.mxu1 %v5953_v22 }
  0xc9   :  { %183 = vst [vmem:[#allocation2] sm:$0xf] %v4121_v0  ;;  %184 = vst [vmem:[#allocation2 + $0x4] sm:$0x1] %v4121_v0  ;;  %3515 = vmatpush3.bf16.msra.mxu0 %v3636_v1  ;;  %v203_v5 = vld [vmem:[#allocation3] sm:$0xff]   ;;  %v3641_v7 = vld [vmem:[#allocation6 + $0x28] sm:$0xff]  }
  0xca   :  { %185 = vst [vmem:[#allocation2 + $0x8] sm:$0xf] %v4121_v0  ;;  %186 = vst [vmem:[#allocation2 + $0xc] sm:$0x1] %v4121_v0  ;;  %3516 = vmatprep.subr.bf16.mxu0 %v3637_v2  ;;  %v3640_v6 = vld [vmem:[#allocation6 + $0x20] sm:$0xff]   ;;  %3530 = vmatprep.mubr.bf16.mxu0 %v203_v5  ;;  %v3642_v8 = vld [vmem:[#allocation6 + $0x30] sm:$0xff]  }
  0xcb   :  { %187 = vst [vmem:[#allocation2 + $0x10] sm:$0xf] %v4121_v0  ;;  %188 = vst [vmem:[#allocation2 + $0x14] sm:$0x1] %v4121_v0  ;;  %v3643_v9 = vld [vmem:[#allocation6 + $0x38] sm:$0xff]   ;;  %v205_v10 = vld [vmem:[#allocation3 + $0x8] sm:$0xff]  }
  0xcc   :  { %191 = vst [vmem:[#allocation2 + $0x20] sm:$0xf] %v4121_v0  ;;  %192 = vst [vmem:[#allocation2 + $0x24] sm:$0x1] %v4121_v0  ;;  %v207_v11 = vld [vmem:[#allocation3 + $0x10] sm:$0xff]   ;;  %v209_v12 = vld [vmem:[#allocation3 + $0x18] sm:$0xff]  }
  0xcd   :  { %193 = vst [vmem:[#allocation2 + $0x28] sm:$0xf] %v4121_v0  ;;  %194 = vst [vmem:[#allocation2 + $0x2c] sm:$0x1] %v4121_v0  ;;  %3517 = vmatpush3.bf16.msra.mxu0 %v3637_v2  ;;  %v211_v13 = vld [vmem:[#allocation3 + $0x20] sm:$0xff]   ;;  %v213_v14 = vld [vmem:[#allocation3 + $0x28] sm:$0xff]  }
  0xce   :  { %195 = vst [vmem:[#allocation2 + $0x30] sm:$0xf] %v4121_v0  ;;  %196 = vst [vmem:[#allocation2 + $0x34] sm:$0x1] %v4121_v0  ;;  %3518 = vmatprep.subr.bf16.mxu0 %v3638_v3  ;;  %v215_v15 = vld [vmem:[#allocation3 + $0x30] sm:$0xff]   ;;  %v217_v16 = vld [vmem:[#allocation3 + $0x38] sm:$0xff]  }
  0xcf   :  { %197 = vst [vmem:[#allocation2 + $0x38] sm:$0xf] %v4121_v0  ;;  %198 = vst [vmem:[#allocation2 + $0x3c] sm:$0x1] %v4121_v0  ;;  %v595_v18 = vld [vmem:[#allocation9] sm:$0xf] }
  0xd0   :  { %199 = vst [vmem:[#allocation2 + $0x40] sm:$0xf] %v4121_v0  ;;  %200 = vst [vmem:[#allocation2 + $0x44] sm:$0x1] %v4121_v0  ;;  %v3652_v19 = vld [vmem:[#allocation12] sm:$0xff]   ;;  %v4357_v20 = vshrl.u32 %v746_v17, 7  ;;  %v744_v45 = vpack.i.b16 %v595_v18, %v595_v18 }
  0xd1   :  { %201 = vst [vmem:[#allocation2 + $0x48] sm:$0xf] %v4121_v0  ;;  %202 = vst [vmem:[#allocation2 + $0x4c] sm:$0x1] %v4121_v0  ;;  %3519 = vmatpush3.bf16.msra.mxu0 %v3638_v3  ;;  %v766_v21 = vshrl.u32 %v595_v18, 16  ;;  %vm4123_vm0 = vmmov 0   ;;  %3547 = vmatpush3.bf16.msra.mxu1 %v3652_v19 }
  0xd2   :  { %3520 = vmatprep.subr.bf16.mxu0 %v3639_v4  ;;  %6018 = vst [vmem:[#allocation29_spill] sm:$0xff] %v4357_v20  ;;  %3562 = vmatprep.mubr.msk.bf16.mxu1 %vm4123_vm0, %v5953_v22  ;;  %v3653_v23 = vld [vmem:[#allocation12 + $0x8] sm:$0xff]   ;;  %v4365_v24 = vsub.s32 0, %v4357_v20  ;;  %v3654_v26 = vld [vmem:[#allocation12 + $0x10] sm:$0xff]   ;;  %v3655_v28 = vld [vmem:[#allocation12 + $0x18] sm:$0xff]   ;;  %v976_v46 = vsub.s32 2, %v4357_v20 }
  0xd3   :  { %3548 = vmatprep.subr.bf16.mxu1 %v5953_v22  ;;  %v4367_v25 = vpack.i.b16 %v766_v21, %v766_v21  ;;  %v4375_v30 = vld [vmem:[#allocation8] ss:$0 sm:$0xff]  ;;  %v4377_v31 = vld [vmem:[#allocation2] sm:$0xf]  ;;  %v3657_v39 = vld [vmem:[#allocation12 + $0x28] sm:$0xff]   ;;  %v791_v51 = vsub.s32 3, %v4357_v20 }
  0xd4   :  { %6019 = vst [vmem:[#allocation30_spill] sm:$0xff] %v4365_v24  ;;  %v3656_v32 = vld [vmem:[#allocation12 + $0x20] sm:$0xff]   ;;  %v3658_v52 = vld [vmem:[#allocation12 + $0x30] sm:$0xff]   ;;  %v4401_v53 = vld [vmem:[#allocation2 + $0x4] sm:$0x1]  ;;  %v771_v56 = vsub.s32 1, %v4357_v20  ;;  %v977_v57 = vrot.slane %v744_v45, %v976_v46 }
  0xd5   :  { %3521 = vmatpush3.bf16.msra.mxu0 %v3639_v4  ;;  %3549 = vmatpush3.bf16.msra.mxu1 %v3653_v23  ;;  %v822_v27 = vrot.slane %v4367_v25, %v4365_v24  ;;  %6021 = vst [vmem:[#allocation32_spill] sm:$0xff] %v4401_v53  ;;  %v596_v54 = vld [vmem:[#allocation9 + $0x4] sm:$0x1]  ;;  %v1129_v1 = vrot.slane %v4367_v25, %v791_v51  ;;  %vm843_vm1 = vsmask.f32 3328  ;;  %vm679_vm4 = vcmask 1043456  }
  0xd6   :  { %3522 = vmatprep.subr.bf16.mxu0 %v3640_v6  ;;  %3550 = vmatprep.subr.bf16.mxu1 %v5953_v22  ;;  %v1468_v2 = vpack.i.b16 %v596_v54, %v596_v54  ;;  %v3659_v3 = vld [vmem:[#allocation12 + $0x38] sm:$0xff]   ;;  %v1291_v18 = vrot.slane %v744_v45, %v771_v56  ;;  %v1382_v21 = vrot.slane %v4367_v25, %v976_v46  ;;  %vm844_vm2 = vsmask.f32 7440  ;;  %s4125_s10 = smov [#allocation21]  }
  0xd7   :  { %v4373_v29 = vcombine.low %v822_v27, %v822_v27  ;;  %v4435_v17 = vcombine.low %v1129_v1, %v1129_v1  ;;  %vm4460_vm3 = vmor %vm843_vm1, %vm844_vm2  ;;  %vm680_vm5 = vsmask.f32 7938  ;;  %vm685_vm6 = vcmask 1040384   ;;  %s3203_s3 = sshll.u32 %s4125_s10, 4  ;;  %s3204_s3 = int_to_ptr.vmem [resolvable:$true] %s3203_s3 }
  0xd8   :  { %v1473_v23 = vrot.slane %v1468_v2, %v4365_v24  ;;  %v4441_v27 = vld [vmem:[#allocation2 + $0x48] sm:$0xf]  ;;  %vm686_vm7 = vsmask.f32 256  ;;  %vm4521_vm8 = vmand %vm679_vm4, %vm680_vm5  ;;  %vm1328_vm10 = vcmask 1042432   ;;  %vm1329_vm11 = vcmask 1046532   ;;  %p4077_p5 = scmp.lt.s32.totalorder %s3204_s3, %s3204_s3 }
  0xd9   :  { %3523 = vmatpush3.bf16.msra.mxu0 %v3640_v6  ;;  %3551 = vmatpush3.bf16.msra.mxu1 %v3654_v26  ;;  %6020 = vst [vmem:[#allocation31_spill] sm:$0xff] %v4373_v29  ;;  %v827_v36 = vmul.bf16 %v4373_v29, %v4377_v31  ;;  %v828_v62 = vmul.bf16 %v4373_v29, %v4401_v53  ;;  %6025 = vst [vmem:[#allocation36_spill] sm:$0xff] %v4435_v17  ;;  %vm2644_vm13 = vcmask 1041409   ;;  %s4072_s18 = scalar_lea.vmem %s3204_s3, 1024 }
  0xda   :  { %3524 = vmatprep.subr.bf16.mxu0 %v3641_v7  ;;  %3552 = vmatprep.subr.bf16.mxu1 %v5953_v22  ;;  %v1148_v46 = vmul.bf16 %v4435_v17, %v4441_v27  ;;  %vm4527_vm9 = vmand %vm685_vm6, %vm686_vm7  ;;  %p4073_p4 = scmp.ne.s32.totalorder %s3204_s3, %s4072_s18  ;;  %p4078_p6 = scmp.lt.s32.totalorder %s4072_s18, %s4072_s18 }
  0xdb   :  { %v847_v48 = vshrl.u32 %v827_v36, 16  ;;  %v850_v49 = vshll.u32 %v827_v36, 16  ;;  %vm5088_vm12 = vmor %vm1328_vm10, %vm1329_vm11 }
  0xdc   :  { %p4079_p7 = por %p4078_p6, %p4077_p5 }
  0xdd   :  { %3525 = vmatpush3.bf16.msra.mxu0 %v3641_v7  ;;  %3553 = vmatpush3.bf16.msra.mxu1 %v3655_v28  ;;  %v849_v60 = vrot.slane %v847_v48, 4  ;;  %v852_v61 = vrot.slane %v850_v49, 5  ;;  %v4419_v7 = vrot.slane %v4367_v25, %v771_v56  ;;  %v4467_v56 = vcombine.low %v1382_v21, %v1382_v21 }
  0xde   :  { %3526 = vmatprep.subr.bf16.mxu0 %v3642_v8  ;;  %3554 = vmatprep.subr.bf16.mxu1 %v5953_v22  ;;  %p4080_p8 = pnand %p4079_p7, %p4073_p4 }
  0xdf   :  { %6022 = vst [vmem:[#allocation33_spill] sm:$0xff] %v4419_v7  ;;  %6029 = vst [vmem:[#allocation38_spill] sm:$0xff] %v4467_v56 }
  0xe1   :  { %3527 = vmatpush3.bf16.msra.mxu0 %v3642_v8  ;;  %3555 = vmatpush3.bf16.msra.mxu1 %v3656_v32  ;;  %v4422_v8 = vrot.slane %v744_v45, %v4365_v24  ;;  %v694_v24 = vld [vmem:[#allocation2 + $0x14] sm:$0x1] }
  0xe2   :  { %3528 = vmatprep.subr.bf16.mxu0 %v3643_v9  ;;  %3556 = vmatprep.subr.bf16.mxu1 %v5953_v22 }
  0xe3   :  { %6023 = vst [vmem:[#allocation34_spill] sm:$0xff] %v4422_v8  ;;  %v750_v26 = vmul.bf16 %v4422_v8, %v4377_v31 }
  0xe5   :  { %3529 = vmatpush3.bf16.msra.mxu0 %v3643_v9  ;;  %3557 = vmatpush3.bf16.msra.mxu1 %v3657_v39  ;;  %v4473_v2 = vadd.bf16 0, %v750_v26  ;;  %v4485_v26 = vld [vmem:[#allocation2] sm:$0xe] }
  0xe6   :  { %3566 = vmatprep.subr.bf16.mxu0 %v5953_v22  ;;  %3558 = vmatprep.subr.bf16.mxu1 %v5953_v22  ;;  %6031 = vst [vmem:[#allocation40_spill] sm:$0xff] %v4485_v26 }
  0xe8   :  { %3531 = vmatmul.mubr.bf16.vlgmr.msra.gmra.mrb[0].mxu0 %v205_v10 }
  0xe9   :  { %3534 = vmatprep.mubr.bf16.mxu0 %v207_v11  ;;  %3559 = vmatpush3.bf16.msra.mxu1 %v3658_v52  ;;  %v4429_v11 = vrot.slane %v744_v45, %v791_v51  ;;  %v4455_v51 = vcombine.low %v1291_v18, %v1291_v18 }
  0xea   :  { %3560 = vmatprep.subr.bf16.mxu1 %v5953_v22 }
  0xeb   :  { %6024 = vst [vmem:[#allocation35_spill] sm:$0xff] %v4429_v11  ;;  %6026 = vst [vmem:[#allocation37_spill] sm:$0xff] %v4455_v51 }
  0xed   :  { %3561 = vmatpush3.bf16.msra.mxu1 %v3659_v3 }
  0xf0   :  { %3535 = vmatmul.mubr.bf16.gmra.mrb[4].mxu0 %v209_v12  ;;  %v4431_v12 = vcombine.low %v977_v57, %v977_v57  ;;  %v4469_v57 = vcombine.low %v1473_v23, %v1473_v23 }
  0xf1   :  { %3538 = vmatprep.mubr.bf16.mxu0 %v211_v13 }
  0xf2   :  { %6030 = vst [vmem:[#allocation39_spill] sm:$0xff] %v4469_v57 }
  0xf8   :  { %3539 = vmatmul.mubr.bf16.gmra.mrb[8].mxu0 %v213_v14  ;;  %v853_v14 = vor.u32 %v852_v61, %v849_v60  ;;  %v818_v61 = vld [vmem:[#allocation2 + $0x4c] sm:$0x1] }
  0xf9   :  { %3542 = vmatprep.mubr.bf16.mxu0 %v215_v15  ;;  %v856_v15 = vshll.u32 %v828_v62, 16  ;;  %v1249_v62 = vshrl.u32 %v1148_v46, 16  ;;  %v1149_v23 = vmul.bf16 %v4435_v17, %v818_v61 }
  0xfa   :  { %v854_v25 = vrot.slane %v853_v14, 4 }
  0xfb   :  { %v1251_v14 = vrot.slane %v1249_v62, 4 }
 0x100   :  { %3543 = vmatmul.mubr.bf16.gmra.mrb[12].mxu0 %v217_v16 }
 0x101   :  { %3582 = vmatprep.mubr.msk.bf16.mxu0 %vm4123_vm0, %v5953_v22 }
 0x1bb   :  { %v3532_v33 = vpop.f32.mrb[0].mxu0 }
 0x1bc   :  { %v4381_v34 = vadd.f32 %v3532_v33, %v4375_v30  ;;  %v372_v35 = vpop.f32.mrb[1].mxu0 }
 0x1bd   :  { %v4386_v37 = vadd.f32 %v4375_v30, %v372_v35  ;;  %v3533_v38 = vpop.f32.mrb[2].mxu0 }
 0x1be   :  { %v3239_v40 = vmul.f32 -1.442695, %v4381_v34  ;;  %v4390_v41 = vadd.f32 %v3533_v38, %v4375_v30  ;;  %v375_v42 = vpop.f32.mrb[3].mxu0 }
 0x1bf   :  { %v3237_v43 = vmul.f32 -1.442695, %v4386_v37  ;;  %v4395_v44 = vadd.f32 %v4375_v30, %v375_v42 }
 0x1c0   :  { %3684 = vpow2.f32 %v3239_v40  ;;  %v3240_v47 = vmul.f32 -1.442695, %v4390_v41  ;;  %v858_v40 = vrot.slane %v856_v15, 5 }
 0x1c1   :  { %3686 = vpow2.f32 %v3237_v43  ;;  %v3238_v50 = vmul.f32 -1.442695, %v4395_v44 }
 0x1c2   :  { %3688 = vpow2.f32 %v3240_v47 }
 0x1c3   :  { %3690 = vpow2.f32 %v3238_v50  ;;  %v3536_v55 = vpop.f32.mrb[4].mxu0 }
 0x1c4   :  { %v4406_v58 = vadd.f32 %v3536_v55, %v4375_v30  ;;  %v388_v59 = vpop.f32.mrb[5].mxu0 }
 0x1c5   :  { %v4411_v63 = vadd.f32 %v4375_v30, %v388_v59  ;;  %v3537_v0 = vpop.f32.mrb[6].mxu0 }
 0x1c6   :  { %v3243_v4 = vmul.f32 -1.442695, %v4406_v58  ;;  %v4416_v5 = vadd.f32 %v3537_v0, %v4375_v30  ;;  %v391_v6 = vpop.f32.mrb[7].mxu0  ;;  %v1252_v0 = vshll.u32 %v1148_v46, 16 }
 0x1c7   :  { %v3241_v9 = vmul.f32 -1.442695, %v4411_v63  ;;  %v4427_v10 = vadd.f32 %v4375_v30, %v391_v6 }
 0x1c8   :  { %3692 = vpow2.f32 %v3243_v4  ;;  %v3244_v13 = vmul.f32 -1.442695, %v4416_v5  ;;  %v4479_v4 = vsel %vm4460_vm3, %v854_v25, %v858_v40  ;;  %v1254_v15 = vrot.slane %v1252_v0, 5 }
 0x1c9   :  { %3694 = vpow2.f32 %v3241_v9  ;;  %v3242_v16 = vmul.f32 -1.442695, %v4427_v10 }
 0x1ca   :  { %v3685_v19 = vpop.eup %3684  ;;  %3696 = vpow2.f32 %v3244_v13 }
 0x1cb   :  { %v3687_v28 = vpop.eup %3686  ;;  %v485_v32 = vadd.f32 1.0, %v3685_v19  ;;  %3698 = vpow2.f32 %v3242_v16  ;;  %v3540_v33 = vpop.f32.mrb[8].mxu0 }
 0x1cc   :  { %v3689_v35 = vpop.eup %3688  ;;  %v483_v36 = vadd.f32 1.0, %v3687_v28  ;;  %v4444_v38 = vadd.f32 %v3540_v33, %v4375_v30  ;;  %v404_v39 = vpop.f32.mrb[9].mxu0 }
 0x1cd   :  { %v3691_v42 = vpop.eup %3690  ;;  %3700 = vrcp.f32 %v485_v32  ;;  %v486_v43 = vadd.f32 1.0, %v3689_v35  ;;  %v4447_v31 = vadd.f32 %v4375_v30, %v404_v39  ;;  %v3541_v45 = vpop.f32.mrb[10].mxu0 }
 0x1ce   :  { %3702 = vrcp.f32 %v483_v36  ;;  %v484_v47 = vadd.f32 1.0, %v3691_v42  ;;  %v3247_v48 = vmul.f32 -1.442695, %v4444_v38  ;;  %v4453_v49 = vadd.f32 %v3541_v45, %v4375_v30  ;;  %v407_v50 = vpop.f32.mrb[11].mxu0 }
 0x1cf   :  { %3704 = vrcp.f32 %v486_v43  ;;  %v3245_v52 = vmul.f32 -1.442695, %v4447_v31  ;;  %v4465_v55 = vadd.f32 %v4375_v30, %v407_v50  ;;  %v1255_v36 = vor.u32 %v1254_v15, %v1251_v14 }
 0x1d0   :  { %3706 = vrcp.f32 %v484_v47  ;;  %v3248_v59 = vmul.f32 -1.442695, %v4453_v49  ;;  %v706_v47 = vld [vmem:[#allocation2 + $0x24] sm:$0x1] }
 0x1d1   :  { %3708 = vpow2.f32 %v3247_v48  ;;  %v3246_v60 = vmul.f32 -1.442695, %v4465_v55  ;;  %v4505_v62 = vrot.slane %v1255_v36, 4 }
 0x1d2   :  { %v3693_v1 = vpop.eup %3692  ;;  %3710 = vpow2.f32 %v3245_v52 }
 0x1d3   :  { %v3695_v6 = vpop.eup %3694  ;;  %v489_v9 = vadd.f32 1.0, %v3693_v1  ;;  %3712 = vpow2.f32 %v3248_v59  ;;  %v3544_v13 = vpop.f32.mrb[12].mxu0  ;;  %v4502_v59 = vshll.u32 %v1149_v23, 16  ;;  %6033 = vst [vmem:[#allocation42_spill] sm:$0xff] %v4505_v62 }
 0x1d4   :  { %v3697_v16 = vpop.eup %3696  ;;  %v487_v18 = vadd.f32 1.0, %v3695_v6  ;;  %3714 = vpow2.f32 %v3246_v60  ;;  %v4482_v19 = vadd.f32 %v3544_v13, %v4375_v30  ;;  %v420_v21 = vpop.f32.mrb[13].mxu0 }
 0x1d5   :  { %v3699_v28 = vpop.eup %3698  ;;  %3716 = vrcp.f32 %v489_v9  ;;  %v490_v32 = vadd.f32 1.0, %v3697_v16  ;;  %v4488_v33 = vadd.f32 %v4375_v30, %v420_v21  ;;  %v3545_v35 = vpop.f32.mrb[14].mxu0  ;;  %6032 = vst [vmem:[#allocation41_spill] sm:$0xff] %v4502_v59 }
 0x1d6   :  { %3718 = vrcp.f32 %v487_v18  ;;  %v488_v39 = vadd.f32 1.0, %v3699_v28  ;;  %v3251_v25 = vmul.f32 -1.442695, %v4482_v19  ;;  %v4492_v40 = vadd.f32 %v3545_v35, %v4375_v30  ;;  %v423_v42 = vpop.f32.mrb[15].mxu0 }
 0x1d7   :  { %v3701_v43 = vpop.eup %3700  ;;  %3720 = vrcp.f32 %v490_v32  ;;  %v3249_v45 = vmul.f32 -1.442695, %v4488_v33  ;;  %v4496_v46 = vadd.f32 %v4375_v30, %v423_v42  ;;  %v697_v42 = vld [vmem:[#allocation2 + $0x18] sm:$0xf]  ;;  %v703_v30 = vld [vmem:[#allocation2 + $0x20] sm:$0xf] }
 0x1d8   :  { %v3703_v48 = vpop.eup %3702  ;;  %v533_v50 = vmul.f32 %v3701_v43, %v4381_v34  ;;  %3722 = vrcp.f32 %v488_v39  ;;  %v3252_v52 = vmul.f32 -1.442695, %v4492_v40 }
 0x1d9   :  { %v3705_v60 = vpop.eup %3704  ;;  %v531_v61 = vmul.f32 %v3703_v48, %v4386_v37  ;;  %3724 = vpow2.f32 %v3251_v25  ;;  %v4511_v34 = vmul.f32 -1.442695, %v4496_v46 }
 0x1da   :  { %v3707_v0 = vpop.eup %3706  ;;  %v3387_v1 = vpack.c.bf16 %v533_v50, %v533_v50  ;;  %v534_v6 = vmul.f32 %v3705_v60, %v4390_v41  ;;  %3726 = vpow2.f32 %v3249_v45 }
 0x1db   :  { %v3709_v9 = vpop.eup %3708  ;;  %v3385_v13 = vpack.c.bf16 %v531_v61, %v531_v61  ;;  %v532_v14 = vmul.f32 %v3707_v0, %v4395_v44  ;;  %3728 = vpow2.f32 %v3252_v52  ;;  %v700_v52 = vld [vmem:[#allocation2 + $0x1c] sm:$0x1] }
 0x1dc   :  { %v3711_v15 = vpop.eup %3710  ;;  %v615_v16 = vshrl.u32 %v3387_v1, 16  ;;  %v618_v18 = vshll.u32 %v3387_v1, 16  ;;  %v3388_v21 = vpack.c.bf16 %v534_v6, %v534_v6  ;;  %v493_v23 = vadd.f32 1.0, %v3709_v9 }
 0x1dd   :  { %v4515_v28 = vpop.eup %3712  ;;  %v599_v32 = vshrl.u32 %v3385_v13, 16  ;;  %v602_v41 = vshll.u32 %v3385_v13, 16  ;;  %v3386_v35 = vpack.c.bf16 %v532_v14, %v532_v14  ;;  %v491_v36 = vadd.f32 1.0, %v3711_v15  ;;  %v682_v13 = vld [vmem:[#allocation2 + $0x8] sm:$0xf] }
 0x1de   :  { %v4517_v39 = vpop.eup %3714  ;;  %v617_v25 = vrot.slane %v615_v16, 7  ;;  %v623_v43 = vshrl.u32 %v3388_v21, 16  ;;  %v626_v45 = vshll.u32 %v3388_v21, 16  ;;  %3730 = vrcp.f32 %v493_v23  ;;  %v688_v14 = vld [vmem:[#allocation2 + $0xc] sm:$0x1] }
 0x1df   :  { %v3717_v48 = vpop.eup %3716  ;;  %v601_v60 = vrot.slane %v599_v32, 7  ;;  %v607_v61 = vshrl.u32 %v3386_v35, 16  ;;  %v610_v0 = vshll.u32 %v3386_v35, 16  ;;  %3732 = vrcp.f32 %v491_v36 }
 0x1e0   :  { %v3719_v1 = vpop.eup %3718  ;;  %v620_v6 = vor.u32 %v618_v18, %v617_v25  ;;  %v621_v9 = vrot.slane %v617_v25, 4  ;;  %v625_v15 = vrot.slane %v623_v43, 7  ;;  %v537_v16 = vmul.f32 %v3717_v48, %v4406_v58  ;;  %v691_v43 = vld [vmem:[#allocation2 + $0x10] sm:$0xf] }
 0x1e1   :  { %v3721_v21 = vpop.eup %3720  ;;  %v604_v23 = vor.u32 %v602_v41, %v601_v60  ;;  %v605_v22 = vrot.slane %v601_v60, 4  ;;  %v609_v37 = vrot.slane %v607_v61, 7  ;;  %v535_v3 = vmul.f32 %v3719_v1, %v4411_v63 }
 0x1e2   :  { %v3723_v32 = vpop.eup %3722  ;;  %v698_v35 = vsel %vm4521_vm8, %v620_v6, %v697_v42  ;;  %v701_v18 = vsel %vm4527_vm9, %v621_v9, %v700_v52  ;;  %v628_v36 = vor.u32 %v626_v45, %v625_v15  ;;  %v629_v25 = vrot.slane %v625_v15, 4  ;;  %v724_v15 = vld [vmem:[#allocation2 + $0x3c] sm:$0x1] }
 0x1e3   :  { %v3725_v58 = vpop.eup %3724  ;;  %699 = vst [vmem:[#allocation2 + $0x18] sm:$0xf] %v698_v35  ;;  %702 = vst [vmem:[#allocation2 + $0x1c] sm:$0x1] %v701_v18  ;;  %v683_v41 = vsel %vm4521_vm8, %v604_v23, %v682_v13  ;;  %v689_v63 = vsel %vm4527_vm9, %v605_v22, %v688_v14  ;;  %v612_v48 = vor.u32 %v610_v0, %v609_v37  ;;  %v613_v60 = vrot.slane %v609_v37, 4 }
 0x1e4   :  { %v3727_v61 = vpop.eup %3726  ;;  %684 = vst [vmem:[#allocation2 + $0x8] sm:$0xf] %v683_v41  ;;  %690 = vst [vmem:[#allocation2 + $0xc] sm:$0x1] %v689_v63  ;;  %v704_v42 = vsel %vm4521_vm8, %v628_v36, %v703_v30  ;;  %v707_v45 = vsel %vm4527_vm9, %v629_v25, %v706_v47  ;;  %v3391_v52 = vpack.c.bf16 %v537_v16, %v537_v16  ;;  %v721_v14 = vld [vmem:[#allocation2 + $0x38] sm:$0xf] }
 0x1e5   :  { %v3389_v1 = vpack.c.bf16 %v535_v3, %v535_v3  ;;  %v4545_v6 = vpop.eup %3728  ;;  %705 = vst [vmem:[#allocation2 + $0x20] sm:$0xf] %v704_v42  ;;  %708 = vst [vmem:[#allocation2 + $0x24] sm:$0x1] %v707_v45  ;;  %v692_v22 = vsel %vm4521_vm8, %v612_v48, %v691_v43  ;;  %v695_v37 = vsel %vm4527_vm9, %v613_v60, %v694_v24  ;;  %v4554_v35 = vadd.f32 1.0, %v4515_v28 }
 0x1e6   :  { %v538_v0 = vmul.f32 %v3721_v21, %v4416_v5  ;;  %v536_v9 = vmul.f32 %v3723_v32, %v4427_v10  ;;  %693 = vst [vmem:[#allocation2 + $0x10] sm:$0xf] %v692_v22  ;;  %696 = vst [vmem:[#allocation2 + $0x14] sm:$0x1] %v695_v37  ;;  %v647_v30 = vshrl.u32 %v3391_v52, 16  ;;  %v650_v47 = vshll.u32 %v3391_v52, 16 }
 0x1e7   :  { %v631_v13 = vshrl.u32 %v3389_v1, 16  ;;  %v634_v3 = vshll.u32 %v3389_v1, 16  ;;  %v4557_v18 = vadd.f32 1.0, %v4517_v39  ;;  %v709_v10 = vld [vmem:[#allocation2 + $0x28] sm:$0xf]  ;;  %v4559_v32 = vadd.f32 1.0, %v3725_v58 }
 0x1e8   :  { %v3392_v16 = vpack.c.bf16 %v538_v0, %v538_v0  ;;  %v3390_v23 = vpack.c.bf16 %v536_v9, %v536_v9  ;;  %v3731_v24 = vpop.eup %3730  ;;  %v649_v5 = vrot.slane %v647_v30, 7  ;;  %v4561_v36 = vadd.f32 1.0, %v3727_v61  ;;  %v712_v43 = vld [vmem:[#allocation2 + $0x2c] sm:$0x1]  ;;  %v727_v22 = vld [vmem:[#allocation2 + $0x40] sm:$0xf] }
 0x1e9   :  { %v633_v21 = vrot.slane %v631_v13, 7  ;;  %v3733_v25 = vpop.eup %3732  ;;  %v541_v58 = vmul.f32 %v3731_v24, %v4444_v38  ;;  %v718_v38 = vld [vmem:[#allocation2 + $0x34] sm:$0x1]  ;;  %3734 = vrcp.f32 %v4554_v35 }
 0x1ea   :  { %v655_v41 = vshrl.u32 %v3392_v16, 16  ;;  %v658_v63 = vshll.u32 %v3392_v16, 16  ;;  %v639_v48 = vshrl.u32 %v3390_v23, 16  ;;  %v642_v60 = vshll.u32 %v3390_v23, 16  ;;  %v4563_v39 = vld [vmem:[#allocation2 + $0x18] sm:$0xf] }
 0x1eb   :  { %v652_v42 = vor.u32 %v650_v47, %v649_v5  ;;  %v653_v28 = vrot.slane %v649_v5, 4  ;;  %v636_v45 = vor.u32 %v634_v3, %v633_v21  ;;  %v637_v52 = vrot.slane %v633_v21, 4  ;;  %v4568_v0 = vld [vmem:[#allocation2 + $0x1c] sm:$0x1]  ;;  %v730_v3 = vld [vmem:[#allocation2 + $0x44] sm:$0x1] }
 0x1ec   :  { %v657_v1 = vrot.slane %v655_v41, 7  ;;  %v641_v37 = vrot.slane %v639_v48, 7  ;;  %6038 = vst [vmem:[#allocation43_spill] sm:$0xff] %v4568_v0  ;;  %v715_v16 = vld [vmem:[#allocation2 + $0x30] sm:$0xf]  ;;  %v3395_v21 = vpack.c.bf16 %v541_v58, %v541_v58  ;;  %3736 = vrcp.f32 %v4557_v18 }
 0x1ed   :  { %v722_v9 = vsel %vm4521_vm8, %v652_v42, %v721_v14  ;;  %v725_v30 = vsel %vm4527_vm9, %v653_v28, %v724_v15  ;;  %v710_v47 = vsel %vm4521_vm8, %v636_v45, %v709_v10  ;;  %v713_v13 = vsel %vm4527_vm9, %v637_v52, %v712_v43  ;;  %v4586_v41 = vld [vmem:[#allocation2 + $0x18] sm:$0xe]  ;;  %v1279_v15 = vld [vmem:[#allocation2 + $0x8] sm:$0xe] }
 0x1ee   :  { %723 = vst [vmem:[#allocation2 + $0x38] sm:$0xf] %v722_v9  ;;  %726 = vst [vmem:[#allocation2 + $0x3c] sm:$0x1] %v725_v30  ;;  %v660_v23 = vor.u32 %v658_v63, %v657_v1  ;;  %v661_v24 = vrot.slane %v657_v1, 4  ;;  %v644_v5 = vor.u32 %v642_v60, %v641_v37  ;;  %v645_v14 = vrot.slane %v641_v37, 4 }
 0x1ef   :  { %711 = vst [vmem:[#allocation2 + $0x28] sm:$0xf] %v710_v47  ;;  %714 = vst [vmem:[#allocation2 + $0x2c] sm:$0x1] %v713_v13  ;;  %v4582_v10 = vmul.bf16 %v4373_v29, %v4563_v39  ;;  %v834_v43 = vmul.bf16 %v4373_v29, %v4568_v0  ;;  %v4600_v45 = vmul.bf16 %v4431_v12, %v4563_v39  ;;  %v810_v47 = vld [vmem:[#allocation2 + $0xc] sm:$0x1]  ;;  %3738 = vrcp.f32 %v4559_v32 }
 0x1f0   :  { %6039 = vst [vmem:[#allocation44_spill] sm:$0xff] %v4586_v41  ;;  %v728_v48 = vsel %vm4521_vm8, %v660_v23, %v727_v22  ;;  %v731_v63 = vsel %vm4527_vm9, %v661_v24, %v730_v3  ;;  %v716_v60 = vsel %vm4521_vm8, %v644_v5, %v715_v16  ;;  %v719_v42 = vsel %vm4527_vm9, %v645_v14, %v718_v38  ;;  %v734_v22 = vld [vmem:[#allocation2 + $0x8] sm:$0xf]  ;;  %v1728_v30 = vld [vmem:[#allocation2 + $0x18] sm:$0xf] }
 0x1f1   :  { %729 = vst [vmem:[#allocation2 + $0x40] sm:$0xf] %v728_v48  ;;  %732 = vst [vmem:[#allocation2 + $0x44] sm:$0x1] %v731_v63  ;;  %v4596_v28 = vshll.u32 %v834_v43, 16  ;;  %v987_v52 = vmul.bf16 %v4431_v12, %v4568_v0  ;;  %v4606_v1 = vmul.bf16 %v4435_v17, %v4563_v39  ;;  %v1137_v37 = vmul.bf16 %v4435_v17, %v4568_v0 }
 0x1f2   :  { %717 = vst [vmem:[#allocation2 + $0x30] sm:$0xf] %v716_v60  ;;  %720 = vst [vmem:[#allocation2 + $0x34] sm:$0x1] %v719_v42  ;;  %v1653_v3 = vshrl.u32 %v3395_v21, 16  ;;  %v1656_v16 = vshll.u32 %v3395_v21, 16  ;;  %v539_v38 = vmul.f32 %v3733_v25, %v4447_v31  ;;  %v751_v24 = vmul.bf16 %v4422_v8, %v734_v22 }
 0x1f3   :  { %6040 = vst [vmem:[#allocation45_spill] sm:$0xff] %v4606_v1  ;;  %v4616_v13 = vshll.u32 %v987_v52, 16  ;;  %v4619_v23 = vshll.u32 %v1137_v37, 16  ;;  %v773_v5 = vmul.bf16 %v4419_v7, %v734_v22  ;;  %v829_v14 = vmul.bf16 %v4373_v29, %v734_v22 }
 0x1f4   :  { %v1655_v43 = vrot.slane %v1653_v3, 7  ;;  %v3393_v48 = vpack.c.bf16 %v539_v38, %v539_v38  ;;  %v830_v63 = vmul.bf16 %v4373_v29, %v810_v47  ;;  %v982_v60 = vmul.bf16 %v4431_v12, %v734_v22  ;;  %v1731_v3 = vld [vmem:[#allocation2 + $0x1c] sm:$0x1] }
 0x1f5   :  { %6041 = vst [vmem:[#allocation46_spill] sm:$0xff] %v4619_v23  ;;  %v4626_v42 = vadd.bf16 0, %v751_v24  ;;  %v4629_v21 = vadd.bf16 %v773_v5, %v4473_v2  ;;  %v861_v31 = vshrl.u32 %v829_v14, 16  ;;  %v864_v25 = vshll.u32 %v829_v14, 16 }
 0x1f6   :  { %v1658_v52 = vor.u32 %v1656_v16, %v1655_v43  ;;  %v1659_v37 = vrot.slane %v1655_v43, 4  ;;  %v870_v9 = vshll.u32 %v830_v63, 16  ;;  %v983_v58 = vmul.bf16 %v4431_v12, %v810_v47 }
 0x1f7   :  { %v863_v38 = vrot.slane %v861_v31, 4  ;;  %v866_v61 = vrot.slane %v864_v25, 5  ;;  %v999_v20 = vshrl.u32 %v982_v60, 16  ;;  %v1002_v41 = vshll.u32 %v982_v60, 16 }
 0x1f8   :  { %v1729_v22 = vsel %vm4521_vm8, %v1658_v52, %v1728_v30  ;;  %v1732_v2 = vsel %vm4527_vm9, %v1659_v37, %v1731_v3  ;;  %v872_v24 = vrot.slane %v870_v9, 5  ;;  %v1008_v5 = vshll.u32 %v983_v58, 16  ;;  %v4642_v58 = vld [vmem:[#allocation2 + $0x20] sm:$0xf]  ;;  %v4650_v3 = vld [vmem:[#allocation2 + $0x10] sm:$0xf] }
 0x1f9   :  { %1730 = vst [vmem:[#allocation2 + $0x18] sm:$0xf] %v1729_v22  ;;  %1733 = vst [vmem:[#allocation2 + $0x1c] sm:$0x1] %v1732_v2  ;;  %v867_v16 = vor.u32 %v866_v61, %v863_v38  ;;  %v1001_v14 = vrot.slane %v999_v20, 4  ;;  %v1004_v43 = vrot.slane %v1002_v41, 5  ;;  %v1298_v63 = vmul.bf16 %v4455_v51, %v1279_v15 }
 0x1fa   :  { %v1010_v53 = vrot.slane %v1008_v5, 5  ;;  %v1299_v31 = vmul.bf16 %v4455_v51, %v810_v47  ;;  %v1387_v60 = vmul.bf16 %v4467_v56, %v1279_v15  ;;  %v1388_v25 = vmul.bf16 %v4467_v56, %v810_v47  ;;  %v4657_v22 = vld [vmem:[#allocation2 + $0x14] sm:$0x1] }
 0x1fb   :  { %v868_v30 = vrot.slane %v867_v16, 4  ;;  %v1005_v52 = vor.u32 %v1004_v43, %v1001_v14  ;;  %v4640_v26 = vrot.slane %v1298_v63, 9  ;;  %v1637_v9 = vshrl.u32 %v3393_v48, 16  ;;  %6046 = vst [vmem:[#allocation51_spill] sm:$0xff] %v4657_v22  ;;  %v1716_v43 = vld [vmem:[#allocation2 + $0x8] sm:$0xf] }
 0x1fc   :  { %v4644_v37 = vrot.slane %v1299_v31, 5  ;;  %v4646_v20 = vrot.slane %v1387_v60, 9  ;;  %v4648_v61 = vrot.slane %v1388_v25, 5  ;;  %v1640_v41 = vshll.u32 %v3393_v48, 16  ;;  %v1719_v63 = vld [vmem:[#allocation2 + $0xc] sm:$0x1] }
 0x1fd   :  { %6042 = vst [vmem:[#allocation47_spill] sm:$0xff] %v4640_v26  ;;  %v4654_v15 = vsel %vm4460_vm3, %v868_v30, %v872_v24  ;;  %v1006_v47 = vrot.slane %v1005_v52, 4  ;;  %v1639_v38 = vrot.slane %v1637_v9, 7  ;;  %v4661_v2 = vmul.bf16 %v4373_v29, %v4642_v58  ;;  %v4723_v31 = vld [vmem:[#allocation2 + $0x28] sm:$0xf] }
 0x1fe   :  { %6043 = vst [vmem:[#allocation48_spill] sm:$0xff] %v4644_v37  ;;  %6044 = vst [vmem:[#allocation49_spill] sm:$0xff] %v4646_v20  ;;  %v4665_v5 = vmul.bf16 %v4431_v12, %v4642_v58  ;;  %v4669_v48 = vmul.bf16 %v4435_v17, %v4642_v58  ;;  %v752_v14 = vmul.bf16 %v4422_v8, %v4650_v3  ;;  %v498_v20 = vadd.f32 1.0, %v4545_v6 }
 0x1ff   :  { %6045 = vst [vmem:[#allocation50_spill] sm:$0xff] %v4648_v61  ;;  %v4674_v24 = vsel %vm4460_vm3, %v1006_v47, %v1010_v53  ;;  %v1642_v35 = vor.u32 %v1640_v41, %v1639_v38  ;;  %v1643_v16 = vrot.slane %v1639_v38, 4  ;;  %v4684_v18 = vmul.bf16 %v4373_v29, %v4650_v3  ;;  %v4698_v41 = vld [vmem:[#allocation2 + $0x10] sm:$0xe] }
 0x200   :  { %6047 = vst [vmem:[#allocation52_spill] sm:$0xff] %v4669_v48  ;;  %6048 = vst [vmem:[#allocation53_spill] sm:$0xff] %v4674_v24  ;;  %v832_v53 = vmul.bf16 %v4373_v29, %v4657_v22  ;;  %v4694_v52 = vmul.bf16 %v4431_v12, %v4650_v3  ;;  %v985_v9 = vmul.bf16 %v4431_v12, %v4657_v22  ;;  %v4730_v47 = vld [vmem:[#allocation2 + $0x30] sm:$0xf]  ;;  %3740 = vrcp.f32 %v4561_v36 }
 0x201   :  { %v1717_v25 = vsel %vm4521_vm8, %v1642_v35, %v1716_v43  ;;  %v1720_v30 = vsel %vm4527_vm9, %v1643_v16, %v1719_v63  ;;  %6049 = vst [vmem:[#allocation54_spill] sm:$0xff] %v4698_v41  ;;  %v4706_v35 = vmul.bf16 %v4435_v17, %v4650_v3  ;;  %v1389_v38 = vmul.bf16 %v4467_v56, %v4698_v41  ;;  %v4736_v56 = vld [vmem:[#allocation2 + $0x38] sm:$0xf] }
 0x202   :  { %1718 = vst [vmem:[#allocation2 + $0x8] sm:$0xf] %v1717_v25  ;;  %1721 = vst [vmem:[#allocation2 + $0xc] sm:$0x1] %v1720_v30  ;;  %v4702_v60 = vshll.u32 %v832_v53, 16  ;;  %v4710_v63 = vshll.u32 %v985_v9, 16  ;;  %v1135_v25 = vmul.bf16 %v4435_v17, %v4657_v22  ;;  %v1300_v53 = vmul.bf16 %v4455_v51, %v4698_v41  ;;  %v3735_v9 = vpop.eup %3734 }
 0x203   :  { %6050 = vst [vmem:[#allocation55_spill] sm:$0xff] %v4706_v35  ;;  %v4714_v30 = vld [vmem:[#allocation2 + $0x44] sm:$0x1]  ;;  %v4734_v26 = vrot.slane %v1389_v38, 9  ;;  %3742 = vrcp.f32 %v498_v20  ;;  %v753_v6 = vmul.bf16 %v4422_v8, %v4563_v39  ;;  %v3737_v38 = vpop.eup %3736  ;;  %v755_v36 = vmul.bf16 %v4422_v8, %v4723_v31 }
 0x204   :  { %v4726_v43 = vshll.u32 %v1135_v25, 16  ;;  %v4732_v61 = vrot.slane %v1300_v53, 9  ;;  %v754_v25 = vmul.bf16 %v4422_v8, %v4642_v58  ;;  %v542_v53 = vmul.f32 %v3735_v9, %v4453_v49  ;;  %v3739_v48 = vpop.eup %3738  ;;  %v4781_v17 = vld [vmem:[#allocation2 + $0x24] sm:$0x1] }
 0x205   :  { %6053 = vst [vmem:[#allocation58_spill] sm:$0xff] %v4734_v26  ;;  %3744 = vpow2.f32 %v4511_v34  ;;  %v756_v20 = vmul.bf16 %v4422_v8, %v4730_v47  ;;  %v540_v16 = vmul.f32 %v3737_v38, %v4465_v55  ;;  %v757_v32 = vmul.bf16 %v4422_v8, %v4736_v56 }
 0x206   :  { %6051 = vst [vmem:[#allocation56_spill] sm:$0xff] %v4726_v43  ;;  %6052 = vst [vmem:[#allocation57_spill] sm:$0xff] %v4732_v61  ;;  %v760_v41 = vadd.bf16 0, %v752_v14  ;;  %v761_v57 = vadd.bf16 0, %v753_v6  ;;  %v3396_v26 = vpack.c.bf16 %v542_v53, %v542_v53  ;;  %v4756_v61 = vld [vmem:[#allocation2 + $0x40] sm:$0xf]  ;;  %v776_v51 = vmul.bf16 %v4419_v7, %v4642_v58 }
 0x207   :  { %v762_v37 = vadd.bf16 0, %v754_v25  ;;  %v763_v49 = vadd.bf16 0, %v755_v36  ;;  %v764_v9 = vadd.bf16 0, %v756_v20  ;;  %v3394_v34 = vpack.c.bf16 %v540_v16, %v540_v16 }
 0x208   :  { %v765_v0 = vadd.bf16 0, %v757_v32  ;;  %v777_v22 = vmul.bf16 %v4419_v7, %v4723_v31  ;;  %v1661_v55 = vshrl.u32 %v3396_v26, 16  ;;  %v1664_v38 = vshll.u32 %v3396_v26, 16 }
 0x209   :  { %v778_v14 = vmul.bf16 %v4419_v7, %v4730_v47  ;;  %v779_v6 = vmul.bf16 %v4419_v7, %v4736_v56  ;;  %v1645_v53 = vshrl.u32 %v3394_v34, 16  ;;  %v1648_v25 = vshll.u32 %v3394_v34, 16 }
 0x20a   :  { %v780_v16 = vmul.bf16 %v4419_v7, %v4756_v61  ;;  %v6054_v32 = vmul.bf16 %v4419_v7, %v4650_v3  ;;  %v1663_v20 = vrot.slane %v1661_v55, 7  ;;  %v6055_v26 = vmul.bf16 %v4419_v7, %v4563_v39  ;;  %v3741_v35 = vpop.eup %3740 }
 0x20b   :  { %v784_v62 = vadd.bf16 %v776_v51, %v761_v57  ;;  %v4775_v59 = vadd.bf16 %v777_v22, %v762_v37  ;;  %v1647_v23 = vrot.slane %v1645_v53, 7  ;;  %v786_v1 = vadd.bf16 %v778_v14, %v763_v49  ;;  %v1734_v57 = vld [vmem:[#allocation2 + $0x20] sm:$0xf]  ;;  %v1737_v37 = vld [vmem:[#allocation2 + $0x24] sm:$0x1] }
 0x20c   :  { %v782_v36 = vadd.bf16 %v6054_v32, %v4626_v42  ;;  %v783_v8 = vadd.bf16 %v6055_v26, %v760_v41  ;;  %v4777_v34 = vadd.bf16 %v779_v6, %v764_v9  ;;  %v4779_v43 = vadd.bf16 %v780_v16, %v765_v0  ;;  %v4789_v14 = vld [vmem:[#allocation2 + $0x20] sm:$0xe] }
 0x20d   :  { %v1666_v24 = vor.u32 %v1664_v38, %v1663_v20  ;;  %v1667_v42 = vrot.slane %v1663_v20, 4  ;;  %v545_v55 = vmul.f32 %v3739_v48, %v4482_v19  ;;  %v795_v41 = vmul.bf16 %v4429_v11, %v4642_v58  ;;  %v3743_v51 = vpop.eup %3742  ;;  %6056 = vst [vmem:[#allocation59_spill] sm:$0xff] %v4789_v14  ;;  %v1722_v58 = vld [vmem:[#allocation2 + $0x10] sm:$0xf]  ;;  %v1725_v48 = vld [vmem:[#allocation2 + $0x14] sm:$0x1] }
 0x20e   :  { %v1650_v22 = vor.u32 %v1648_v25, %v1647_v23  ;;  %v1651_v53 = vrot.slane %v1647_v23, 4  ;;  %v543_v49 = vmul.f32 %v3741_v35, %v4488_v33  ;;  %v796_v0 = vmul.bf16 %v4429_v11, %v4723_v31 }
 0x20f   :  { %v3745_v9 = vpop.eup %3744  ;;  %v1735_v38 = vsel %vm4521_vm8, %v1666_v24, %v1734_v57  ;;  %v1738_v19 = vsel %vm4527_vm9, %v1667_v42, %v1737_v37  ;;  %v3399_v6 = vpack.c.bf16 %v545_v55, %v545_v55  ;;  %v546_v25 = vmul.f32 %v3743_v51, %v4492_v40 }
 0x210   :  { %1736 = vst [vmem:[#allocation2 + $0x20] sm:$0xf] %v1735_v38  ;;  %1739 = vst [vmem:[#allocation2 + $0x24] sm:$0x1] %v1738_v19  ;;  %v1723_v33 = vsel %vm4521_vm8, %v1650_v22, %v1722_v58  ;;  %v1726_v23 = vsel %vm4527_vm9, %v1651_v53, %v1725_v48  ;;  %v3397_v35 = vpack.c.bf16 %v543_v49, %v543_v49  ;;  %v496_v16 = vadd.f32 1.0, %v3745_v9 }
 0x211   :  { %1724 = vst [vmem:[#allocation2 + $0x10] sm:$0xf] %v1723_v33  ;;  %1727 = vst [vmem:[#allocation2 + $0x14] sm:$0x1] %v1726_v23  ;;  %v1685_v24 = vshrl.u32 %v3399_v6, 16  ;;  %v1688_v32 = vshll.u32 %v3399_v6, 16  ;;  %v3400_v20 = vpack.c.bf16 %v546_v25, %v546_v25  ;;  %v797_v26 = vmul.bf16 %v4429_v11, %v4730_v47 }
 0x212   :  { %v1669_v42 = vshrl.u32 %v3397_v35, 16  ;;  %v1672_v40 = vshll.u32 %v3397_v35, 16  ;;  %3746 = vrcp.f32 %v496_v16  ;;  %v798_v55 = vmul.bf16 %v4429_v11, %v4736_v56  ;;  %v4819_v48 = vld [vmem:[#allocation2 + $0x3c] sm:$0x1]  ;;  %v4821_v6 = vld [vmem:[#allocation2 + $0x38] sm:$0xe] }
 0x213   :  { %v1687_v51 = vrot.slane %v1685_v24, 7  ;;  %v1693_v57 = vshrl.u32 %v3400_v20, 16  ;;  %v1696_v37 = vshll.u32 %v3400_v20, 16  ;;  %v799_v22 = vmul.bf16 %v4429_v11, %v4756_v61  ;;  %6059 = vst [vmem:[#allocation60_spill] sm:$0xff] %v4821_v6  ;;  %v1752_v23 = vld [vmem:[#allocation2 + $0x38] sm:$0xf] }
 0x214   :  { %v1671_v53 = vrot.slane %v1669_v42, 7  ;;  %v6057_v49 = vmul.bf16 %v4429_v11, %v4650_v3  ;;  %v6058_v38 = vmul.bf16 %v4429_v11, %v4563_v39  ;;  %v4817_v58 = vadd.bf16 %v795_v41, %v783_v8  ;;  %v1755_v35 = vld [vmem:[#allocation2 + $0x3c] sm:$0x1]  ;;  %v1740_v39 = vld [vmem:[#allocation2 + $0x28] sm:$0xf] }
 0x215   :  { %v1690_v25 = vor.u32 %v1688_v32, %v1687_v51  ;;  %v1691_v33 = vrot.slane %v1687_v51, 4  ;;  %v1695_v16 = vrot.slane %v1693_v57, 7  ;;  %v4823_v24 = vadd.bf16 %v796_v0, %v784_v62  ;;  %v1743_v42 = vld [vmem:[#allocation2 + $0x2c] sm:$0x1]  ;;  %v4836_v0 = vld [vmem:[#allocation2 + $0x34] sm:$0x1] }
 0x216   :  { %v4810_v9 = vadd.bf16 %v6057_v49, %v4629_v21  ;;  %v4815_v19 = vadd.bf16 %v6058_v38, %v782_v36  ;;  %v4825_v21 = vld [vmem:[#allocation2 + $0x2c] sm:$0x1]  ;;  %v1674_v3 = vor.u32 %v1672_v40, %v1671_v53  ;;  %v1675_v20 = vrot.slane %v1671_v53, 4  ;;  %v4838_v40 = vld [vmem:[#allocation2 + $0x28] sm:$0xe] }
 0x217   :  { %v4828_v36 = vadd.bf16 %v797_v26, %v4775_v59  ;;  %v4830_v8 = vadd.bf16 %v798_v55, %v786_v1  ;;  %v1753_v41 = vsel %vm4521_vm8, %v1690_v25, %v1752_v23  ;;  %v1756_v32 = vsel %vm4527_vm9, %v1691_v33, %v1755_v35  ;;  %6060 = vst [vmem:[#allocation61_spill] sm:$0xff] %v4838_v40  ;;  %v1758_v26 = vld [vmem:[#allocation2 + $0x40] sm:$0xf]  ;;  %v1761_v55 = vld [vmem:[#allocation2 + $0x44] sm:$0x1] }
 0x218   :  { %v1698_v51 = vor.u32 %v1696_v37, %v1695_v16  ;;  %v1699_v62 = vrot.slane %v1695_v16, 4  ;;  %1754 = vst [vmem:[#allocation2 + $0x38] sm:$0xf] %v1753_v41  ;;  %1757 = vst [vmem:[#allocation2 + $0x3c] sm:$0x1] %v1756_v32  ;;  %v1741_v59 = vsel %vm4521_vm8, %v1674_v3, %v1740_v39  ;;  %v1744_v1 = vsel %vm4527_vm9, %v1675_v20, %v1743_v42 }
 0x219   :  { %v4845_v57 = vadd.bf16 %v799_v22, %v4777_v34  ;;  %v6061_v37 = vmul.bf16 %v4429_v11, %v4441_v27  ;;  %1742 = vst [vmem:[#allocation2 + $0x28] sm:$0xf] %v1741_v59  ;;  %1745 = vst [vmem:[#allocation2 + $0x2c] sm:$0x1] %v1744_v1  ;;  %v4853_v49 = vld [vmem:[#allocation2 + $0x40] sm:$0xe]  ;;  %v836_v34 = vmul.bf16 %v4373_v29, %v4781_v17 }
 0x21a   :  { %6062 = vst [vmem:[#allocation62_spill] sm:$0xff] %v4853_v49  ;;  %v1759_v38 = vsel %vm4521_vm8, %v1698_v51, %v1758_v26  ;;  %v1762_v25 = vsel %vm4527_vm9, %v1699_v62, %v1761_v55  ;;  %v837_v22 = vmul.bf16 %v4373_v29, %v4723_v31  ;;  %v838_v27 = vmul.bf16 %v4373_v29, %v4825_v21 }
 0x21b   :  { %v4851_v53 = vadd.bf16 %v6061_v37, %v4779_v43  ;;  %1760 = vst [vmem:[#allocation2 + $0x40] sm:$0xf] %v1759_v38  ;;  %1763 = vst [vmem:[#allocation2 + $0x44] sm:$0x1] %v1762_v25  ;;  %v839_v43 = vmul.bf16 %v4373_v29, %v4730_v47  ;;  %v840_v33 = vmul.bf16 %v4373_v29, %v4836_v0  ;;  %v6063_v16 = vshrl.u32 %v4684_v18, 16 }
 0x21c   :  { %v841_v23 = vmul.bf16 %v4373_v29, %v4736_v56  ;;  %v842_v35 = vmul.bf16 %v4373_v29, %v4819_v48  ;;  %v6064_v20 = vshll.u32 %v4684_v18, 16  ;;  %v889_v41 = vshrl.u32 %v4582_v10, 16  ;;  %v3747_v32 = vpop.eup %3746 }
 0x21d   :  { %v877_v3 = vrot.slane %v6063_v16, 4  ;;  %v892_v42 = vshll.u32 %v4582_v10, 16  ;;  %v900_v51 = vrot.slane %v4596_v28, 5  ;;  %v903_v62 = vshrl.u32 %v4661_v2, 16 }
 0x21e   :  { %v880_v39 = vrot.slane %v6064_v20, 5  ;;  %v906_v59 = vshll.u32 %v4661_v2, 16  ;;  %v544_v1 = vmul.f32 %v3747_v32, %v4496_v46  ;;  %v891_v55 = vrot.slane %v889_v41, 4 }
 0x21f   :  { %v912_v37 = vshll.u32 %v836_v34, 16  ;;  %v894_v38 = vrot.slane %v892_v42, 5  ;;  %v905_v25 = vrot.slane %v903_v62, 4  ;;  %v917_v16 = vshrl.u32 %v837_v22, 16 }
 0x220   :  { %v881_v26 = vor.u32 %v880_v39, %v877_v3  ;;  %v908_v18 = vrot.slane %v906_v59, 5  ;;  %v3398_v20 = vpack.c.bf16 %v544_v1, %v544_v1  ;;  %v920_v7 = vshll.u32 %v837_v22, 16 }
 0x221   :  { %v914_v11 = vrot.slane %v912_v37, 5  ;;  %v895_v10 = vor.u32 %v894_v38, %v891_v55  ;;  %v919_v28 = vrot.slane %v917_v16, 4  ;;  %v926_v6 = vshll.u32 %v838_v27, 16  ;;  %v1746_v55 = vld [vmem:[#allocation2 + $0x30] sm:$0xf] }
 0x222   :  { %v882_v29 = vrot.slane %v881_v26, 4  ;;  %v909_v49 = vor.u32 %v908_v18, %v905_v25  ;;  %v1677_v40 = vshrl.u32 %v3398_v20, 16  ;;  %v1680_v14 = vshll.u32 %v3398_v20, 16  ;;  %v1749_v37 = vld [vmem:[#allocation2 + $0x34] sm:$0x1] }
 0x223   :  { %v6065_v2 = vrot.slane %v4702_v60, 5  ;;  %v922_v34 = vrot.slane %v920_v7, 5  ;;  %v896_v3 = vrot.slane %v895_v10, 4  ;;  %v928_v41 = vrot.slane %v926_v6, 5  ;;  %v4897_v25 = vld [vmem:[#allocation2 + $0x30] sm:$0xe] }
 0x224   :  { %v910_v39 = vrot.slane %v909_v49, 4  ;;  %v931_v32 = vshrl.u32 %v839_v43, 16  ;;  %v1679_v42 = vrot.slane %v1677_v40, 7  ;;  %v934_v22 = vshll.u32 %v839_v43, 16 }
 0x225   :  { %v4887_v46 = vsel %vm4460_vm3, %v882_v29, %v6065_v2  ;;  %v923_v62 = vor.u32 %v922_v34, %v919_v28  ;;  %v940_v59 = vshll.u32 %v840_v33, 16  ;;  %v4891_v27 = vsel %vm4460_vm3, %v896_v3, %v900_v51 }
 0x226   :  { %v4895_v60 = vsel %vm4460_vm3, %v910_v39, %v914_v11  ;;  %v933_v1 = vrot.slane %v931_v32, 4  ;;  %v945_v29 = vshrl.u32 %v841_v23, 16  ;;  %v1682_v26 = vor.u32 %v1680_v14, %v1679_v42 }
 0x227   :  { %v1683_v7 = vrot.slane %v1679_v42, 4  ;;  %v924_v49 = vrot.slane %v923_v62, 4  ;;  %v936_v6 = vrot.slane %v934_v22, 5  ;;  %v942_v40 = vrot.slane %v940_v59, 5 }
 0x228   :  { %v947_v38 = vrot.slane %v945_v29, 4  ;;  %v948_v43 = vshll.u32 %v841_v23, 16  ;;  %v954_v33 = vshll.u32 %v842_v35, 16  ;;  %v1747_v51 = vsel %vm4521_vm8, %v1682_v26, %v1746_v55 }
 0x229   :  { %v1750_v11 = vsel %vm4527_vm9, %v1683_v7, %v1749_v37  ;;  %v4905_v14 = vsel %vm4460_vm3, %v924_v49, %v928_v41  ;;  %v937_v18 = vor.u32 %v936_v6, %v933_v1  ;;  %1748 = vst [vmem:[#allocation2 + $0x30] sm:$0xf] %v1747_v51  ;;  %v966_v23 = vadd.bf16 %v4479_v4, %v4810_v9 }
 0x22a   :  { %1751 = vst [vmem:[#allocation2 + $0x34] sm:$0x1] %v1750_v11  ;;  %v950_v16 = vrot.slane %v948_v43, 5  ;;  %v956_v20 = vrot.slane %v954_v33, 5  ;;  %v967_v35 = vadd.bf16 %v4654_v15, %v4815_v19  ;;  %v968_v50 = vadd.bf16 %v4887_v46, %v4817_v58 }
 0x22b   :  { %v938_v44 = vrot.slane %v937_v18, 4  ;;  %v989_v3 = vmul.bf16 %v4431_v12, %v4781_v17  ;;  %v990_v39 = vmul.bf16 %v4431_v12, %v4723_v31  ;;  %v991_v32 = vmul.bf16 %v4431_v12, %v4825_v21 }
 0x22c   :  { %v951_v2 = vor.u32 %v950_v16, %v947_v38  ;;  %v992_v42 = vmul.bf16 %v4431_v12, %v4730_v47  ;;  %v993_v62 = vmul.bf16 %v4431_v12, %v4836_v0  ;;  %v994_v1 = vmul.bf16 %v4431_v12, %v4736_v56 }
 0x22d   :  { %v4925_v41 = vsel %vm4460_vm3, %v938_v44, %v942_v40  ;;  %v995_v29 = vmul.bf16 %v4431_v12, %v4819_v48  ;;  %v996_v26 = vmul.bf16 %v4431_v12, %v4756_v61  ;;  %v6066_v7 = vshrl.u32 %v4694_v52, 16 }
 0x22e   :  { %v952_v22 = vrot.slane %v951_v2, 4  ;;  %v6067_v49 = vshll.u32 %v4694_v52, 16  ;;  %v1027_v37 = vshrl.u32 %v4600_v45, 16  ;;  %v1030_v38 = vshll.u32 %v4600_v45, 16 }
 0x22f   :  { %v1015_v55 = vrot.slane %v6066_v7, 4  ;;  %v1038_v43 = vrot.slane %v4616_v13, 5  ;;  %v1041_v33 = vshrl.u32 %v4665_v5, 16  ;;  %v1044_v52 = vshll.u32 %v4665_v5, 16 }
 0x230   :  { %v1018_v6 = vrot.slane %v6067_v49, 5  ;;  %v4948_v40 = vsel %vm4460_vm3, %v952_v22, %v956_v20  ;;  %v1029_v18 = vrot.slane %v1027_v37, 4  ;;  %v1032_v16 = vrot.slane %v1030_v38, 5 }
 0x231   :  { %v1043_v44 = vrot.slane %v1041_v33, 4  ;;  %v1050_v2 = vshll.u32 %v989_v3, 16  ;;  %v1055_v7 = vshrl.u32 %v990_v39, 16  ;;  %v1046_v20 = vrot.slane %v1044_v52, 5 }
 0x232   :  { %v1019_v11 = vor.u32 %v1018_v6, %v1015_v55  ;;  %v1058_v22 = vshll.u32 %v990_v39, 16  ;;  %v1064_v59 = vshll.u32 %v991_v32, 16  ;;  %v1033_v45 = vor.u32 %v1032_v16, %v1029_v18 }
 0x233   :  { %v1052_v34 = vrot.slane %v1050_v2, 5  ;;  %v1057_v13 = vrot.slane %v1055_v7, 4  ;;  %v1069_v28 = vshrl.u32 %v992_v42, 16  ;;  %v6068_v10 = vrot.slane %v4710_v63, 5 }
 0x234   :  { %v1020_v49 = vrot.slane %v1019_v11, 4  ;;  %v1047_v6 = vor.u32 %v1046_v20, %v1043_v44  ;;  %v1060_v37 = vrot.slane %v1058_v22, 5  ;;  %v1066_v5 = vrot.slane %v1064_v59, 5 }
 0x235   :  { %v1034_v38 = vrot.slane %v1033_v45, 4  ;;  %v1071_v33 = vrot.slane %v1069_v28, 4  ;;  %v1072_v3 = vshll.u32 %v992_v42, 16  ;;  %v1078_v51 = vshll.u32 %v993_v62, 16 }
 0x236   :  { %v1025_v55 = vsel %vm4460_vm3, %v1020_v49, %v6068_v10  ;;  %v1048_v11 = vrot.slane %v1047_v6, 4  ;;  %v1061_v52 = vor.u32 %v1060_v37, %v1057_v13  ;;  %v1083_v39 = vshrl.u32 %v994_v1, 16 }
 0x237   :  { %v1086_v32 = vshll.u32 %v994_v1, 16  ;;  %v1039_v18 = vsel %vm4460_vm3, %v1034_v38, %v1038_v43  ;;  %v1074_v16 = vrot.slane %v1072_v3, 5  ;;  %v1080_v2 = vrot.slane %v1078_v51, 5 }
 0x238   :  { %v1092_v63 = vshll.u32 %v995_v29, 16  ;;  %v1053_v10 = vsel %vm4460_vm3, %v1048_v11, %v1052_v34  ;;  %v1062_v44 = vrot.slane %v1061_v52, 4  ;;  %v1085_v7 = vrot.slane %v1083_v39, 4  ;;  %v6070_v29 = vld [vmem:[#allocation53_spill] sm:$0xff]  ;;  %v6076_v52 = vld [vmem:[#allocation55_spill] sm:$0xff] }
 0x239   :  { %v1088_v59 = vrot.slane %v1086_v32, 5  ;;  %v1075_v49 = vor.u32 %v1074_v16, %v1071_v33  ;;  %v1097_v42 = vshrl.u32 %v996_v26, 16  ;;  %v1100_v62 = vshll.u32 %v996_v26, 16 }
 0x23a   :  { %v1094_v28 = vrot.slane %v1092_v63, 5  ;;  %v1067_v20 = vsel %vm4460_vm3, %v1062_v44, %v1066_v5  ;;  %v6069_v43 = vmul.bf16 %v4431_v12, %v4714_v30  ;;  %v4973_v34 = vadd.bf16 %v6070_v29, %v966_v23 }
 0x23b   :  { %v1089_v1 = vor.u32 %v1088_v59, %v1085_v7  ;;  %v1076_v51 = vrot.slane %v1075_v49, 4  ;;  %v1099_v45 = vrot.slane %v1097_v42, 4  ;;  %v1102_v13 = vrot.slane %v1100_v62, 5  ;;  %v6081_v49 = vld [vmem:[#allocation52_spill] sm:$0xff] }
 0x23c   :  { %v1106_v22 = vshll.u32 %v6069_v43, 16  ;;  %v4978_v26 = vadd.bf16 %v1025_v55, %v967_v35  ;;  %v4983_v5 = vadd.bf16 %v1039_v18, %v968_v50  ;;  %v6071_v4 = vadd.bf16 %v4891_v27, %v4823_v24  ;;  %v6073_v35 = vld [vmem:[#allocation36_spill] sm:$0xff]  ;;  %v6078_v18 = vld [vmem:[#allocation45_spill] sm:$0xff] }
 0x23d   :  { %v1090_v6 = vrot.slane %v1089_v1, 4  ;;  %v1081_v23 = vsel %vm4460_vm3, %v1076_v51, %v1080_v2  ;;  %v1103_v38 = vor.u32 %v1102_v13, %v1099_v45  ;;  %v6072_v15 = vadd.bf16 %v4895_v60, %v4828_v36 }
 0x23e   :  { %v1108_v37 = vrot.slane %v1106_v22, 5  ;;  %v4988_v9 = vadd.bf16 %v1053_v10, %v6071_v4  ;;  %v1139_v55 = vmul.bf16 %v6073_v35, %v4781_v17  ;;  %v6074_v24 = vadd.bf16 %v4905_v14, %v4830_v8 }
 0x23f   :  { %v4995_v19 = vadd.bf16 %v1067_v20, %v6072_v15  ;;  %v1095_v58 = vsel %vm4460_vm3, %v1090_v6, %v1094_v28  ;;  %v1140_v27 = vmul.bf16 %v6073_v35, %v4723_v31  ;;  %v1141_v50 = vmul.bf16 %v6073_v35, %v4825_v21 }
 0x240   :  { %v5004_v46 = vadd.bf16 %v1081_v23, %v6074_v24  ;;  %v1104_v36 = vrot.slane %v1103_v38, 4  ;;  %v6075_v60 = vadd.bf16 %v4925_v41, %v4845_v57  ;;  %v1142_v3 = vmul.bf16 %v6073_v35, %v4730_v47  ;;  %v6077_v47 = vld [vmem:[#allocation56_spill] sm:$0xff] }
 0x241   :  { %v1143_v8 = vmul.bf16 %v6073_v35, %v4836_v0  ;;  %v1144_v14 = vmul.bf16 %v6073_v35, %v4736_v56  ;;  %v1145_v31 = vmul.bf16 %v6073_v35, %v4819_v48  ;;  %v1146_v11 = vmul.bf16 %v6073_v35, %v4756_v61  ;;  %v6080_v61 = vld [vmem:[#allocation46_spill] sm:$0xff] }
 0x242   :  { %v5013_v33 = vadd.bf16 %v1095_v58, %v6075_v60  ;;  %v1151_v39 = vshrl.u32 %v6076_v52, 16  ;;  %v1109_v57 = vsel %vm4460_vm3, %v1104_v36, %v1108_v37  ;;  %v1154_v41 = vshll.u32 %v6076_v52, 16 }
 0x243   :  { %v1162_v32 = vrot.slane %v6077_v47, 5  ;;  %v1165_v16 = vshrl.u32 %v6078_v18, 16  ;;  %v6079_v56 = vadd.bf16 %v4948_v40, %v4851_v53  ;;  %v1168_v10 = vshll.u32 %v6078_v18, 16 }
 0x244   :  { %v1153_v63 = vrot.slane %v1151_v39, 4  ;;  %v1176_v44 = vrot.slane %v6080_v61, 5  ;;  %v1156_v7 = vrot.slane %v1154_v41, 5  ;;  %v1179_v28 = vshrl.u32 %v6081_v49, 16 }
 0x245   :  { %v5034_v2 = vadd.bf16 %v1109_v57, %v6079_v56  ;;  %v1167_v59 = vrot.slane %v1165_v16, 4  ;;  %v1182_v42 = vshll.u32 %v6081_v49, 16  ;;  %v1170_v62 = vrot.slane %v1168_v10, 5 }
 0x246   :  { %v1188_v20 = vshll.u32 %v1139_v55, 16  ;;  %v1193_v1 = vshrl.u32 %v1140_v27, 16  ;;  %v1196_v43 = vshll.u32 %v1140_v27, 16  ;;  %v1157_v22 = vor.u32 %v1156_v7, %v1153_v63 }
 0x247   :  { %v1181_v29 = vrot.slane %v1179_v28, 4  ;;  %v1184_v53 = vrot.slane %v1182_v42, 5  ;;  %v1202_v40 = vshll.u32 %v1141_v50, 16  ;;  %v1171_v51 = vor.u32 %v1170_v62, %v1167_v59  ;;  %v6083_v59 = vld [vmem:[#allocation41_spill] sm:$0xff]  ;;  %v6085_v28 = vld [vmem:[#allocation42_spill] sm:$0xff] }
 0x248   :  { %v1190_v45 = vrot.slane %v1188_v20, 5  ;;  %v1195_v13 = vrot.slane %v1193_v1, 4  ;;  %v1198_v6 = vrot.slane %v1196_v43, 5  ;;  %v1158_v37 = vrot.slane %v1157_v22, 4 }
 0x249   :  { %v1185_v4 = vor.u32 %v1184_v53, %v1181_v29  ;;  %v1204_v23 = vrot.slane %v1202_v40, 5  ;;  %v1207_v38 = vshrl.u32 %v1142_v3, 16  ;;  %v1172_v15 = vrot.slane %v1171_v51, 4 }
 0x24a   :  { %v1199_v58 = vor.u32 %v1198_v6, %v1195_v13  ;;  %v1210_v24 = vshll.u32 %v1142_v3, 16  ;;  %v1216_v55 = vshll.u32 %v1143_v8, 16  ;;  %v5042_v27 = vsel %vm4460_vm3, %v1158_v37, %v1162_v32  ;;  %v6086_v13 = vld [vmem:[#allocation51_spill] sm:$0xff]  ;;  %v6087_v6 = vld [vmem:[#allocation37_spill] sm:$0xff] }
 0x24b   :  { %v1186_v36 = vrot.slane %v1185_v4, 4  ;;  %v1209_v50 = vrot.slane %v1207_v38, 4  ;;  %v1221_v60 = vshrl.u32 %v1144_v14, 16  ;;  %v5046_v52 = vsel %vm4460_vm3, %v1172_v15, %v1176_v44  ;;  %v6088_v4 = vld [vmem:[#allocation43_spill] sm:$0xff] }
 0x24c   :  { %v1200_v39 = vrot.slane %v1199_v58, 4  ;;  %v1212_v57 = vrot.slane %v1210_v24, 5  ;;  %v1218_v41 = vrot.slane %v1216_v55, 5  ;;  %v1224_v8 = vshll.u32 %v1144_v14, 16  ;;  %v6090_v58 = vld [vmem:[#allocation61_spill] sm:$0xff] }
 0x24d   :  { %v5050_v47 = vsel %vm4460_vm3, %v1186_v36, %v1190_v45  ;;  %v1223_v3 = vrot.slane %v1221_v60, 4  ;;  %v1230_v18 = vshll.u32 %v1145_v31, 16  ;;  %v1235_v56 = vshrl.u32 %v1146_v11, 16  ;;  %v6094_v60 = vld [vmem:[#allocation60_spill] sm:$0xff] }
 0x24e   :  { %v5054_v32 = vsel %vm4460_vm3, %v1200_v39, %v1204_v23  ;;  %v1213_v16 = vor.u32 %v1212_v57, %v1209_v50  ;;  %v1238_v63 = vshll.u32 %v1146_v11, 16  ;;  %v1226_v10 = vrot.slane %v1224_v8, 5  ;;  %v6097_v8 = vld [vmem:[#allocation32_spill] sm:$0xff] }
 0x24f   :  { %v1232_v61 = vrot.slane %v1230_v18, 5  ;;  %v6082_v44 = vmul.bf16 %v6073_v35, %v4714_v30  ;;  %v6084_v49 = vrot.slane %v6083_v59, 5  ;;  %v1237_v42 = vrot.slane %v1235_v56, 4  ;;  %v6100_v56 = vld [vmem:[#allocation47_spill] sm:$0xff] }
 0x250   :  { %v1214_v31 = vrot.slane %v1213_v16, 4  ;;  %v1240_v62 = vrot.slane %v1238_v63, 5  ;;  %v1270_v20 = vadd.bf16 %v5042_v27, %v4973_v34  ;;  %v1227_v1 = vor.u32 %v1226_v10, %v1223_v3  ;;  %v6099_v16 = vld [vmem:[#allocation48_spill] sm:$0xff] }
 0x251   :  { %v1244_v7 = vshll.u32 %v6082_v44, 16  ;;  %v1261_v14 = vsel %vm4460_vm3, %v6085_v28, %v6084_v49  ;;  %v1271_v43 = vadd.bf16 %v5046_v52, %v4978_v26  ;;  %v1272_v22 = vadd.bf16 %v5050_v47, %v4983_v5  ;;  %v6089_v5 = vld [vmem:[#allocation59_spill] sm:$0xff]  ;;  %v6101_v10 = vld [vmem:[#allocation44_spill] sm:$0xff] }
 0x252   :  { %v1219_v29 = vsel %vm4460_vm3, %v1214_v31, %v1218_v41  ;;  %v1241_v53 = vor.u32 %v1240_v62, %v1237_v42  ;;  %v1273_v40 = vadd.bf16 %v5054_v32, %v4988_v9  ;;  %v1277_v51 = vadd.bf16 %v1261_v14, %v5034_v2  ;;  %v6095_v41 = vld [vmem:[#allocation40_spill] sm:$0xff]  ;;  %v6103_v31 = vld [vmem:[#allocation57_spill] sm:$0xff] }
 0x253   :  { %v1246_v11 = vrot.slane %v1244_v7, 5  ;;  %v1228_v45 = vrot.slane %v1227_v1, 4  ;;  %v1274_v34 = vadd.bf16 %v1219_v29, %v4995_v19  ;;  %v1301_v37 = vmul.bf16 %v6087_v6, %v6086_v13 }
 0x254   :  { %v1303_v26 = vmul.bf16 %v6087_v6, %v6088_v4  ;;  %v1242_v23 = vrot.slane %v1241_v53, 4  ;;  %v1304_v38 = vmul.bf16 %v6087_v6, %v6089_v5  ;;  %v1305_v15 = vmul.bf16 %v6087_v6, %v4781_v17 }
 0x255   :  { %v1306_v9 = vmul.bf16 %v6087_v6, %v6090_v58  ;;  %v6091_v19 = vmov 0  ;;  %v1233_v2 = vsel %vm4460_vm3, %v1228_v45, %v1232_v61  ;;  %v1307_v24 = vmul.bf16 %v6087_v6, %v4825_v21 }
 0x256   :  { %v6092_v19 = vsel %vm5088_vm12, 4294967295, %v6091_v19  ;;  %v1308_v55 = vmul.bf16 %v6087_v6, %v4897_v25  ;;  %v1309_v27 = vmul.bf16 %v6087_v6, %v4836_v0  ;;  %v1247_v36 = vsel %vm4460_vm3, %v1242_v23, %v1246_v11 }
 0x257   :  { %6093 = vst [vmem:[#allocation53_spill] sm:$0xff] %v6092_v19  ;;  %v1275_v50 = vadd.bf16 %v1233_v2, %v5004_v46  ;;  %v1310_v52 = vmul.bf16 %v6087_v6, %v6094_v60  ;;  %v1311_v39 = vmul.bf16 %v6087_v6, %v4819_v48  ;;  %v1276_v57 = vadd.bf16 %v1247_v36, %v5013_v33 }
 0x258   :  { %v6096_v47 = vmul.bf16 %v6087_v6, %v6095_v41  ;;  %v6098_v18 = vmul.bf16 %v6087_v6, %v6097_v8  ;;  %v1338_v46 = vsel %vm5088_vm12, %v6100_v56, %v6099_v16  ;;  %v1341_v63 = vrot.slane %v1301_v37, 5  ;;  %v6104_v41 = vld [vmem:[#allocation38_spill] sm:$0xff] }
 0x259   :  { %v6102_v61 = vmul.bf16 %v6087_v6, %v6101_v10  ;;  %v1345_v7 = vrot.slane %v1303_v26, 5  ;;  %v3277_v33 = vrot.slane %v1304_v38, 9  ;;  %v1349_v49 = vrot.slane %v1305_v15, 5 }
 0x25a   :  { %v3273_v3 = vrot.slane %v6096_v47, 9  ;;  %v1333_v32 = vrot.slane %v6098_v18, 5  ;;  %v3278_v28 = vrot.slane %v1306_v9, 9  ;;  %v1353_v14 = vrot.slane %v1307_v24, 5  ;;  %v6106_v18 = vld [vmem:[#allocation50_spill] sm:$0xff] }
 0x25b   :  { %v3276_v44 = vrot.slane %v6102_v61, 9  ;;  %v1342_v42 = vsel %vm5088_vm12, %v6103_v31, %v1341_v63  ;;  %v3279_v1 = vrot.slane %v1308_v55, 9  ;;  %v1357_v11 = vrot.slane %v1309_v27, 5 }
 0x25c   :  { %v1334_v59 = vsel %vm5088_vm12, %v3273_v3, %v1333_v32  ;;  %v1350_v29 = vsel %vm5088_vm12, %v3277_v33, %v1349_v49  ;;  %v1354_v53 = vsel %vm5088_vm12, %v3278_v28, %v1353_v14  ;;  %v3280_v45 = vrot.slane %v1310_v52, 9  ;;  %v6107_v32 = vld [vmem:[#allocation49_spill] sm:$0xff]  ;;  %v6109_v33 = vld [vmem:[#allocation58_spill] sm:$0xff] }
 0x25d   :  { %v1346_v62 = vsel %vm5088_vm12, %v3276_v44, %v1345_v7  ;;  %v1361_v37 = vrot.slane %v1311_v39, 5  ;;  %v1358_v26 = vsel %vm5088_vm12, %v3279_v1, %v1357_v11  ;;  %v1371_v23 = vadd.bf16 %v1334_v59, %v1270_v20 }
 0x25e   :  { %v1372_v38 = vadd.bf16 %v1338_v46, %v1271_v43  ;;  %v1373_v15 = vadd.bf16 %v1342_v42, %v1272_v22  ;;  %v1374_v2 = vadd.bf16 %v1346_v62, %v1273_v40  ;;  %v1375_v24 = vadd.bf16 %v1350_v29, %v1274_v34 }
 0x25f   :  { %v1362_v9 = vsel %vm5088_vm12, %v3280_v45, %v1361_v37  ;;  %v1376_v55 = vadd.bf16 %v1354_v53, %v1275_v50  ;;  %v1377_v27 = vadd.bf16 %v1358_v26, %v1276_v57  ;;  %v1390_v47 = vmul.bf16 %v6104_v41, %v6086_v13  ;;  %v6105_v57 = vld [vmem:[#allocation62_spill] sm:$0xff] }
 0x260   :  { %v1378_v36 = vadd.bf16 %v1362_v9, %v1277_v51  ;;  %v1392_v52 = vmul.bf16 %v6104_v41, %v6088_v4  ;;  %v1393_v39 = vmul.bf16 %v6104_v41, %v6089_v5  ;;  %v1394_v20 = vmul.bf16 %v6104_v41, %v4781_v17 }
 0x261   :  { %v1395_v43 = vmul.bf16 %v6104_v41, %v6090_v58  ;;  %v1396_v22 = vmul.bf16 %v6104_v41, %v4825_v21  ;;  %v1397_v40 = vmul.bf16 %v6104_v41, %v4897_v25  ;;  %v1398_v51 = vmul.bf16 %v6104_v41, %v4836_v0 }
 0x262   :  { %v1399_v34 = vmul.bf16 %v6104_v41, %v6094_v60  ;;  %v1400_v50 = vmul.bf16 %v6104_v41, %v4819_v48  ;;  %v1401_v3 = vmul.bf16 %v6104_v41, %v6105_v57  ;;  %v1402_v8 = vmul.bf16 %v6104_v41, %v4714_v30 }
 0x263   :  { %v1422_v16 = vsel %vm5088_vm12, %v6107_v32, %v6106_v18  ;;  %v1425_v56 = vrot.slane %v1390_v47, 5  ;;  %v6108_v46 = vmul.bf16 %v6104_v41, %v6101_v10  ;;  %v1429_v61 = vrot.slane %v1392_v52, 5 }
 0x264   :  { %v3285_v44 = vrot.slane %v1393_v39, 9  ;;  %v1433_v7 = vrot.slane %v1394_v20, 5  ;;  %v3286_v49 = vrot.slane %v1395_v43, 9  ;;  %v1437_v28 = vrot.slane %v1396_v22, 5  ;;  %v1287_v22 = vld [vmem:[#allocation2 + $0x48] sm:$0xe] }
 0x265   :  { %v3284_v63 = vrot.slane %v6108_v46, 9  ;;  %v1426_v59 = vsel %vm5088_vm12, %v6109_v33, %v1425_v56  ;;  %v3287_v14 = vrot.slane %v1397_v40, 9  ;;  %v1441_v62 = vrot.slane %v1398_v51, 5 }
 0x266   :  { %v1434_v42 = vsel %vm5088_vm12, %v3285_v44, %v1433_v7  ;;  %v3288_v1 = vrot.slane %v1399_v34, 9  ;;  %v1438_v11 = vsel %vm5088_vm12, %v3286_v49, %v1437_v28  ;;  %v1445_v29 = vrot.slane %v1400_v50, 5  ;;  %v6110_v50 = vld [vmem:[#allocation39_spill] sm:$0xff] }
 0x267   :  { %v1430_v31 = vsel %vm5088_vm12, %v3284_v63, %v1429_v61  ;;  %v3289_v53 = vrot.slane %v1401_v3, 9  ;;  %v1449_v45 = vrot.slane %v1402_v8, 5  ;;  %v1442_v37 = vsel %vm5088_vm12, %v3287_v14, %v1441_v62 }
 0x268   :  { %v1459_v26 = vadd.bf16 %v1422_v16, %v1371_v23  ;;  %v1460_v9 = vadd.bf16 %v1426_v59, %v1372_v38  ;;  %v1461_v47 = vadd.bf16 %v1430_v31, %v1373_v15  ;;  %v1446_v52 = vsel %vm5088_vm12, %v3288_v1, %v1445_v29 }
 0x269   :  { %v1450_v39 = vsel %vm5088_vm12, %v3289_v53, %v1449_v45  ;;  %v1462_v20 = vadd.bf16 %v1434_v42, %v1374_v2  ;;  %v1463_v43 = vadd.bf16 %v1438_v11, %v1375_v24  ;;  %v1464_v40 = vadd.bf16 %v1442_v37, %v1376_v55  ;;  %v3299_v37 = vld [vmem:[#allocation11] ss:$0 sm:$0xff] }
 0x26a   :  { %v1465_v51 = vadd.bf16 %v1446_v52, %v1377_v27  ;;  %v1466_v34 = vadd.bf16 %v1450_v39, %v1378_v36  ;;  %v1479_v3 = vmul.bf16 %v6110_v50, %v6086_v13  ;;  %v1481_v23 = vmul.bf16 %v6110_v50, %v6088_v4  ;;  %v3820_v27 = vld [vmem:[#allocation2 + $0x4c] sm:$0x1] }
 0x26b   :  { %v1482_v38 = vmul.bf16 %v6110_v50, %v6089_v5  ;;  %v1483_v15 = vmul.bf16 %v6110_v50, %v4781_v17  ;;  %v1484_v2 = vmul.bf16 %v6110_v50, %v6090_v58  ;;  %v1485_v24 = vmul.bf16 %v6110_v50, %v4825_v21  ;;  %v6111_v36 = vld [vmem:[#allocation54_spill] sm:$0xff] }
 0x26c   :  { %v1486_v55 = vmul.bf16 %v6110_v50, %v4897_v25  ;;  %v1487_v13 = vmul.bf16 %v6110_v50, %v4836_v0  ;;  %v1488_v4 = vmul.bf16 %v6110_v50, %v6094_v60  ;;  %v1489_v5 = vmul.bf16 %v6110_v50, %v4819_v48 }
 0x26d   :  { %v1490_v17 = vmul.bf16 %v6110_v50, %v6105_v57  ;;  %v1491_v58 = vmul.bf16 %v6110_v50, %v4714_v30  ;;  %v1492_v21 = vmul.bf16 %v6110_v50, %v1287_v22  ;;  %v1493_v25 = vmul.bf16 %v3820_v27, %v6110_v50 }
 0x26e   :  { %v6112_v0 = vmul.bf16 %v6110_v50, %v6111_v36  ;;  %v1512_v18 = vrot.slane %v1479_v3, 5  ;;  %v6113_v60 = vmul.bf16 %v6110_v50, %v6101_v10  ;;  %v1516_v32 = vrot.slane %v1481_v23, 5 }
 0x26f   :  { %v3293_v16 = vrot.slane %v1482_v38, 9  ;;  %v1520_v57 = vrot.slane %v1483_v15, 5  ;;  %v3294_v56 = vrot.slane %v1484_v2, 9  ;;  %v1524_v46 = vrot.slane %v1485_v24, 5 }
 0x270   :  { %v3291_v8 = vrot.slane %v6112_v0, 9  ;;  %v3292_v48 = vrot.slane %v6113_v60, 9  ;;  %v3295_v63 = vrot.slane %v1486_v55, 9  ;;  %v1528_v61 = vrot.slane %v1487_v13, 5 }
 0x271   :  { %v1521_v7 = vsel %vm5088_vm12, %v3293_v16, %v1520_v57  ;;  %v3296_v33 = vrot.slane %v1488_v4, 9  ;;  %v1532_v59 = vrot.slane %v1489_v5, 5  ;;  %v1525_v10 = vsel %vm5088_vm12, %v3294_v56, %v1524_v46  ;;  %v6120_v16 = vld [vmem:[#allocation34_spill] sm:$0xff] }
 0x272   :  { %v1513_v30 = vsel %vm5088_vm12, %v3291_v8, %v1512_v18  ;;  %v1517_v44 = vsel %vm5088_vm12, %v3292_v48, %v1516_v32  ;;  %v1529_v49 = vsel %vm5088_vm12, %v3295_v63, %v1528_v61  ;;  %v3297_v28 = vrot.slane %v1490_v17, 9  ;;  %v5246_v17 = vld [vmem:[#allocation2 + $0x8] sm:$0xf]  ;;  %v5256_v8 = vld [vmem:[#allocation2] sm:$0xf] }
 0x273   :  { %v1536_v14 = vrot.slane %v1491_v58, 5  ;;  %v1533_v31 = vsel %vm5088_vm12, %v3296_v33, %v1532_v59  ;;  %v3298_v42 = vrot.slane %v1492_v21, 9  ;;  %v1540_v62 = vrot.slane %v1493_v25, 5  ;;  %v5258_v18 = vld [vmem:[#allocation2 + $0x20] sm:$0xf] }
 0x274   :  { %v1550_v1 = vadd.bf16 %v1513_v30, %v1459_v26  ;;  %v1551_v29 = vadd.bf16 %v1517_v44, %v1460_v9  ;;  %v1552_v53 = vadd.bf16 %v1521_v7, %v1461_v47  ;;  %v1553_v45 = vadd.bf16 %v1525_v10, %v1462_v20  ;;  %v5236_v20 = vld [vmem:[#allocation2 + $0x18] sm:$0xf]  ;;  %v5262_v32 = vld [vmem:[#allocation2 + $0x28] sm:$0xf]  ;;  %v5266_v56 = vld [vmem:[#allocation2 + $0x30] sm:$0xf] }
 0x275   :  { %v1537_v11 = vsel %vm5088_vm12, %v3297_v28, %v1536_v14  ;;  %v1541_v52 = vsel %vm5088_vm12, %v3298_v42, %v1540_v62  ;;  %v1554_v39 = vadd.bf16 %v1529_v49, %v1463_v43  ;;  %v1555_v22 = vadd.bf16 %v1533_v31, %v1464_v40  ;;  %v5238_v43 = vld [vmem:[#allocation2 + $0x10] sm:$0xf]  ;;  %v5268_v30 = vld [vmem:[#allocation2 + $0x38] sm:$0xf]  ;;  %v5286_v14 = vld [vmem:[#allocation2 + $0x40] sm:$0xf] }
 0x276   :  { %v1556_v3 = vadd.bf16 %v1537_v11, %v1465_v51  ;;  %v1557_v23 = vadd.bf16 %v1541_v52, %v1466_v34  ;;  %v1558_v38 = vunpack.c.l.bf16 %v1550_v1  ;;  %v1559_v15 = vunpack.c.l.bf16 %v1551_v29  ;;  %6121 = vst [vmem:[#allocation41_spill] sm:$0xff] %v5268_v30  ;;  %6122 = vst [vmem:[#allocation42_spill] sm:$0xff] %v5286_v14  ;;  %v6123_v1 = vld [vmem:[#allocation33_spill] sm:$0xff] }
 0x277   :  { %v1560_v2 = vunpack.c.l.bf16 %v1552_v53  ;;  %v1561_v24 = vunpack.c.l.bf16 %v1553_v45  ;;  %v1562_v55 = vunpack.c.l.bf16 %v1554_v39  ;;  %v1563_v26 = vunpack.c.l.bf16 %v1555_v22 }
 0x278   :  { %v1564_v13 = vunpack.c.l.bf16 %v1556_v3  ;;  %v1565_v4 = vunpack.c.l.bf16 %v1557_v23  ;;  %v5230_v5 = vadd.f32 %v3299_v37, %v1558_v38  ;;  %v5232_v9 = vadd.f32 %v3299_v37, %v1559_v15 }
 0x279   :  { %v5234_v47 = vadd.f32 %v3299_v37, %v1560_v2  ;;  %v5240_v40 = vadd.f32 %v3299_v37, %v1561_v24  ;;  %v5242_v51 = vadd.f32 %v3299_v37, %v1562_v55  ;;  %v5244_v34 = vadd.f32 %v3299_v37, %v1563_v26 }
 0x27a   :  { %v5248_v58 = vadd.f32 %v3299_v37, %v1564_v13  ;;  %v3300_v21 = vmul.f32 -1.442695, %v5230_v5  ;;  %v3301_v27 = vmul.f32 -1.442695, %v5232_v9  ;;  %v5253_v36 = vadd.f32 %v3299_v37, %v1565_v4 }
 0x27b   :  { %6114 = vst [vmem:[#allocation36_spill] sm:$0xff] %v5234_v47  ;;  %6115 = vst [vmem:[#allocation55_spill] sm:$0xff] %v5240_v40  ;;  %v3302_v25 = vmul.f32 -1.442695, %v5234_v47  ;;  %v3303_v0 = vmul.f32 -1.442695, %v5240_v40  ;;  %v1774_v57 = vmul.bf16 %v5256_v8, %v6120_v16  ;;  %v1775_v46 = vmul.bf16 %v5246_v17, %v6120_v16 }
 0x27c   :  { %6116 = vst [vmem:[#allocation56_spill] sm:$0xff] %v5242_v51  ;;  %6117 = vst [vmem:[#allocation45_spill] sm:$0xff] %v5244_v34  ;;  %3748 = vpow2.f32 %v3300_v21  ;;  %v3304_v60 = vmul.f32 -1.442695, %v5242_v51  ;;  %v3305_v48 = vmul.f32 -1.442695, %v5244_v34  ;;  %v1776_v63 = vmul.bf16 %v5238_v43, %v6120_v16 }
 0x27d   :  { %6118 = vst [vmem:[#allocation46_spill] sm:$0xff] %v5248_v58  ;;  %6119 = vst [vmem:[#allocation52_spill] sm:$0xff] %v5253_v36  ;;  %3750 = vpow2.f32 %v3301_v27  ;;  %v1777_v61 = vmul.bf16 %v5236_v20, %v6120_v16  ;;  %v3306_v44 = vmul.f32 -1.442695, %v5248_v58  ;;  %v3307_v7 = vmul.f32 -1.442695, %v5253_v36 }
 0x27e   :  { %3752 = vpow2.f32 %v3302_v25  ;;  %v1778_v33 = vmul.bf16 %v5258_v18, %v6120_v16  ;;  %v1779_v59 = vmul.bf16 %v5262_v32, %v6120_v16  ;;  %v1780_v10 = vmul.bf16 %v5266_v56, %v6120_v16  ;;  %v5382_v36 = vld [vmem:[#allocation2 + $0x3c] sm:$0x1] }
 0x27f   :  { %3754 = vpow2.f32 %v3303_v0  ;;  %v1781_v49 = vmul.bf16 %v5268_v30, %v6120_v16  ;;  %v1782_v28 = vadd.bf16 0, %v1774_v57  ;;  %v1783_v31 = vadd.bf16 0, %v1775_v46  ;;  %v6124_v0 = vld [vmem:[#allocation35_spill] sm:$0xff]  ;;  %v5306_v57 = vld [vmem:[#allocation2 + $0x48] sm:$0xf]  ;;  %6132 = vst [vmem:[#allocation32_spill] sm:$0xff] %v5382_v36 }
 0x280   :  { %3756 = vpow2.f32 %v3304_v60  ;;  %v1784_v42 = vadd.bf16 0, %v1776_v63  ;;  %v1785_v62 = vadd.bf16 0, %v1777_v61  ;;  %v1790_v11 = vmul.bf16 %v5246_v17, %v6123_v1  ;;  %6125 = vst [vmem:[#allocation51_spill] sm:$0xff] %v5306_v57 }
 0x281   :  { %3758 = vpow2.f32 %v3305_v48  ;;  %v1791_v29 = vmul.bf16 %v5238_v43, %v6123_v1  ;;  %v1793_v53 = vmul.bf16 %v5258_v18, %v6123_v1  ;;  %v1787_v45 = vadd.bf16 0, %v1779_v59 }
 0x282   :  { %3760 = vpow2.f32 %v3306_v44  ;;  %v1794_v37 = vmul.bf16 %v5262_v32, %v6123_v1  ;;  %v1795_v52 = vmul.bf16 %v5266_v56, %v6123_v1  ;;  %v1788_v39 = vadd.bf16 0, %v1780_v10 }
 0x283   :  { %3762 = vpow2.f32 %v3307_v7  ;;  %v1789_v22 = vadd.bf16 0, %v1781_v49  ;;  %v1792_v3 = vmul.bf16 %v5236_v20, %v6123_v1  ;;  %v1797_v23 = vmul.bf16 %v5286_v14, %v6123_v1 }
 0x284   :  { %v1786_v38 = vadd.bf16 0, %v1778_v33  ;;  %v1796_v15 = vmul.bf16 %v5268_v30, %v6123_v1  ;;  %v1798_v24 = vadd.bf16 %v1790_v11, %v1782_v28  ;;  %v1799_v55 = vadd.bf16 %v1791_v29, %v1783_v31 }
 0x285   :  { %v1800_v26 = vadd.bf16 %v1792_v3, %v1784_v42  ;;  %v1801_v13 = vadd.bf16 %v1793_v53, %v1785_v62  ;;  %v1803_v25 = vadd.bf16 %v1795_v52, %v1787_v45  ;;  %v1806_v60 = vmul.bf16 %v5238_v43, %v6124_v0 }
 0x286   :  { %v3749_v2 = vpop.eup %3748  ;;  %v1802_v27 = vadd.bf16 %v1794_v37, %v1786_v38  ;;  %v1804_v46 = vadd.bf16 %v1796_v15, %v1788_v39  ;;  %v1805_v63 = vadd.bf16 %v1797_v23, %v1789_v22  ;;  %v1807_v61 = vmul.bf16 %v5236_v20, %v6124_v0  ;;  %v5328_v39 = vld [vmem:[#allocation2 + $0x4] sm:$0x1]  ;;  %v5334_v15 = vld [vmem:[#allocation2 + $0xc] sm:$0x1] }
 0x287   :  { %v3751_v4 = vpop.eup %3750  ;;  %v1604_v21 = vadd.f32 1.0, %v3749_v2  ;;  %v1808_v33 = vmul.bf16 %v5258_v18, %v6124_v0  ;;  %v1809_v59 = vmul.bf16 %v5262_v32, %v6124_v0  ;;  %v1810_v10 = vmul.bf16 %v5266_v56, %v6124_v0  ;;  %6126 = vst [vmem:[#allocation43_spill] sm:$0xff] %v5328_v39  ;;  %6127 = vst [vmem:[#allocation59_spill] sm:$0xff] %v5334_v15 }
 0x288   :  { %v3753_v48 = vpop.eup %3752  ;;  %v1605_v16 = vadd.f32 1.0, %v3751_v4  ;;  %v1811_v31 = vmul.bf16 %v5268_v30, %v6124_v0  ;;  %v1812_v42 = vmul.bf16 %v5286_v14, %v6124_v0  ;;  %v1813_v11 = vmul.bf16 %v5306_v57, %v6124_v0  ;;  %v6128_v4 = vld [vmem:[#allocation31_spill] sm:$0xff]  ;;  %v5346_v0 = vld [vmem:[#allocation2 + $0x24] sm:$0x1] }
 0x289   :  { %v3755_v44 = vpop.eup %3754  ;;  %v1606_v7 = vadd.f32 1.0, %v3753_v48  ;;  %3764 = vrcp.f32 %v1604_v21  ;;  %v5322_v29 = vadd.bf16 %v1806_v60, %v1798_v24  ;;  %v5324_v37 = vadd.bf16 %v1807_v61, %v1799_v55  ;;  %v5340_v55 = vld [vmem:[#allocation2 + $0x14] sm:$0x1] }
 0x28a   :  { %v3757_v49 = vpop.eup %3756  ;;  %v1607_v28 = vadd.f32 1.0, %v3755_v44  ;;  %3766 = vrcp.f32 %v1605_v16  ;;  %v5326_v52 = vadd.bf16 %v1808_v33, %v1800_v26  ;;  %v5330_v23 = vadd.bf16 %v1809_v59, %v1801_v13  ;;  %v5342_v26 = vld [vmem:[#allocation2 + $0x1c] sm:$0x1]  ;;  %v5360_v16 = vld [vmem:[#allocation2 + $0x2c] sm:$0x1] }
 0x28b   :  { %v3759_v62 = vpop.eup %3758  ;;  %v1608_v1 = vadd.f32 1.0, %v3757_v49  ;;  %3768 = vrcp.f32 %v1606_v7  ;;  %v5332_v38 = vadd.bf16 %v1810_v10, %v1802_v27  ;;  %v5336_v2 = vadd.bf16 %v1811_v31, %v1803_v25  ;;  %v5370_v33 = vld [vmem:[#allocation2 + $0x34] sm:$0x1] }
 0x28c   :  { %v3761_v53 = vpop.eup %3760  ;;  %v1609_v45 = vadd.f32 1.0, %v3759_v62  ;;  %3770 = vrcp.f32 %v1607_v28  ;;  %v5338_v24 = vadd.bf16 %v1812_v42, %v1804_v46  ;;  %v1832_v21 = vmul.bf16 %v6128_v4, %v5256_v8  ;;  %6131 = vst [vmem:[#allocation40_spill] sm:$0xff] %v5370_v33 }
 0x28d   :  { %v3763_v22 = vpop.eup %3762  ;;  %v1610_v3 = vadd.f32 1.0, %v3761_v53  ;;  %3772 = vrcp.f32 %v1608_v1  ;;  %v1833_v13 = vmul.bf16 %v6128_v4, %v5328_v39  ;;  %v1834_v27 = vmul.bf16 %v6128_v4, %v5246_v17 }
 0x28e   :  { %3774 = vrcp.f32 %v1609_v45  ;;  %v1836_v25 = vmul.bf16 %v6128_v4, %v5238_v43  ;;  %v5354_v60 = vadd.f32 1.0, %v3763_v22  ;;  %v5356_v48 = vadd.bf16 %v1813_v11, %v1805_v63 }
 0x28f   :  { %3776 = vrcp.f32 %v1610_v3  ;;  %v1835_v8 = vmul.bf16 %v6128_v4, %v5334_v15  ;;  %v1837_v46 = vmul.bf16 %v6128_v4, %v5340_v55  ;;  %v1838_v61 = vmul.bf16 %v6128_v4, %v5236_v20 }
 0x290   :  { %6129 = vst [vmem:[#allocation61_spill] sm:$0xff] %v5354_v60  ;;  %6130 = vst [vmem:[#allocation60_spill] sm:$0xff] %v5356_v48  ;;  %v1839_v44 = vmul.bf16 %v6128_v4, %v5342_v26  ;;  %v1840_v7 = vmul.bf16 %v6128_v4, %v5258_v18  ;;  %v1841_v63 = vmul.bf16 %v6128_v4, %v5346_v0  ;;  %v1849_v10 = vshrl.u32 %v1832_v21, 16 }
 0x291   :  { %v1842_v59 = vmul.bf16 %v6128_v4, %v5262_v32  ;;  %v1852_v49 = vshll.u32 %v1832_v21, 16  ;;  %v1858_v28 = vshll.u32 %v1833_v13, 16  ;;  %v1863_v31 = vshrl.u32 %v1834_v27, 16 }
 0x292   :  { %v1866_v42 = vshll.u32 %v1834_v27, 16  ;;  %v1877_v62 = vshrl.u32 %v1836_v25, 16  ;;  %v1843_v11 = vmul.bf16 %v6128_v4, %v5360_v16  ;;  %v5380_v53 = vmul.bf16 %v6128_v4, %v5266_v56 }
 0x293   :  { %v3765_v1 = vpop.eup %3764  ;;  %v1851_v45 = vrot.slane %v1849_v10, 4  ;;  %v1854_v22 = vrot.slane %v1852_v49, 5  ;;  %v1845_v21 = vmul.bf16 %v6128_v4, %v5370_v33  ;;  %v1865_v13 = vrot.slane %v1863_v31, 4 }
 0x294   :  { %v3767_v3 = vpop.eup %3766  ;;  %v1868_v58 = vrot.slane %v1866_v42, 5  ;;  %v1872_v27 = vshll.u32 %v1835_v8, 16  ;;  %v1846_v51 = vmul.bf16 %v6128_v4, %v5268_v30  ;;  %v1879_v60 = vrot.slane %v1877_v62, 4 }
 0x295   :  { %v5386_v34 = vpop.eup %3768  ;;  %v1855_v40 = vor.u32 %v1854_v22, %v1851_v45  ;;  %v1880_v47 = vshll.u32 %v1836_v25, 16  ;;  %v1860_v10 = vrot.slane %v1858_v28, 5  ;;  %v1886_v41 = vshll.u32 %v1837_v46, 16 }
 0x296   :  { %6133 = vst [vmem:[#allocation48_spill] sm:$0xff] %v5386_v34  ;;  %v5390_v50 = vpop.eup %3770  ;;  %v1869_v49 = vor.u32 %v1868_v58, %v1865_v13  ;;  %v1891_v19 = vshrl.u32 %v1838_v61, 16  ;;  %v1847_v31 = vmul.bf16 %v6128_v4, %v5382_v36  ;;  %v1894_v34 = vshll.u32 %v1838_v61, 16 }
 0x297   :  { %6134 = vst [vmem:[#allocation47_spill] sm:$0xff] %v5390_v50  ;;  %v5392_v39 = vpop.eup %3772  ;;  %v1856_v8 = vrot.slane %v1855_v40, 4  ;;  %v1882_v42 = vrot.slane %v1880_v47, 5  ;;  %v5399_v45 = vmul.f32 %v3765_v1, %v5230_v5  ;;  %v1874_v62 = vrot.slane %v1872_v27, 5 }
 0x298   :  { %6135 = vst [vmem:[#allocation44_spill] sm:$0xff] %v5392_v39  ;;  %v5396_v6 = vpop.eup %3774  ;;  %v1870_v25 = vrot.slane %v1869_v49, 4  ;;  %v1893_v22 = vrot.slane %v1891_v19, 4  ;;  %v5404_v58 = vmul.f32 %v3767_v3, %v5232_v9  ;;  %v1888_v13 = vrot.slane %v1886_v41, 5 }
 0x299   :  { %6136 = vst [vmem:[#allocation57_spill] sm:$0xff] %v5396_v6  ;;  %6137 = vst [vmem:[#allocation62_spill] sm:$0xff] %v5399_v45  ;;  %v5401_v28 = vpop.eup %3776  ;;  %v1883_v46 = vor.u32 %v1882_v42, %v1879_v60  ;;  %v1896_v39 = vrot.slane %v1894_v34, 5  ;;  %v5408_v47 = vsel %vm4460_vm3, %v1856_v8, %v1860_v10  ;;  %v1900_v5 = vshll.u32 %v1839_v44, 16 }
 0x29a   :  { %6138 = vst [vmem:[#allocation50_spill] sm:$0xff] %v5401_v28  ;;  %6139 = vst [vmem:[#allocation49_spill] sm:$0xff] %v5404_v58  ;;  %v5412_v40 = vsel %vm4460_vm3, %v1870_v25, %v1874_v62  ;;  %v1905_v4 = vshrl.u32 %v1840_v7, 16  ;;  %v1908_v1 = vshll.u32 %v1840_v7, 16  ;;  %v1914_v27 = vshll.u32 %v1841_v63, 16 }
 0x29b   :  { %v1884_v61 = vrot.slane %v1883_v46, 4  ;;  %v1897_v19 = vor.u32 %v1896_v39, %v1893_v22  ;;  %v1902_v49 = vrot.slane %v1900_v5, 5  ;;  %v1919_v3 = vshrl.u32 %v1842_v59, 16 }
 0x29c   :  { %v1907_v9 = vrot.slane %v1905_v4, 4  ;;  %v1922_v60 = vshll.u32 %v1842_v59, 16  ;;  %v1910_v10 = vrot.slane %v1908_v1, 5  ;;  %v1916_v8 = vrot.slane %v1914_v27, 5 }
 0x29d   :  { %v5416_v41 = vsel %vm4460_vm3, %v1884_v61, %v1888_v13  ;;  %v1898_v34 = vrot.slane %v1897_v19, 4  ;;  %v1921_v42 = vrot.slane %v1919_v3, 4  ;;  %v1928_v62 = vshll.u32 %v1843_v11, 16 }
 0x29e   :  { %v1924_v25 = vrot.slane %v1922_v60, 5  ;;  %v1933_v44 = vshrl.u32 %v5380_v53, 16  ;;  %v1911_v7 = vor.u32 %v1910_v10, %v1907_v9  ;;  %v1936_v63 = vshll.u32 %v5380_v53, 16 }
 0x29f   :  { %v5421_v39 = vsel %vm4460_vm3, %v1898_v34, %v1902_v49  ;;  %v1942_v59 = vshll.u32 %v1845_v21, 16  ;;  %v1930_v46 = vrot.slane %v1928_v62, 5  ;;  %v1947_v5 = vshrl.u32 %v1846_v51, 16 }
 0x2a0   :  { %v1925_v22 = vor.u32 %v1924_v25, %v1921_v42  ;;  %v1935_v13 = vrot.slane %v1933_v44, 4  ;;  %v1912_v4 = vrot.slane %v1911_v7, 4  ;;  %v1938_v61 = vrot.slane %v1936_v63, 5 }
 0x2a1   :  { %v1944_v19 = vrot.slane %v1942_v59, 5  ;;  %v1950_v1 = vshll.u32 %v1846_v51, 16  ;;  %v1949_v11 = vrot.slane %v1947_v5, 4  ;;  %v1956_v3 = vshll.u32 %v1847_v31, 16  ;;  %v5460_v5 = vld [vmem:[#allocation2 + $0x44] sm:$0x1] }
 0x2a2   :  { %v1926_v27 = vrot.slane %v1925_v22, 4  ;;  %v5428_v49 = vsel %vm4460_vm3, %v1912_v4, %v1916_v8  ;;  %v1939_v53 = vor.u32 %v1938_v61, %v1935_v13  ;;  %v1976_v44 = vmul.bf16 %v4431_v12, %v5246_v17  ;;  %6140 = vst [vmem:[#allocation58_spill] sm:$0xff] %v5460_v5 }
 0x2a3   :  { %v1952_v21 = vrot.slane %v1950_v1, 5  ;;  %v1958_v51 = vrot.slane %v1956_v3, 5  ;;  %v1977_v7 = vmul.bf16 %v4431_v12, %v5334_v15  ;;  %v1978_v63 = vmul.bf16 %v4431_v12, %v5238_v43 }
 0x2a4   :  { %v5434_v34 = vsel %vm4460_vm3, %v1926_v27, %v1930_v46  ;;  %v1940_v42 = vrot.slane %v1939_v53, 4  ;;  %v1979_v59 = vmul.bf16 %v4431_v12, %v5340_v55  ;;  %v1980_v13 = vmul.bf16 %v4431_v12, %v5236_v20 }
 0x2a5   :  { %v1953_v25 = vor.u32 %v1952_v21, %v1949_v11  ;;  %v1981_v17 = vmul.bf16 %v4431_v12, %v5342_v26  ;;  %v1982_v61 = vmul.bf16 %v4431_v12, %v5258_v18  ;;  %v1983_v1 = vmul.bf16 %v4431_v12, %v5346_v0 }
 0x2a6   :  { %v5454_v22 = vsel %vm4460_vm3, %v1940_v42, %v1944_v19  ;;  %v1984_v19 = vmul.bf16 %v4431_v12, %v5262_v32  ;;  %v1985_v11 = vmul.bf16 %v4431_v12, %v5360_v16  ;;  %v1986_v3 = vmul.bf16 %v4431_v12, %v5266_v56 }
 0x2a7   :  { %v1954_v46 = vrot.slane %v1953_v25, 4  ;;  %v1987_v53 = vmul.bf16 %v4431_v12, %v5370_v33  ;;  %v1988_v42 = vmul.bf16 %v4431_v12, %v5268_v30  ;;  %v1989_v25 = vmul.bf16 %v4431_v12, %v5382_v36 }
 0x2a8   :  { %v1993_v4 = vshrl.u32 %v1976_v44, 16  ;;  %v1996_v62 = vshll.u32 %v1976_v44, 16  ;;  %v2002_v8 = vshll.u32 %v1977_v7, 16  ;;  %v2007_v10 = vshrl.u32 %v1978_v63, 16 }
 0x2a9   :  { %v5472_v27 = vsel %vm4460_vm3, %v1954_v46, %v1958_v51  ;;  %v5488_v51 = vmul.bf16 %v4431_v12, %v5286_v14  ;;  %v1991_v46 = vmul.bf16 %v4431_v12, %v5460_v5  ;;  %v2010_v31 = vshll.u32 %v1978_v63, 16 }
 0x2aa   :  { %6141 = vst [vmem:[#allocation54_spill] sm:$0xff] %v5472_v27  ;;  %v2016_v9 = vshll.u32 %v1979_v59, 16  ;;  %v2021_v21 = vshrl.u32 %v1980_v13, 16  ;;  %v1995_v60 = vrot.slane %v1993_v4, 4  ;;  %v1998_v28 = vrot.slane %v1996_v62, 5 }
 0x2ab   :  { %v2004_v6 = vrot.slane %v2002_v8, 5  ;;  %v2024_v50 = vshll.u32 %v1980_v13, 16  ;;  %v2009_v58 = vrot.slane %v2007_v10, 4  ;;  %v2012_v45 = vrot.slane %v2010_v31, 5 }
 0x2ac   :  { %v2018_v15 = vrot.slane %v2016_v9, 5  ;;  %v2023_v57 = vrot.slane %v2021_v21, 4  ;;  %v1999_v14 = vor.u32 %v1998_v28, %v1995_v60  ;;  %v2030_v27 = vshll.u32 %v1981_v17, 16 }
 0x2ad   :  { %v2026_v48 = vrot.slane %v2024_v50, 5  ;;  %v2035_v36 = vshrl.u32 %v1982_v61, 16  ;;  %v2013_v12 = vor.u32 %v2012_v45, %v2009_v58  ;;  %v2038_v5 = vshll.u32 %v1982_v61, 16 }
 0x2ae   :  { %v2044_v44 = vshll.u32 %v1983_v1, 16  ;;  %v2049_v7 = vshrl.u32 %v1984_v19, 16  ;;  %v2000_v30 = vrot.slane %v1999_v14, 4  ;;  %v2032_v59 = vrot.slane %v2030_v27, 5 }
 0x2af   :  { %v2027_v63 = vor.u32 %v2026_v48, %v2023_v57  ;;  %v2037_v33 = vrot.slane %v2035_v36, 4  ;;  %v2014_v4 = vrot.slane %v2013_v12, 4  ;;  %v2040_v62 = vrot.slane %v2038_v5, 5 }
 0x2b0   :  { %v2046_v8 = vrot.slane %v2044_v44, 5  ;;  %v2051_v13 = vrot.slane %v2049_v7, 4  ;;  %v2005_v9 = vsel %vm4460_vm3, %v2000_v30, %v2004_v6  ;;  %v2052_v28 = vshll.u32 %v1984_v19, 16 }
 0x2b1   :  { %v2028_v31 = vrot.slane %v2027_v63, 4  ;;  %v2058_v50 = vshll.u32 %v1985_v11, 16  ;;  %v2019_v45 = vsel %vm4460_vm3, %v2014_v4, %v2018_v15  ;;  %v2041_v58 = vor.u32 %v2040_v62, %v2037_v33 }
 0x2b2   :  { %v2063_v60 = vshrl.u32 %v1986_v3, 16  ;;  %v2066_v10 = vshll.u32 %v1986_v3, 16  ;;  %v2054_v36 = vrot.slane %v2052_v28, 5  ;;  %v2072_v48 = vshll.u32 %v1987_v53, 16 }
 0x2b3   :  { %v2033_v14 = vsel %vm4460_vm3, %v2028_v31, %v2032_v59  ;;  %v2060_v57 = vrot.slane %v2058_v50, 5  ;;  %v2042_v17 = vrot.slane %v2041_v58, 4  ;;  %v2077_v1 = vshrl.u32 %v1988_v42, 16 }
 0x2b4   :  { %v2065_v5 = vrot.slane %v2063_v60, 4  ;;  %v2068_v61 = vrot.slane %v2066_v10, 5  ;;  %v2055_v6 = vor.u32 %v2054_v36, %v2051_v13  ;;  %v2074_v30 = vrot.slane %v2072_v48, 5  ;;  %v6149_v48 = vld [vmem:[#allocation40_spill] sm:$0xff] }
 0x2b5   :  { %v2080_v19 = vshll.u32 %v1988_v42, 16  ;;  %v2086_v27 = vshll.u32 %v1989_v25, 16  ;;  %v2047_v15 = vsel %vm4460_vm3, %v2042_v17, %v2046_v8  ;;  %v2079_v11 = vrot.slane %v2077_v1, 4  ;;  %v6152_v1 = vld [vmem:[#allocation54_spill] sm:$0xff] }
 0x2b6   :  { %v2069_v33 = vor.u32 %v2068_v61, %v2065_v5  ;;  %v2091_v3 = vshrl.u32 %v5488_v51, 16  ;;  %v2056_v21 = vrot.slane %v2055_v6, 4  ;;  %v2094_v53 = vshll.u32 %v5488_v51, 16  ;;  %v6150_v5 = vld [vmem:[#allocation41_spill] sm:$0xff] }
 0x2b7   :  { %v2082_v12 = vrot.slane %v2080_v19, 5  ;;  %v2088_v44 = vrot.slane %v2086_v27, 5  ;;  %v2100_v59 = vshll.u32 %v1991_v46, 16  ;;  %v6142_v4 = vadd.bf16 %v5408_v47, %v5322_v29  ;;  %v6155_v19 = vld [vmem:[#allocation42_spill] sm:$0xff] }
 0x2b8   :  { %v2070_v7 = vrot.slane %v2069_v33, 4  ;;  %v2093_v63 = vrot.slane %v2091_v3, 4  ;;  %v2061_v25 = vsel %vm4460_vm3, %v2056_v21, %v2060_v57  ;;  %v2096_v8 = vrot.slane %v2094_v53, 5  ;;  %v6156_v27 = vld [vmem:[#allocation58_spill] sm:$0xff]  ;;  %v6157_v33 = vld [vmem:[#allocation51_spill] sm:$0xff] }
 0x2b9   :  { %v5505_v42 = vadd.bf16 %v2005_v9, %v6142_v4  ;;  %v2083_v62 = vor.u32 %v2082_v12, %v2079_v11  ;;  %v6143_v13 = vadd.bf16 %v5412_v40, %v5324_v37  ;;  %v2102_v28 = vrot.slane %v2100_v59, 5 }
 0x2ba   :  { %v2075_v51 = vsel %vm4460_vm3, %v2070_v7, %v2074_v30  ;;  %v6144_v46 = vadd.bf16 %v5416_v41, %v5326_v52  ;;  %v6145_v47 = vadd.bf16 %v5421_v39, %v5330_v23  ;;  %v2097_v58 = vor.u32 %v2096_v8, %v2093_v63 }
 0x2bb   :  { %v5512_v31 = vadd.bf16 %v2019_v45, %v6143_v13  ;;  %v2084_v50 = vrot.slane %v2083_v62, 4  ;;  %v6146_v37 = vadd.bf16 %v5428_v49, %v5332_v38  ;;  %v6147_v45 = vadd.bf16 %v5434_v34, %v5336_v2 }
 0x2bc   :  { %v5519_v29 = vadd.bf16 %v2033_v14, %v6144_v46  ;;  %v5524_v9 = vadd.bf16 %v2047_v15, %v6145_v47  ;;  %v2120_v52 = vmul.bf16 %v6073_v35, %v5238_v43  ;;  %v2121_v23 = vmul.bf16 %v6073_v35, %v5340_v55  ;;  %v5550_v43 = vld [vmem:[#allocation2 + $0x4c] sm:$0x1] }
 0x2bd   :  { %v5529_v40 = vadd.bf16 %v2061_v25, %v6146_v37  ;;  %v5534_v60 = vadd.bf16 %v2075_v51, %v6147_v45  ;;  %v2122_v41 = vmul.bf16 %v6073_v35, %v5236_v20  ;;  %v2123_v39 = vmul.bf16 %v6073_v35, %v5342_v26 }
 0x2be   :  { %v2089_v38 = vsel %vm4460_vm3, %v2084_v50, %v2088_v44  ;;  %v2098_v49 = vrot.slane %v2097_v58, 4  ;;  %v2124_v2 = vmul.bf16 %v6073_v35, %v5258_v18  ;;  %v2125_v34 = vmul.bf16 %v6073_v35, %v5346_v0 }
 0x2bf   :  { %v6148_v10 = vadd.bf16 %v5454_v22, %v5338_v24  ;;  %v2126_v20 = vmul.bf16 %v6073_v35, %v5262_v32  ;;  %v2127_v36 = vmul.bf16 %v6073_v35, %v5360_v16  ;;  %v2128_v57 = vmul.bf16 %v6073_v35, %v5266_v56  ;;  %v6151_v22 = vld [vmem:[#allocation32_spill] sm:$0xff] }
 0x2c0   :  { %v2103_v18 = vsel %vm4460_vm3, %v2098_v49, %v2102_v28  ;;  %v2129_v17 = vmul.bf16 %v6073_v35, %v6149_v48  ;;  %v2130_v24 = vmul.bf16 %v6073_v35, %v6150_v5  ;;  %v2131_v61 = vmul.bf16 %v6073_v35, %v6151_v22  ;;  %v6153_v32 = vld [vmem:[#allocation60_spill] sm:$0xff] }
 0x2c1   :  { %v5555_v14 = vadd.bf16 %v2089_v38, %v6148_v10  ;;  %v6154_v6 = vadd.bf16 %v6152_v1, %v6153_v32  ;;  %v2132_v56 = vmul.bf16 %v6073_v35, %v6155_v19  ;;  %v2133_v15 = vmul.bf16 %v6073_v35, %v6156_v27 }
 0x2c2   :  { %v5582_v11 = vmul.bf16 %v6073_v35, %v6157_v33  ;;  %v2135_v3 = vmul.bf16 %v6073_v35, %v5550_v43  ;;  %v2137_v21 = vshrl.u32 %v2120_v52, 16  ;;  %v2140_v12 = vshll.u32 %v2120_v52, 16 }
 0x2c3   :  { %v5574_v30 = vadd.bf16 %v2103_v18, %v6154_v6  ;;  %v2146_v44 = vshll.u32 %v2121_v23, 16  ;;  %v2151_v53 = vshrl.u32 %v2122_v41, 16  ;;  %v2154_v7 = vshll.u32 %v2122_v41, 16 }
 0x2c4   :  { %v2160_v63 = vshll.u32 %v2123_v39, 16  ;;  %v2165_v59 = vshrl.u32 %v2124_v2, 16  ;;  %v2139_v4 = vrot.slane %v2137_v21, 4  ;;  %v2142_v25 = vrot.slane %v2140_v12, 5 }
 0x2c5   :  { %v2148_v62 = vrot.slane %v2146_v44, 5  ;;  %v2168_v8 = vshll.u32 %v2124_v2, 16  ;;  %v2153_v13 = vrot.slane %v2151_v53, 4  ;;  %v2156_v51 = vrot.slane %v2154_v7, 5 }
 0x2c6   :  { %v2162_v28 = vrot.slane %v2160_v63, 5  ;;  %v2167_v46 = vrot.slane %v2165_v59, 4  ;;  %v2143_v47 = vor.u32 %v2142_v25, %v2139_v4  ;;  %v2174_v58 = vshll.u32 %v2125_v34, 16 }
 0x2c7   :  { %v2170_v50 = vrot.slane %v2168_v8, 5  ;;  %v2179_v37 = vshrl.u32 %v2126_v20, 16  ;;  %v2157_v35 = vor.u32 %v2156_v51, %v2153_v13  ;;  %v2182_v45 = vshll.u32 %v2126_v20, 16 }
 0x2c8   :  { %v2188_v52 = vshll.u32 %v2127_v36, 16  ;;  %v2193_v23 = vshrl.u32 %v2128_v57, 16  ;;  %v2144_v38 = vrot.slane %v2143_v47, 4  ;;  %v2176_v39 = vrot.slane %v2174_v58, 5 }
 0x2c9   :  { %v2171_v41 = vor.u32 %v2170_v50, %v2167_v46  ;;  %v2181_v49 = vrot.slane %v2179_v37, 4  ;;  %v2158_v10 = vrot.slane %v2157_v35, 4  ;;  %v2184_v18 = vrot.slane %v2182_v45, 5 }
 0x2ca   :  { %v2190_v5 = vrot.slane %v2188_v52, 5  ;;  %v2195_v2 = vrot.slane %v2193_v23, 4  ;;  %v5588_v1 = vsel %vm4460_vm3, %v2144_v38, %v2148_v62  ;;  %v2196_v6 = vshll.u32 %v2128_v57, 16  ;;  %v2264_v23 = vld [vmem:[#allocation2] sm:$0xe] }
 0x2cb   :  { %v2172_v32 = vrot.slane %v2171_v41, 4  ;;  %v2202_v34 = vshll.u32 %v2129_v17, 16  ;;  %v5592_v20 = vsel %vm4460_vm3, %v2158_v10, %v2162_v28  ;;  %v2185_v36 = vor.u32 %v2184_v18, %v2181_v49  ;;  %v5612_v38 = vld [vmem:[#allocation2 + $0x8] sm:$0xe]  ;;  %v5622_v49 = vld [vmem:[#allocation2 + $0x10] sm:$0xe] }
 0x2cc   :  { %v2207_v19 = vshrl.u32 %v2130_v24, 16  ;;  %v2210_v33 = vshll.u32 %v2130_v24, 16  ;;  %v2198_v12 = vrot.slane %v2196_v6, 5  ;;  %v2216_v53 = vshll.u32 %v2131_v61, 16  ;;  %v5630_v6 = vld [vmem:[#allocation2 + $0x20] sm:$0xe] }
 0x2cd   :  { %v5596_v21 = vsel %vm4460_vm3, %v2172_v32, %v2176_v39  ;;  %v2204_v44 = vrot.slane %v2202_v34, 5  ;;  %v2186_v7 = vrot.slane %v2185_v36, 4  ;;  %v2221_v4 = vshrl.u32 %v2132_v56, 16  ;;  %v5628_v32 = vld [vmem:[#allocation2 + $0x18] sm:$0xe] }
 0x2ce   :  { %v2209_v63 = vrot.slane %v2207_v19, 4  ;;  %v2212_v59 = vrot.slane %v2210_v33, 5  ;;  %v2199_v57 = vor.u32 %v2198_v12, %v2195_v2  ;;  %v2218_v17 = vrot.slane %v2216_v53, 5  ;;  %v5632_v34 = vld [vmem:[#allocation2 + $0x28] sm:$0xe]  ;;  %v6159_v19 = vld [vmem:[#allocation43_spill] sm:$0xff] }
 0x2cf   :  { %v2224_v25 = vshll.u32 %v2132_v56, 16  ;;  %v2230_v62 = vshll.u32 %v2133_v15, 16  ;;  %v5600_v8 = vsel %vm4460_vm3, %v2186_v7, %v2190_v5  ;;  %v2223_v13 = vrot.slane %v2221_v4, 4  ;;  %v5645_v53 = vld [vmem:[#allocation2 + $0x38] sm:$0xe] }
 0x2d0   :  { %v2213_v24 = vor.u32 %v2212_v59, %v2209_v63  ;;  %v2235_v51 = vshrl.u32 %v5582_v11, 16  ;;  %v2200_v28 = vrot.slane %v2199_v57, 4  ;;  %v2238_v61 = vshll.u32 %v5582_v11, 16 }
 0x2d1   :  { %v2226_v46 = vrot.slane %v2224_v25, 5  ;;  %v2232_v47 = vrot.slane %v2230_v62, 5  ;;  %v2244_v37 = vshll.u32 %v2135_v3, 16  ;;  %v2256_v56 = vadd.bf16 %v5588_v1, %v5505_v42  ;;  %v6162_v42 = vld [vmem:[#allocation38_spill] sm:$0xff] }
 0x2d2   :  { %v2214_v50 = vrot.slane %v2213_v24, 4  ;;  %v2237_v58 = vrot.slane %v2235_v51, 4  ;;  %v5608_v15 = vsel %vm4460_vm3, %v2200_v28, %v2204_v44  ;;  %v2240_v45 = vrot.slane %v2238_v61, 5  ;;  %v5643_v44 = vld [vmem:[#allocation2 + $0x30] sm:$0xe] }
 0x2d3   :  { %v2227_v35 = vor.u32 %v2226_v46, %v2223_v13  ;;  %v2257_v52 = vadd.bf16 %v5592_v20, %v5512_v31  ;;  %v2246_v3 = vrot.slane %v2244_v37, 5  ;;  %v2258_v41 = vadd.bf16 %v5596_v21, %v5519_v29  ;;  %v6158_v29 = vld [vmem:[#allocation37_spill] sm:$0xff]  ;;  %v6160_v21 = vld [vmem:[#allocation59_spill] sm:$0xff] }
 0x2d4   :  { %v5616_v11 = vsel %vm4460_vm3, %v2214_v50, %v2218_v17  ;;  %v2259_v39 = vadd.bf16 %v5600_v8, %v5524_v9  ;;  %v2241_v18 = vor.u32 %v2240_v45, %v2237_v58  ;;  %v2260_v5 = vadd.bf16 %v5608_v15, %v5529_v40 }
 0x2d5   :  { %v2228_v10 = vrot.slane %v2227_v35, 4  ;;  %v2261_v2 = vadd.bf16 %v5616_v11, %v5534_v60  ;;  %v2274_v36 = vmul.bf16 %v6158_v29, %v2264_v23  ;;  %v2275_v9 = vmul.bf16 %v6158_v29, %v6159_v19 }
 0x2d6   :  { %v2276_v33 = vmul.bf16 %v6158_v29, %v5612_v38  ;;  %v2277_v40 = vmul.bf16 %v6158_v29, %v6160_v21  ;;  %v2242_v12 = vrot.slane %v2241_v18, 4  ;;  %v2278_v7 = vmul.bf16 %v6158_v29, %v5622_v49 }
 0x2d7   :  { %v2233_v60 = vsel %vm4460_vm3, %v2228_v10, %v2232_v47  ;;  %v2279_v63 = vmul.bf16 %v6158_v29, %v5340_v55  ;;  %v2280_v4 = vmul.bf16 %v6158_v29, %v5628_v32  ;;  %v2281_v57 = vmul.bf16 %v6158_v29, %v5342_v26 }
 0x2d8   :  { %v2262_v59 = vadd.bf16 %v2233_v60, %v5555_v14  ;;  %v2282_v17 = vmul.bf16 %v6158_v29, %v5630_v6  ;;  %v2247_v25 = vsel %vm4460_vm3, %v2242_v12, %v2246_v3  ;;  %v2283_v62 = vmul.bf16 %v6158_v29, %v5346_v0 }
 0x2d9   :  { %v2284_v8 = vmul.bf16 %v6158_v29, %v5632_v34  ;;  %v2285_v14 = vmul.bf16 %v6158_v29, %v5360_v16  ;;  %v2263_v24 = vadd.bf16 %v2247_v25, %v5574_v30  ;;  %v2286_v13 = vmul.bf16 %v6158_v29, %v5643_v44  ;;  %v6164_v30 = vld [vmem:[#allocation36_spill] sm:$0xff] }
 0x2da   :  { %v2287_v51 = vmul.bf16 %v6158_v29, %v6149_v48  ;;  %v2288_v54 = vmul.bf16 %v6158_v29, %v5645_v53  ;;  %v2289_v28 = vmul.bf16 %v6158_v29, %v6151_v22  ;;  %v3308_v46 = vrot.slane %v2274_v36, 9 }
 0x2db   :  { %v2308_v47 = vrot.slane %v2275_v9, 5  ;;  %v3309_v61 = vrot.slane %v2276_v33, 9  ;;  %v2312_v50 = vrot.slane %v2277_v40, 5  ;;  %v3310_v58 = vrot.slane %v2278_v7, 9 }
 0x2dc   :  { %v2316_v37 = vrot.slane %v2279_v63, 5  ;;  %v3311_v15 = vrot.slane %v2280_v4, 9  ;;  %v2320_v45 = vrot.slane %v2281_v57, 5  ;;  %v3312_v23 = vrot.slane %v2282_v17, 9 }
 0x2dd   :  { %v2309_v35 = vsel %vm5088_vm12, %v3308_v46, %v2308_v47  ;;  %v2324_v11 = vrot.slane %v2283_v62, 5  ;;  %v2313_v3 = vsel %vm5088_vm12, %v3309_v61, %v2312_v50  ;;  %v3313_v18 = vrot.slane %v2284_v8, 9 }
 0x2de   :  { %v2317_v10 = vsel %vm5088_vm12, %v3310_v58, %v2316_v37  ;;  %v2328_v29 = vrot.slane %v2285_v14, 5  ;;  %v2321_v36 = vsel %vm5088_vm12, %v3311_v15, %v2320_v45  ;;  %v3314_v9 = vrot.slane %v2286_v13, 9  ;;  %v5697_v13 = vld [vmem:[#allocation2 + $0x40] sm:$0xe] }
 0x2df   :  { %v2325_v19 = vsel %vm5088_vm12, %v3312_v23, %v2324_v11  ;;  %v2332_v33 = vrot.slane %v2287_v51, 5  ;;  %v3315_v60 = vrot.slane %v2288_v54, 9  ;;  %v2336_v12 = vrot.slane %v2289_v28, 5 }
 0x2e0   :  { %v2329_v40 = vsel %vm5088_vm12, %v3313_v18, %v2328_v29  ;;  %v2346_v7 = vadd.bf16 %v2309_v35, %v2256_v56  ;;  %v2347_v4 = vadd.bf16 %v2313_v3, %v2257_v52  ;;  %v2348_v57 = vadd.bf16 %v2317_v10, %v2258_v41 }
 0x2e1   :  { %v2333_v63 = vsel %vm5088_vm12, %v3314_v9, %v2332_v33  ;;  %v2349_v17 = vadd.bf16 %v2321_v36, %v2259_v39  ;;  %v2337_v25 = vsel %vm5088_vm12, %v3315_v60, %v2336_v12  ;;  %v2350_v62 = vadd.bf16 %v2325_v19, %v2260_v5 }
 0x2e2   :  { %v2351_v8 = vadd.bf16 %v2329_v40, %v2261_v2  ;;  %v2352_v14 = vadd.bf16 %v2333_v63, %v2262_v59  ;;  %v2353_v51 = vadd.bf16 %v2337_v25, %v2263_v24  ;;  %v2354_v1 = vmul.bf16 %v6162_v42, %v5612_v38 }
 0x2e3   :  { %v2355_v56 = vmul.bf16 %v6162_v42, %v6160_v21  ;;  %v2356_v31 = vmul.bf16 %v6162_v42, %v5622_v49  ;;  %v2357_v20 = vmul.bf16 %v6162_v42, %v5340_v55  ;;  %v2358_v52 = vmul.bf16 %v6162_v42, %v5628_v32 }
 0x2e4   :  { %v2359_v41 = vmul.bf16 %v6162_v42, %v5342_v26  ;;  %v2360_v39 = vmul.bf16 %v6162_v42, %v5630_v6  ;;  %v2361_v38 = vmul.bf16 %v6162_v42, %v5346_v0  ;;  %v2362_v5 = vmul.bf16 %v6162_v42, %v5632_v34 }
 0x2e5   :  { %v2363_v2 = vmul.bf16 %v6162_v42, %v5360_v16  ;;  %v2364_v21 = vmul.bf16 %v6162_v42, %v5643_v44  ;;  %v2365_v59 = vmul.bf16 %v6162_v42, %v6149_v48  ;;  %v2366_v24 = vmul.bf16 %v6162_v42, %v5645_v53 }
 0x2e6   :  { %v2367_v54 = vmul.bf16 %v6162_v42, %v6151_v22  ;;  %v2368_v28 = vmul.bf16 %v6162_v42, %v5697_v13  ;;  %v2369_v46 = vmul.bf16 %v6162_v42, %v6156_v27  ;;  %v3316_v47 = vrot.slane %v2354_v1, 9 }
 0x2e7   :  { %v2388_v61 = vrot.slane %v2355_v56, 5  ;;  %v3317_v50 = vrot.slane %v2356_v31, 9  ;;  %v2392_v58 = vrot.slane %v2357_v20, 5  ;;  %v3318_v37 = vrot.slane %v2358_v52, 9 }
 0x2e8   :  { %v2396_v15 = vrot.slane %v2359_v41, 5  ;;  %v3319_v35 = vrot.slane %v2360_v39, 9  ;;  %v2400_v23 = vrot.slane %v2361_v38, 5  ;;  %v3320_v11 = vrot.slane %v2362_v5, 9  ;;  %v2273_v38 = vld [vmem:[#allocation2 + $0x48] sm:$0xe] }
 0x2e9   :  { %v2389_v45 = vsel %vm5088_vm12, %v3316_v47, %v2388_v61  ;;  %v2404_v3 = vrot.slane %v2363_v2, 5  ;;  %v2393_v10 = vsel %vm5088_vm12, %v3317_v50, %v2392_v58  ;;  %v3321_v29 = vrot.slane %v2364_v21, 9  ;;  %v6163_v2 = vld [vmem:[#allocation39_spill] sm:$0xff] }
 0x2ea   :  { %v2397_v18 = vsel %vm5088_vm12, %v3318_v37, %v2396_v15  ;;  %v2408_v36 = vrot.slane %v2365_v59, 5  ;;  %v2401_v19 = vsel %vm5088_vm12, %v3319_v35, %v2400_v23  ;;  %v3322_v33 = vrot.slane %v2366_v24, 9 }
 0x2eb   :  { %v2405_v9 = vsel %vm5088_vm12, %v3320_v11, %v2404_v3  ;;  %v2412_v40 = vrot.slane %v2367_v54, 5  ;;  %v3323_v12 = vrot.slane %v2368_v28, 9  ;;  %v2416_v63 = vrot.slane %v2369_v46, 5 }
 0x2ec   :  { %v2409_v60 = vsel %vm5088_vm12, %v3321_v29, %v2408_v36  ;;  %v2426_v25 = vadd.bf16 %v2389_v45, %v2346_v7  ;;  %v2427_v1 = vadd.bf16 %v2393_v10, %v2347_v4  ;;  %v2428_v56 = vadd.bf16 %v2397_v18, %v2348_v57 }
 0x2ed   :  { %v2413_v42 = vsel %vm5088_vm12, %v3322_v33, %v2412_v40  ;;  %v2429_v31 = vadd.bf16 %v2401_v19, %v2349_v17  ;;  %v2417_v20 = vsel %vm5088_vm12, %v3323_v12, %v2416_v63  ;;  %v2430_v52 = vadd.bf16 %v2405_v9, %v2350_v62 }
 0x2ee   :  { %v2431_v41 = vadd.bf16 %v2409_v60, %v2351_v8  ;;  %v2432_v39 = vadd.bf16 %v2413_v42, %v2352_v14  ;;  %v2433_v5 = vadd.bf16 %v2417_v20, %v2353_v51  ;;  %v2434_v21 = vmul.bf16 %v6163_v2, %v5622_v49 }
 0x2ef   :  { %v2435_v7 = vmul.bf16 %v6163_v2, %v5340_v55  ;;  %v2436_v59 = vmul.bf16 %v6163_v2, %v5628_v32  ;;  %v2437_v4 = vmul.bf16 %v6163_v2, %v5342_v26  ;;  %v2438_v57 = vmul.bf16 %v6163_v2, %v5630_v6 }
 0x2f0   :  { %v2439_v17 = vmul.bf16 %v6163_v2, %v5346_v0  ;;  %v2440_v62 = vmul.bf16 %v6163_v2, %v5632_v34  ;;  %v2441_v49 = vmul.bf16 %v6163_v2, %v5360_v16  ;;  %v2442_v55 = vmul.bf16 %v6163_v2, %v5643_v44 }
 0x2f1   :  { %v2443_v32 = vmul.bf16 %v6163_v2, %v6149_v48  ;;  %v2444_v26 = vmul.bf16 %v6163_v2, %v5645_v53  ;;  %v2445_v6 = vmul.bf16 %v6163_v2, %v6151_v22  ;;  %v2446_v0 = vmul.bf16 %v6163_v2, %v5697_v13 }
 0x2f2   :  { %v2447_v34 = vmul.bf16 %v6163_v2, %v6156_v27  ;;  %v2448_v16 = vmul.bf16 %v6163_v2, %v2273_v38  ;;  %v2449_v44 = vmul.bf16 %v6163_v2, %v5550_v43  ;;  %v3324_v8 = vrot.slane %v2434_v21, 9  ;;  %v3821_v21 = vld [vmem:[#allocation11] ss:$0 sm:$0xff] }
 0x2f3   :  { %v2468_v14 = vrot.slane %v2435_v7, 5  ;;  %v3325_v48 = vrot.slane %v2436_v59, 9  ;;  %v2472_v51 = vrot.slane %v2437_v4, 5  ;;  %v3326_v24 = vrot.slane %v2438_v57, 9 }
 0x2f4   :  { %v2476_v53 = vrot.slane %v2439_v17, 5  ;;  %v3327_v54 = vrot.slane %v2440_v62, 9  ;;  %v2480_v28 = vrot.slane %v2441_v49, 5  ;;  %v3328_v13 = vrot.slane %v2442_v55, 9  ;;  %v6166_v62 = vld [vmem:[#allocation61_spill] sm:$0xff] }
 0x2f5   :  { %v2469_v22 = vsel %vm5088_vm12, %v3324_v8, %v2468_v14  ;;  %v2484_v46 = vrot.slane %v2443_v32, 5  ;;  %v2473_v27 = vsel %vm5088_vm12, %v3325_v48, %v2472_v51  ;;  %v3329_v43 = vrot.slane %v2444_v26, 9  ;;  %v6167_v32 = vld [vmem:[#allocation62_spill] sm:$0xff]  ;;  %v6168_v26 = vld [vmem:[#allocation49_spill] sm:$0xff] }
 0x2f6   :  { %v2477_v47 = vsel %vm5088_vm12, %v3326_v24, %v2476_v53  ;;  %v2488_v61 = vrot.slane %v2445_v6, 5  ;;  %v2481_v50 = vsel %vm5088_vm12, %v3327_v54, %v2480_v28  ;;  %v3330_v37 = vrot.slane %v2446_v0, 9  ;;  %v6171_v24 = vld [vmem:[#allocation56_spill] sm:$0xff] }
 0x2f7   :  { %v2485_v58 = vsel %vm5088_vm12, %v3328_v13, %v2484_v46  ;;  %v2492_v15 = vrot.slane %v2447_v34, 5  ;;  %v3331_v45 = vrot.slane %v2448_v16, 9  ;;  %v2496_v23 = vrot.slane %v2449_v44, 5  ;;  %v6169_v34 = vld [vmem:[#allocation55_spill] sm:$0xff]  ;;  %v6172_v53 = vld [vmem:[#allocation44_spill] sm:$0xff]  ;;  %v6173_v13 = vld [vmem:[#allocation45_spill] sm:$0xff] }
 0x2f8   :  { %v2489_v35 = vsel %vm5088_vm12, %v3329_v43, %v2488_v61  ;;  %v2506_v11 = vadd.bf16 %v2469_v22, %v2426_v25  ;;  %v2507_v10 = vadd.bf16 %v2473_v27, %v2427_v1  ;;  %v2508_v18 = vadd.bf16 %v2477_v47, %v2428_v56  ;;  %v6170_v16 = vld [vmem:[#allocation47_spill] sm:$0xff]  ;;  %v6174_v46 = vld [vmem:[#allocation57_spill] sm:$0xff] }
 0x2f9   :  { %v2493_v3 = vsel %vm5088_vm12, %v3330_v37, %v2492_v15  ;;  %v2509_v29 = vadd.bf16 %v2481_v50, %v2429_v31  ;;  %v2497_v36 = vsel %vm5088_vm12, %v3331_v45, %v2496_v23  ;;  %v2510_v19 = vadd.bf16 %v2485_v58, %v2430_v52  ;;  %v6165_v31 = vld [vmem:[#allocation48_spill] sm:$0xff]  ;;  %v6176_v45 = vld [vmem:[#allocation50_spill] sm:$0xff] }
 0x2fa   :  { %v2511_v9 = vadd.bf16 %v2489_v35, %v2431_v41  ;;  %v2512_v33 = vadd.bf16 %v2493_v3, %v2432_v39  ;;  %v2513_v40 = vadd.bf16 %v2497_v36, %v2433_v5  ;;  %v2514_v60 = vunpack.c.l.bf16 %v2506_v11  ;;  %v6175_v35 = vld [vmem:[#allocation46_spill] sm:$0xff] }
 0x2fb   :  { %v2515_v12 = vunpack.c.l.bf16 %v2507_v10  ;;  %v2516_v63 = vunpack.c.l.bf16 %v2508_v18  ;;  %v2517_v42 = vunpack.c.l.bf16 %v2509_v29  ;;  %v2518_v20 = vunpack.c.l.bf16 %v2510_v19 }
 0x2fc   :  { %v2519_v38 = vunpack.c.l.bf16 %v2511_v9  ;;  %v2520_v25 = vunpack.c.l.bf16 %v2512_v33  ;;  %v2521_v2 = vunpack.c.l.bf16 %v2513_v40  ;;  %v5794_v7 = vadd.f32 %v3821_v21, %v2514_v60 }
 0x2fd   :  { %v5796_v1 = vadd.f32 %v3821_v21, %v2515_v12  ;;  %v5798_v56 = vadd.f32 %v3821_v21, %v2516_v63  ;;  %v5802_v52 = vmul.f32 %v6165_v31, %v6164_v30  ;;  %v5804_v41 = vadd.f32 %v3821_v21, %v2517_v42  ;;  %v6177_v12 = vld [vmem:[#allocation52_spill] sm:$0xff] }
 0x2fe   :  { %v5806_v39 = vadd.f32 %v3821_v21, %v2518_v20  ;;  %v5808_v5 = vadd.f32 %v3821_v21, %v2519_v38  ;;  %v5810_v59 = vadd.f32 %v3821_v21, %v2520_v25  ;;  %v3332_v4 = vmul.f32 -1.442695, %v5794_v7 }
 0x2ff   :  { %v3333_v57 = vmul.f32 -1.442695, %v5796_v1  ;;  %v3334_v17 = vmul.f32 -1.442695, %v5798_v56  ;;  %3778 = vrcp.f32 %v6166_v62  ;;  %v5816_v49 = vadd.f32 %v3821_v21, %v2521_v2 }
 0x300   :  { %v3335_v55 = vmul.f32 -1.442695, %v5804_v41  ;;  %v2586_v6 = vadd.f32 %v6168_v26, %v6167_v32  ;;  %3780 = vpow2.f32 %v3332_v4  ;;  %v3336_v0 = vmul.f32 -1.442695, %v5806_v39 }
 0x301   :  { %v5824_v44 = vmul.f32 %v6170_v16, %v6169_v34  ;;  %3782 = vpow2.f32 %v3333_v57  ;;  %v3337_v8 = vmul.f32 -1.442695, %v5808_v5  ;;  %v3338_v48 = vmul.f32 -1.442695, %v5810_v59 }
 0x302   :  { %v2587_v14 = vadd.f32 %v2586_v6, %v5802_v52  ;;  %3784 = vpow2.f32 %v3334_v17  ;;  %v3339_v51 = vmul.f32 -1.442695, %v5816_v49  ;;  %v5832_v54 = vmul.f32 %v6172_v53, %v6171_v24 }
 0x303   :  { %3786 = vpow2.f32 %v3335_v55  ;;  %v5837_v27 = vmul.f32 %v6174_v46, %v6173_v13  ;;  %v5842_v23 = vmul.f32 %v6176_v45, %v6175_v35 }
 0x304   :  { %3788 = vpow2.f32 %v3336_v0  ;;  %v2588_v22 = vadd.f32 %v2587_v14, %v5824_v44 }
 0x305   :  { %3790 = vpow2.f32 %v3337_v8 }
 0x306   :  { %3792 = vpow2.f32 %v3338_v48  ;;  %v2589_v47 = vadd.f32 %v2588_v22, %v5832_v54 }
 0x307   :  { %3794 = vpow2.f32 %v3339_v51 }
 0x308   :  { %v2590_v3 = vadd.f32 %v2589_v47, %v5837_v27 }
 0x309   :  { %v3779_v28 = vpop.eup %3778 }
 0x30a   :  { %v3781_v43 = vpop.eup %3780  ;;  %v2591_v60 = vadd.f32 %v2590_v3, %v5842_v23  ;;  %v5847_v63 = vmul.f32 %v3779_v28, %v6177_v12  ;;  %v3660_v3 = vld [vmem:[#allocation15] sm:$0xff]  }
 0x30b   :  { %v3783_v61 = vpop.eup %3782  ;;  %v2554_v50 = vadd.f32 1.0, %v3781_v43  ;;  %3567 = vmatpush3.bf16.msra.mxu0 %v3660_v3 }
 0x30c   :  { %v3785_v58 = vpop.eup %3784  ;;  %v2555_v37 = vadd.f32 1.0, %v3783_v61  ;;  %v2592_v20 = vadd.f32 %v2591_v60, %v5847_v63  ;;  %v3340_v60 = vld [vmem:[#allocation14] ss:$0 sm:$0xff] }
 0x30d   :  { %v3787_v15 = vpop.eup %3786  ;;  %v2556_v11 = vadd.f32 1.0, %v3785_v58  ;;  %3796 = vrcp.f32 %v2554_v50 }
 0x30e   :  { %v3789_v10 = vpop.eup %3788  ;;  %v2557_v18 = vadd.f32 1.0, %v3787_v15  ;;  %3798 = vrcp.f32 %v2555_v37  ;;  %v2593_v31 = vrot.slane %v2592_v20, 4 }
 0x30f   :  { %v3791_v29 = vpop.eup %3790  ;;  %v2558_v36 = vadd.f32 1.0, %v3789_v10  ;;  %3800 = vrcp.f32 %v2556_v11  ;;  %v6178_v10 = vmov 0.0  }
 0x310   :  { %v3793_v19 = vpop.eup %3792  ;;  %v2559_v9 = vadd.f32 1.0, %v3791_v29  ;;  %3802 = vrcp.f32 %v2557_v18  ;;  %3568 = vmatprep.subr.bf16.mxu0 %v6178_v10  ;;  %v3661_v18 = vld [vmem:[#allocation15 + $0x8] sm:$0xff]   ;;  %v3662_v29 = vld [vmem:[#allocation15 + $0x10] sm:$0xff]  }
 0x311   :  { %v3795_v33 = vpop.eup %3794  ;;  %v2560_v40 = vadd.f32 1.0, %v3793_v19  ;;  %3804 = vrcp.f32 %v2558_v36  ;;  %3569 = vmatpush3.bf16.msra.mxu0 %v3661_v18  ;;  %v3663_v36 = vld [vmem:[#allocation15 + $0x18] sm:$0xff]   ;;  %v3664_v19 = vld [vmem:[#allocation15 + $0x20] sm:$0xff]  }
 0x312   :  { %3806 = vrcp.f32 %v2559_v9  ;;  %v2561_v42 = vadd.f32 1.0, %v3795_v33  ;;  %3570 = vmatprep.subr.bf16.mxu0 %v6178_v10  ;;  %v3665_v9 = vld [vmem:[#allocation15 + $0x28] sm:$0xff]   ;;  %v3666_v33 = vld [vmem:[#allocation15 + $0x30] sm:$0xff]  }
 0x313   :  { %3808 = vrcp.f32 %v2560_v40  ;;  %v3667_v40 = vld [vmem:[#allocation15 + $0x38] sm:$0xff]  }
 0x314   :  { %3810 = vrcp.f32 %v2561_v42 }
 0x315   :  { %3571 = vmatpush3.bf16.msra.mxu0 %v3662_v29 }
 0x316   :  { %3572 = vmatprep.subr.bf16.mxu0 %v6178_v10 }
 0x317   :  { %v3797_v38 = vpop.eup %3796 }
 0x318   :  { %v3799_v25 = vpop.eup %3798  ;;  %v5851_v21 = vmul.f32 %v3797_v38, %v5794_v7  ;;  %v2594_v7 = vadd.f32 %v2593_v31, %v2592_v20 }
 0x319   :  { %v3801_v2 = vpop.eup %3800  ;;  %v5854_v30 = vmul.f32 %v3799_v25, %v5796_v1  ;;  %3573 = vmatpush3.bf16.msra.mxu0 %v3663_v36 }
 0x31a   :  { %v3803_v4 = vpop.eup %3802  ;;  %v5857_v57 = vmul.f32 %v3801_v2, %v5798_v56  ;;  %3574 = vmatprep.subr.bf16.mxu0 %v6178_v10 }
 0x31b   :  { %v3805_v17 = vpop.eup %3804  ;;  %v5860_v62 = vmul.f32 %v3803_v4, %v5804_v41  ;;  %v2599_v55 = vadd.f32 %v5854_v30, %v5851_v21  ;;  %v2595_v41 = vrot.slane %v2594_v7, 2 }
 0x31c   :  { %v3807_v6 = vpop.eup %3806  ;;  %v5865_v0 = vmul.f32 %v3805_v17, %v5806_v39 }
 0x31d   :  { %v2600_v1 = vadd.f32 %v2599_v55, %v5857_v57  ;;  %v3809_v34 = vpop.eup %3808  ;;  %v5869_v16 = vmul.f32 %v3807_v6, %v5808_v5  ;;  %v2596_v24 = vadd.f32 %v2595_v41, %v2594_v7  ;;  %3575 = vmatpush3.bf16.msra.mxu0 %v3664_v19  ;;  %v3668_v7 = vld [vmem:[#allocation18] sm:$0xff]  }
 0x31e   :  { %v5873_v8 = vmul.f32 %v3809_v34, %v5810_v59  ;;  %v3811_v48 = vpop.eup %3810  ;;  %3576 = vmatprep.subr.bf16.mxu0 %v6178_v10  ;;  %3586 = vmatprep.subr.bf16.mxu1 %v3668_v7  ;;  %v3670_v34 = vld [vmem:[#allocation18 + $0x10] sm:$0xff]   ;;  %v3672_v41 = vld [vmem:[#allocation18 + $0x20] sm:$0xff]  }
 0x31f   :  { %v2601_v56 = vadd.f32 %v2600_v1, %v5860_v62  ;;  %v5878_v39 = vmul.f32 %v3811_v48, %v5816_v49  ;;  %v2597_v22 = vrot.slane %v2596_v24, 1  ;;  %v3669_v1 = vld [vmem:[#allocation18 + $0x8] sm:$0xff]   ;;  %v3674_v48 = vld [vmem:[#allocation18 + $0x30] sm:$0xff]  }
 0x321   :  { %v2602_v14 = vadd.f32 %v2601_v56, %v5865_v0  ;;  %v2598_v46 = vadd.f32 %v2597_v22, %v2596_v24  ;;  %3577 = vmatpush3.bf16.msra.mxu0 %v3665_v9  ;;  %v3671_v56 = vld [vmem:[#allocation18 + $0x18] sm:$0xff]  }
 0x322   :  { %3578 = vmatprep.subr.bf16.mxu0 %v6178_v10  ;;  %v3350_v24 = vld [vmem:[#allocation17] ss:$0 sm:$0xff] }
 0x323   :  { %v2603_v51 = vadd.f32 %v2602_v14, %v5869_v16  ;;  %v2613_v61 = vmul.f32 0.015625, %v2598_v46  ;;  %v3673_v14 = vld [vmem:[#allocation18 + $0x28] sm:$0xff]  }
 0x325   :  { %v2604_v53 = vadd.f32 %v2603_v51, %v5873_v8  ;;  %v2615_v37 = vpack.c.bf16 %v2613_v61, %v2613_v61  ;;  %3579 = vmatpush3.bf16.msra.mxu0 %v3666_v33  ;;  %v3675_v51 = vld [vmem:[#allocation18 + $0x38] sm:$0xff]  }
 0x326   :  { %3580 = vmatprep.subr.bf16.mxu0 %v6178_v10 }
 0x327   :  { %v2605_v5 = vadd.f32 %v2604_v53, %v5878_v39  ;;  %v2642_v49 = vunpack.c.l.b16 %v2615_v37 }
 0x329   :  { %v2606_v28 = vrot.slane %v2605_v5, 4  ;;  %3581 = vmatpush3.bf16.msra.mxu0 %v3667_v40 }
 0x32b   :  { %v2607_v13 = vadd.f32 %v2606_v28, %v2605_v5 }
 0x32d   :  { %v2608_v59 = vrot.slane %v2607_v13, 2 }
 0x32f   :  { %v2609_v47 = vadd.f32 %v2608_v59, %v2607_v13 }
 0x331   :  { %v2610_v43 = vrot.slane %v2609_v47, 1 }
 0x333   :  { %v2611_v50 = vadd.f32 %v2610_v43, %v2609_v47  ;;  %v4124_v43 = vmov 1966171168  }
 0x334   :  { %v2863_v61 = vunpack.c.l.s4 %v4124_v43 }
 0x335   :  { %v2614_v58 = vmul.f32 0.015625, %v2611_v50 }
 0x336   :  { %v2864_v50 = vunpack.c.0.s8 %v2863_v61  ;;  %v3825_v61 = vld [vmem:[#allocation3 + $0x10] sm:$0xff]  }
 0x337   :  { %v2616_v15 = vpack.c.bf16 %v2614_v58, %v2614_v58  ;;  %v6179_v58 = vld [vmem:[#allocation29_spill] sm:$0xff] }
 0x338   :  { %v2867_v37 = vsub.s32 %v2864_v50, %v6179_v58  ;;  %v3090_v50 = vunpack.c.l.bf16 %v3825_v61 }
 0x339   :  { %v2643_v35 = vunpack.c.l.b16 %v2616_v15 }
 0x33b   :  { %v2645_v45 = vsel %vm2644_vm13, %v2643_v35, %v2642_v49 }
 0x33c   :  { %v2646_v11 = vpack.c.b16 %v2645_v45, %v2645_v45 }
 0x33e   :  { %3563 = vmatmul.mubr.bf16.vlgmr.msra.gmra.mrb[0].mxu1 %v2646_v11  ;;  %v6180_v11 = vld [vmem:[#allocation30_spill] sm:$0xff] }
 0x33f   :  { %3587 = vmatpush3.bf16.msra.mxu1 %v3668_v7 }
 0x340   :  { %3588 = vmatprep.subr.bf16.mxu1 %v3669_v1 }
 0x343   :  { %3589 = vmatpush3.bf16.msra.mxu1 %v3669_v1 }
 0x344   :  { %3590 = vmatprep.subr.bf16.mxu1 %v3670_v34 }
 0x347   :  { %3591 = vmatpush3.bf16.msra.mxu1 %v3670_v34 }
 0x348   :  { %3592 = vmatprep.subr.bf16.mxu1 %v3671_v56 }
 0x34b   :  { %3593 = vmatpush3.bf16.msra.mxu1 %v3671_v56 }
 0x34c   :  { %3594 = vmatprep.subr.bf16.mxu1 %v3672_v41 }
 0x34f   :  { %3595 = vmatpush3.bf16.msra.mxu1 %v3672_v41 }
 0x350   :  { %3596 = vmatprep.subr.bf16.mxu1 %v3673_v14 }
 0x353   :  { %3597 = vmatpush3.bf16.msra.mxu1 %v3673_v14 }
 0x354   :  { %3598 = vmatprep.subr.bf16.mxu1 %v3674_v48 }
 0x357   :  { %3599 = vmatpush3.bf16.msra.mxu1 %v3674_v48 }
 0x358   :  { %3600 = vmatprep.subr.bf16.mxu1 %v3675_v51 }
 0x35b   :  { %3601 = vmatpush3.bf16.msra.mxu1 %v3675_v51 }
 0x411   :  { %v2730_v12 = vpop.f32.mrb[0].mxu1 }
 0x412   :  { %v2731_v42 = vadd.f32 %v3340_v60, %v2730_v12  ;;  %v3564_v20 = vpop.f32.mrb[1].mxu1 }
 0x413   :  { %v2733_v38 = vpop.f32.mrb[2].mxu1 }
 0x414   :  { %v3349_v25 = vmul.f32 -1.442695, %v2731_v42  ;;  %v3565_v2 = vpop.f32.mrb[3].mxu1 }
 0x416   :  { %3812 = vpow2.f32 %v3349_v25 }
 0x420   :  { %v3813_v31 = vpop.eup %3812 }
 0x421   :  { %v2739_v4 = vadd.f32 1.0, %v3813_v31 }
 0x423   :  { %3814 = vrcp.f32 %v2739_v4  ;;  %v5908_v4 = vld [vmem:[#allocation20] ss:$0 sm:$0xff] }
 0x42d   :  { %v3815_v17 = vpop.eup %3814 }
 0x42e   :  { %v2742_v55 = vmul.f32 %v3815_v17, %v2731_v42  ;;  %v3822_v17 = vld [vmem:[#allocation3] sm:$0xff]  }
 0x42f   :  { %v3087_v1 = vunpack.c.h.bf16 %v3822_v17 }
 0x430   :  { %v2743_v6 = vpack.c.bf16 %v2742_v55, %v2742_v55 }
 0x432   :  { %3583 = vmatmul.mubr.bf16.vlgmr.msra.gmra.mrb[16].mxu0 %v2743_v6 }
 0x505   :  { %v2849_v53 = vpop.f32.mrb[16].mxu0 }
 0x506   :  { %v2850_v5 = vadd.f32 %v3350_v24, %v2849_v53  ;;  %v3584_v22 = vpop.f32.mrb[17].mxu0 }
 0x507   :  { %v2852_v28 = vpop.f32.mrb[18].mxu0 }
 0x508   :  { %v3359_v13 = vmul.f32 -1.442695, %v2850_v5  ;;  %v3585_v46 = vpop.f32.mrb[19].mxu0 }
 0x50a   :  { %3816 = vpow2.f32 %v3359_v13  ;;  %v3824_v13 = vld [vmem:[#allocation3 + $0x18] sm:$0xff]  }
 0x50b   :  { %v3092_v46 = vunpack.c.l.bf16 %v3824_v13 }
 0x514   :  { %v3817_v59 = vpop.eup %3816 }
 0x515   :  { %v2858_v47 = vadd.f32 1.0, %v3817_v59 }
 0x517   :  { %3818 = vrcp.f32 %v2858_v47  ;;  %v3093_v47 = vunpack.c.h.bf16 %v3824_v13 }
 0x521   :  { %v3819_v15 = vpop.eup %3818 }
 0x522   :  { %v2868_v49 = vrot.slane %v3819_v15, %v2867_v37 }
 0x524   :  { %v2869_v35 = vcombine.high %v2868_v49, %v2868_v49  ;;  %v2876_v45 = vrot.slane %v2868_v49, %v2867_v37 }
 0x526   :  { %v2887_v3 = vrot.slane %v2876_v45, %v6180_v11  ;;  %v2883_v10 = vrot.slane %v2869_v35, %v2867_v37  ;;  %v3091_v37 = vunpack.c.h.bf16 %v3825_v61 }
 0x528   :  { %v2894_v18 = vmul.f32 %v2887_v3, %v6167_v32  ;;  %v2895_v29 = vmul.f32 %v2887_v3, %v6168_v26  ;;  %v2896_v36 = vmul.f32 %v2887_v3, %v5802_v52  ;;  %v2897_v19 = vmul.f32 %v2887_v3, %v5824_v44 }
 0x529   :  { %v2898_v9 = vmul.f32 %v2887_v3, %v5832_v54  ;;  %v2899_v33 = vmul.f32 %v2887_v3, %v5837_v27  ;;  %v2891_v12 = vrot.slane %v2883_v10, %v6180_v11  ;;  %v2900_v32 = vmul.f32 %v2887_v3, %v5842_v23 }
 0x52a   :  { %v2910_v40 = vpack.c.bf16 %v2895_v29, %v2894_v18  ;;  %v2911_v60 = vpack.c.bf16 %v2897_v19, %v2896_v36  ;;  %v2901_v26 = vmul.f32 %v2887_v3, %v5847_v63 }
 0x52b   :  { %v2912_v42 = vpack.c.bf16 %v2899_v33, %v2898_v9  ;;  %v2902_v52 = vmul.f32 %v2891_v12, %v5851_v21  ;;  %v2903_v44 = vmul.f32 %v2891_v12, %v5854_v30  ;;  %v2904_v27 = vmul.f32 %v2891_v12, %v5857_v57  ;;  %v3826_v9 = vld [vmem:[#allocation3 + $0x28] sm:$0xff]  }
 0x52c   :  { %3602 = vmatprep.mubr.bf16.mxu1 %v2910_v40  ;;  %v2913_v20 = vpack.c.bf16 %v2901_v26, %v2900_v32  ;;  %v2905_v38 = vmul.f32 %v2891_v12, %v5860_v62  ;;  %v2906_v25 = vmul.f32 %v2891_v12, %v5865_v0  ;;  %v2907_v2 = vmul.f32 %v2891_v12, %v5869_v16  ;;  %v3823_v0 = vld [vmem:[#allocation3 + $0x8] sm:$0xff]  }
 0x52d   :  { %3603 = vmatmul.mubr.bf16.vlgmr.msra.gmra.mrb[4].mxu1 %v2911_v60  ;;  %v2914_v54 = vpack.c.bf16 %v2903_v44, %v2902_v52  ;;  %v2908_v63 = vmul.f32 %v2891_v12, %v5873_v8  ;;  %v2909_v21 = vmul.f32 %v2891_v12, %v5878_v39  ;;  %v3086_v57 = vunpack.c.l.bf16 %v3822_v17 }
 0x52e   :  { %3606 = vmatprep.mubr.bf16.mxu1 %v2912_v42  ;;  %v2915_v31 = vpack.c.bf16 %v2905_v38, %v2904_v27  ;;  %v2916_v23 = vpack.c.bf16 %v2907_v2, %v2906_v25  ;;  %v3088_v6 = vunpack.c.l.bf16 %v3823_v0  ;;  %v3089_v7 = vunpack.c.h.bf16 %v3823_v0  ;;  %v3827_v42 = vld [vmem:[#allocation3 + $0x20] sm:$0xff]   ;;  %v3829_v0 = vld [vmem:[#allocation3 + $0x30] sm:$0xff]  }
 0x52f   :  { %v2917_v30 = vpack.c.bf16 %v2909_v21, %v2908_v63  ;;  %v3096_v33 = vunpack.c.l.bf16 %v3826_v9  ;;  %v3097_v60 = vunpack.c.h.bf16 %v3826_v9  ;;  %v3094_v32 = vunpack.c.l.bf16 %v3827_v42 }
 0x530   :  { %v3095_v52 = vunpack.c.h.bf16 %v3827_v42 }
 0x535   :  { %3607 = vmatmul.mubr.bf16.gmra.mrb[8].mxu1 %v2913_v20 }
 0x536   :  { %3610 = vmatprep.mubr.bf16.mxu1 %v2914_v54 }
 0x53d   :  { %3611 = vmatmul.mubr.bf16.gmra.mrb[12].mxu1 %v2915_v31 }
 0x53e   :  { %3614 = vmatprep.mubr.bf16.mxu1 %v2916_v23 }
 0x545   :  { %3615 = vmatmul.mubr.bf16.gmra.mrb[16].mxu1 %v2917_v30  ;;  %v3828_v30 = vld [vmem:[#allocation3 + $0x38] sm:$0xff]  }
 0x546   :  { %v3100_v17 = vunpack.c.l.bf16 %v3828_v30 }
 0x600   :  { %v3604_v55 = vpop.f32.mrb[4].mxu1 }
 0x601   :  { %v3032_v62 = vadd.f32 %v3604_v55, %v5908_v4  ;;  %v3023_v16 = vpop.f32.mrb[5].mxu1  ;;  %v3101_v55 = vunpack.c.h.bf16 %v3828_v30 }
 0x602   :  { %v3024_v34 = vadd.f32 %v5908_v4, %v3023_v16  ;;  %v3605_v56 = vpop.f32.mrb[6].mxu1 }
 0x603   :  { %v3035_v8 = vadd.f32 %v3605_v56, %v5908_v4  ;;  %v3026_v39 = vpop.f32.mrb[7].mxu1  ;;  %v3104_v48 = vadd.f32 %v3088_v6, %v3032_v62  ;;  %v3098_v6 = vunpack.c.l.bf16 %v3829_v0 }
 0x604   :  { %v3102_v41 = vadd.f32 %v3086_v57, %v3024_v34  ;;  %v3027_v14 = vadd.f32 %v5908_v4, %v3026_v39 }
 0x605   :  { %v3105_v51 = vadd.f32 %v3089_v7, %v3035_v8  ;;  %v3099_v7 = vunpack.c.h.bf16 %v3829_v0 }
 0x606   :  { %v3103_v24 = vadd.f32 %v3087_v1, %v3027_v14 }
 0x607   :  { %v3425_v53 = vpack.c.bf16 %v3105_v51, %v3104_v48 }
 0x608   :  { %v3420_v5 = vpack.c.bf16 %v3103_v24, %v3102_v41  ;;  %v3608_v22 = vpop.f32.mrb[8].mxu1 }
 0x609   :  { %3457 = vst [vmem:[#allocation21 + $0x8] sm:$0xff] %v3425_v53   ;;  %v3048_v28 = vadd.f32 %v3608_v22, %v5908_v4  ;;  %v3039_v59 = vpop.f32.mrb[9].mxu1 }
 0x60a   :  { %3421 = vst [vmem:[#allocation21] sm:$0xff] %v3420_v5   ;;  %v3040_v43 = vadd.f32 %v5908_v4, %v3039_v59  ;;  %v3609_v58 = vpop.f32.mrb[10].mxu1 }
 0x60b   :  { %v3051_v15 = vadd.f32 %v3609_v58, %v5908_v4  ;;  %v3042_v49 = vpop.f32.mrb[11].mxu1  ;;  %v3108_v45 = vadd.f32 %v3092_v46, %v3048_v28 }
 0x60c   :  { %v3043_v35 = vadd.f32 %v5908_v4, %v3042_v49  ;;  %v3106_v3 = vadd.f32 %v3090_v50, %v3040_v43 }
 0x60d   :  { %v3109_v11 = vadd.f32 %v3093_v47, %v3051_v15 }
 0x60e   :  { %v3107_v10 = vadd.f32 %v3091_v37, %v3043_v35 }
 0x60f   :  { %v3435_v18 = vpack.c.bf16 %v3109_v11, %v3108_v45 }
 0x610   :  { %v3430_v29 = vpack.c.bf16 %v3107_v10, %v3106_v3  ;;  %v3612_v36 = vpop.f32.mrb[12].mxu1 }
 0x611   :  { %3459 = vst [vmem:[#allocation21 + $0x18] sm:$0xff] %v3435_v18   ;;  %v3064_v19 = vadd.f32 %v3612_v36, %v5908_v4  ;;  %v3055_v40 = vpop.f32.mrb[13].mxu1 }
 0x612   :  { %3458 = vst [vmem:[#allocation21 + $0x10] sm:$0xff] %v3430_v29   ;;  %v3056_v12 = vadd.f32 %v5908_v4, %v3055_v40  ;;  %v3613_v26 = vpop.f32.mrb[14].mxu1 }
 0x613   :  { %v3067_v44 = vadd.f32 %v3613_v26, %v5908_v4  ;;  %v3058_v20 = vpop.f32.mrb[15].mxu1  ;;  %v3112_v27 = vadd.f32 %v3096_v33, %v3064_v19 }
 0x614   :  { %v3059_v54 = vadd.f32 %v5908_v4, %v3058_v20  ;;  %v3110_v25 = vadd.f32 %v3094_v32, %v3056_v12 }
 0x615   :  { %v3113_v38 = vadd.f32 %v3097_v60, %v3067_v44 }
 0x616   :  { %v3111_v2 = vadd.f32 %v3095_v52, %v3059_v54 }
 0x617   :  { %v3445_v31 = vpack.c.bf16 %v3113_v38, %v3112_v27 }
 0x618   :  { %v3440_v23 = vpack.c.bf16 %v3111_v2, %v3110_v25  ;;  %v3616_v63 = vpop.f32.mrb[16].mxu1 }
 0x619   :  { %3461 = vst [vmem:[#allocation21 + $0x28] sm:$0xff] %v3445_v31   ;;  %v3080_v21 = vadd.f32 %v3616_v63, %v5908_v4  ;;  %v3071_v57 = vpop.f32.mrb[17].mxu1 }
 0x61a   :  { %3460 = vst [vmem:[#allocation21 + $0x20] sm:$0xff] %v3440_v23   ;;  %v3072_v62 = vadd.f32 %v5908_v4, %v3071_v57  ;;  %v3617_v16 = vpop.f32.mrb[18].mxu1 }
 0x61b   :  { %v3083_v1 = vadd.f32 %v3617_v16, %v5908_v4  ;;  %v3074_v34 = vpop.f32.mrb[19].mxu1  ;;  %v3116_v8 = vadd.f32 %v3100_v17, %v3080_v21 }
 0x61c   :  { %v3075_v56 = vadd.f32 %v5908_v4, %v3074_v34  ;;  %v3114_v41 = vadd.f32 %v3098_v6, %v3072_v62 }
 0x61d   :  { %v3117_v39 = vadd.f32 %v3101_v55, %v3083_v1 }
 0x61e   :  { %v3115_v14 = vadd.f32 %v3099_v7, %v3075_v56 }
 0x61f   :  { %v3455_v48 = vpack.c.bf16 %v3117_v39, %v3116_v8 }
 0x620   :  { %v3450_v51 = vpack.c.bf16 %v3115_v14, %v3114_v41 }
 0x621   :  { %3463 = vst [vmem:[#allocation21 + $0x38] sm:$0xff] %v3455_v48  }
 0x622   :  { %3462 = vst [vmem:[#allocation21 + $0x30] sm:$0xff] %v3450_v51  }
 0x623   :  { %4083 = shalt.err (!%p4080_p8)
}
 0x624   :  { %s4084_s28 = scalar_lea.hbm %s5952_s11, 1024 }
 0x625   :  { %p4085_p9 = scmp.ne.s32.totalorder %s5952_s11, %s4084_s28  ;;  %p4088_p10 = scmp.lt.u32.totalorder %s4084_s28, %s5952_s11 }
 0x627   :  { %p4090_p11 = pnand %p4088_p10, %p4085_p9 }
 0x629   :  { %4093 = shalt.err (!%p4090_p11)
}
 0x62a   :  { %3209 = dma.vmem_to_hbm [thread:$0]  %s3204_s3, 1024, %s5952_s11, [#allocation5], %s4110_s29, %s4110_s29, %s4111_s30  }
 0x62b   :  { %4106 = dma.done.wait [#allocation5], 1024  }
 0x62c   :  { %4107 = vsyncadd [#allocation5], 4294966272 }
 0x62d   :  { %3213 = vsyncpa [#allocation4], 1 }
 0x62e   :  { %3214 = vsyncpa [#allocation7], 1 }
 0x62f   :  { %3215 = vsyncpa [#allocation10], 1 }
 0x630   :  { %3216 = vsyncpa [#allocation13], 1 }
 0x631   :  { %3217 = vsyncpa [#allocation16], 1 }
 0x632   :  { %3218 = vsyncpa [#allocation19], 1 }
 0x633   :  { %3219 = vsyncpa [#allocation5], 1 }

</bundles_post_ra>
